<compile_context>
chip_gen: v7x
topology: tpu7x:2x2x1
jax: 0.10.0
libtpu: 0.0.40
codegen_flags: <defaults>
</compile_context>

<pallas_src>
import jax
import jax.numpy as jnp
from jax import lax
from jax.experimental import pallas as pl
from jax.experimental.pallas import tpu as pltpu

KH, KW = 3, 3
LANE = 128
# 384 = 3*128: two channel blocks for C=672 (384 + 288).  Two "parallel" blocks feed v7x's
# 2 TensorCores; on single-core v5e/v6e the extra grid step costs only ~0.35us and buys
# DMA/compute overlap.
C_BLK_MAX = 3 * LANE


def _round_up(v, m):
    return ((v + m - 1) // m) * m


def _dw3x3_kernel(x_ref, w_ref, o_ref):
    """One (batch, channel-block) grid step.

    x_ref: (H, W, Cb)   unpadded input block, channels on lanes
    w_ref: (9, 1, Cb)   per-tap weight rows (tap order dh*3+dw), broadcast in the multiply
    o_ref: (H, W, Cb)
    """
    H, W, _ = o_ref.shape
    f32 = jnp.float32

    # h-invariant loads hoisted out of the row loop (static addresses, replicated layout).
    wts = [w_ref[t].astype(f32) for t in range(KH * KW)]          # 9 x (1, Cb)
    zero_row = jnp.zeros((1,) + o_ref.shape[2:], f32)             # (1, Cb)

    def shift_right(v):   # out[w] = v[w-1], out[0] = 0      -> realizes the dw=0 taps + left halo
        return jnp.concatenate([zero_row, v[:-1]], axis=0)

    def shift_left(v):    # out[w] = v[w+1], out[W-1] = 0    -> realizes the dw=2 taps + right halo
        return jnp.concatenate([v[1:], zero_row], axis=0)

    # Fully static unroll over output rows: all row/tap indices are compile-time constants,
    # out-of-range dh taps are simply skipped (that *is* the H halo).
    for h in range(H):
        p0 = p1 = p2 = None
        for dh in range(KH):
            r = h + dh - 1
            if r < 0 or r >= H:
                continue
            row = x_ref[r].astype(f32)                            # (W, Cb), aligned full-row load
            t = dh * KW
            p0 = row * wts[t + 0] if p0 is None else p0 + row * wts[t + 0]
            p1 = row * wts[t + 1] if p1 is None else p1 + row * wts[t + 1]
            p2 = row * wts[t + 2] if p2 is None else p2 + row * wts[t + 2]
        # Combine the three width taps by shifting the per-column partial sums; the zero fill
        # entering at the boundary implements the W padding exactly.
        acc = p1 + shift_right(p0) + shift_left(p2)
        o_ref[h] = acc.astype(o_ref.dtype)


def _prep_weights(w_oihw):
    """(C, 1, 3, 3) PyTorch depthwise weights -> (9, 1, C) tap rows (tap = dh*3+dw)."""
    C = w_oihw.shape[0]
    return jnp.transpose(w_oihw.reshape(C, KH * KW), (1, 0))[:, None, :]


def depthwise_conv3x3_nhwc(x_nhwc, w_taps):
    """x_nhwc: (N, H, W, C); w_taps: (9, 1, C). Returns (N, H, W, C). Preferred entry point."""
    N, H, W, C = x_nhwc.shape

    c_blk = min(C_BLK_MAX, _round_up(C, LANE))
    n_cblk = pl.cdiv(C, c_blk)

    return pl.pallas_call(
        _dw3x3_kernel,
        out_shape=jax.ShapeDtypeStruct((N, H, W, C), x_nhwc.dtype),
        grid_spec=pltpu.PrefetchScalarGridSpec(
            num_scalar_prefetch=0,
            grid=(N, n_cblk),
            in_specs=[
                pl.BlockSpec((pl.Squeezed(), H, W, c_blk),
                             lambda n, c: (n, 0, 0, c)),
                pl.BlockSpec((KH * KW, 1, c_blk),
                             lambda n, c: (0, 0, c)),
            ],
            out_specs=pl.BlockSpec((pl.Squeezed(), H, W, c_blk),
                                   lambda n, c: (n, 0, 0, c)),
        ),
        compiler_params=pltpu.CompilerParams(
            dimension_semantics=("parallel", "parallel")),
    )(x_nhwc, w_taps)


@jax.jit
def module_forward(x_nchw, w_oihw):
    """Matches M.forward: NCHW in, NCHW out. w_oihw: (C, 1, 3, 3) depthwise weights."""
    # The two layout transposes exist only to honor the PyTorch NCHW contract; in an NHWC
    # pipeline call depthwise_conv3x3_nhwc directly and they disappear.
    x_nhwc = jnp.transpose(x_nchw, (0, 2, 3, 1))        # NCHW -> NHWC (channels on lanes)
    w_taps = _prep_weights(w_oihw)                      # (9, 1, C), tiny
    y_nhwc = depthwise_conv3x3_nhwc(x_nhwc, w_taps)
    return jnp.transpose(y_nhwc, (0, 3, 1, 2))          # NHWC -> NCHW


if __name__ == "__main__":
    N, C, H, W = 1, 672, 14, 14  # shapes implied by the module's forward

    key = jax.random.PRNGKey(0)
    kx, kw = jax.random.split(key)
    x = jax.random.normal(kx, (N, C, H, W), dtype=jnp.float32)
    # Deterministic synthetic depthwise weights, PyTorch layout (out_ch, in_ch/groups=1, 3, 3).
    w = jax.random.normal(kw, (C, 1, KH, KW), dtype=jnp.float32) * 0.1

    y = module_forward(x, w)
    y = jax.block_until_ready(y)
    assert y.shape == (N, C, H, W), y.shape

    # Reference check against XLA's grouped convolution.
    y_ref = lax.conv_general_dilated(
        x, w, window_strides=(1, 1), padding=((1, 1), (1, 1)),
        feature_group_count=C,
        dimension_numbers=("NCHW", "OIHW", "NCHW"))
    assert jnp.allclose(y, y_ref, atol=1e-4, rtol=1e-4), float(jnp.max(jnp.abs(y - y_ref)))

    print("KERNEL_OK")
</pallas_src>

<mosaic_0001>
module attributes {stable_mosaic.version = 11 : i64} {
  func.func @_dw3x3_kernel(%arg0: i32, %arg1: i32, %arg2: memref<1x14x14x384xf32, #tpu.memory_space<vmem>>, %arg3: memref<9x1x384xf32, #tpu.memory_space<vmem>>, %arg4: memref<1x14x14x384xf32, #tpu.memory_space<vmem>>) attributes {dimension_semantics = [#tpu.dimension_semantics<parallel>, #tpu.dimension_semantics<parallel>], iteration_bounds = array<i64: 1, 2>, scalar_prefetch = 0 : i64, scratch_operands = 0 : i64, tpu.core_type = #tpu.core_type<tc>, window_params = [{transform_indices = @transform_0, window_bounds = array<i64: 1, 14, 14, 384>}, {transform_indices = @transform_1, window_bounds = array<i64: 9, 1, 384>}, {transform_indices = @transform_2, window_bounds = array<i64: 1, 14, 14, 384>}]} {
    %c0 = arith.constant 0 : index
    %c0_0 = arith.constant 0 : index
    %c0_1 = arith.constant 0 : index
    %0 = vector.load %arg3[%c0, %c0_0, %c0_1] : memref<9x1x384xf32, #tpu.memory_space<vmem>>, vector<1x1x384xf32>
    %1 = vector.shape_cast %0 : vector<1x1x384xf32> to vector<1x384xf32>
    %c1 = arith.constant 1 : index
    %c0_2 = arith.constant 0 : index
    %c0_3 = arith.constant 0 : index
    %2 = vector.load %arg3[%c1, %c0_2, %c0_3] : memref<9x1x384xf32, #tpu.memory_space<vmem>>, vector<1x1x384xf32>
    %3 = vector.shape_cast %2 : vector<1x1x384xf32> to vector<1x384xf32>
    %c2 = arith.constant 2 : index
    %c0_4 = arith.constant 0 : index
    %c0_5 = arith.constant 0 : index
    %4 = vector.load %arg3[%c2, %c0_4, %c0_5] : memref<9x1x384xf32, #tpu.memory_space<vmem>>, vector<1x1x384xf32>
    %5 = vector.shape_cast %4 : vector<1x1x384xf32> to vector<1x384xf32>
    %c3 = arith.constant 3 : index
    %c0_6 = arith.constant 0 : index
    %c0_7 = arith.constant 0 : index
    %6 = vector.load %arg3[%c3, %c0_6, %c0_7] : memref<9x1x384xf32, #tpu.memory_space<vmem>>, vector<1x1x384xf32>
    %7 = vector.shape_cast %6 : vector<1x1x384xf32> to vector<1x384xf32>
    %c4 = arith.constant 4 : index
    %c0_8 = arith.constant 0 : index
    %c0_9 = arith.constant 0 : index
    %8 = vector.load %arg3[%c4, %c0_8, %c0_9] : memref<9x1x384xf32, #tpu.memory_space<vmem>>, vector<1x1x384xf32>
    %9 = vector.shape_cast %8 : vector<1x1x384xf32> to vector<1x384xf32>
    %c5 = arith.constant 5 : index
    %c0_10 = arith.constant 0 : index
    %c0_11 = arith.constant 0 : index
    %10 = vector.load %arg3[%c5, %c0_10, %c0_11] : memref<9x1x384xf32, #tpu.memory_space<vmem>>, vector<1x1x384xf32>
    %11 = vector.shape_cast %10 : vector<1x1x384xf32> to vector<1x384xf32>
    %c6 = arith.constant 6 : index
    %c0_12 = arith.constant 0 : index
    %c0_13 = arith.constant 0 : index
    %12 = vector.load %arg3[%c6, %c0_12, %c0_13] : memref<9x1x384xf32, #tpu.memory_space<vmem>>, vector<1x1x384xf32>
    %13 = vector.shape_cast %12 : vector<1x1x384xf32> to vector<1x384xf32>
    %c7 = arith.constant 7 : index
    %c0_14 = arith.constant 0 : index
    %c0_15 = arith.constant 0 : index
    %14 = vector.load %arg3[%c7, %c0_14, %c0_15] : memref<9x1x384xf32, #tpu.memory_space<vmem>>, vector<1x1x384xf32>
    %15 = vector.shape_cast %14 : vector<1x1x384xf32> to vector<1x384xf32>
    %c8 = arith.constant 8 : index
    %c0_16 = arith.constant 0 : index
    %c0_17 = arith.constant 0 : index
    %16 = vector.load %arg3[%c8, %c0_16, %c0_17] : memref<9x1x384xf32, #tpu.memory_space<vmem>>, vector<1x1x384xf32>
    %17 = vector.shape_cast %16 : vector<1x1x384xf32> to vector<1x384xf32>
    %cst = arith.constant 0.000000e+00 : f32
    %18 = vector.broadcast %cst : f32 to vector<1x384xf32>
    %c0_18 = arith.constant 0 : index
    %c0_19 = arith.constant 0 : index
    %c0_20 = arith.constant 0 : index
    %c0_21 = arith.constant 0 : index
    %19 = vector.load %arg2[%c0_18, %c0_19, %c0_20, %c0_21] : memref<1x14x14x384xf32, #tpu.memory_space<vmem>>, vector<1x1x14x384xf32>
    %20 = vector.shape_cast %19 : vector<1x1x14x384xf32> to vector<14x384xf32>
    %21 = vector.broadcast %7 : vector<1x384xf32> to vector<14x384xf32>
    %22 = arith.mulf %20, %21 : vector<14x384xf32>
    %23 = vector.broadcast %9 : vector<1x384xf32> to vector<14x384xf32>
    %24 = arith.mulf %20, %23 : vector<14x384xf32>
    %25 = vector.broadcast %11 : vector<1x384xf32> to vector<14x384xf32>
    %26 = arith.mulf %20, %25 : vector<14x384xf32>
    %c0_22 = arith.constant 0 : index
    %c1_23 = arith.constant 1 : index
    %c0_24 = arith.constant 0 : index
    %c0_25 = arith.constant 0 : index
    %27 = vector.load %arg2[%c0_22, %c1_23, %c0_24, %c0_25] : memref<1x14x14x384xf32, #tpu.memory_space<vmem>>, vector<1x1x14x384xf32>
    %28 = vector.shape_cast %27 : vector<1x1x14x384xf32> to vector<14x384xf32>
    %29 = vector.broadcast %13 : vector<1x384xf32> to vector<14x384xf32>
    %30 = arith.mulf %28, %29 : vector<14x384xf32>
    %31 = arith.addf %22, %30 : vector<14x384xf32>
    %32 = vector.broadcast %15 : vector<1x384xf32> to vector<14x384xf32>
    %33 = arith.mulf %28, %32 : vector<14x384xf32>
    %34 = arith.addf %24, %33 : vector<14x384xf32>
    %35 = vector.broadcast %17 : vector<1x384xf32> to vector<14x384xf32>
    %36 = arith.mulf %28, %35 : vector<14x384xf32>
    %37 = arith.addf %26, %36 : vector<14x384xf32>
    %38 = vector.extract_strided_slice %31 {offsets = [0, 0], sizes = [13, 384], strides = [1, 1]} : vector<14x384xf32> to vector<13x384xf32>
    %39 = tpu.concatenate %18, %38 in 0 : vector<1x384xf32>, vector<13x384xf32> -> vector<14x384xf32>
    %40 = arith.addf %34, %39 : vector<14x384xf32>
    %41 = vector.extract_strided_slice %37 {offsets = [1, 0], sizes = [13, 384], strides = [1, 1]} : vector<14x384xf32> to vector<13x384xf32>
    %42 = tpu.concatenate %41, %18 in 0 : vector<13x384xf32>, vector<1x384xf32> -> vector<14x384xf32>
    %43 = arith.addf %40, %42 : vector<14x384xf32>
    %c0_26 = arith.constant 0 : index
    %c0_27 = arith.constant 0 : index
    %c0_28 = arith.constant 0 : index
    %c0_29 = arith.constant 0 : index
    %44 = vector.load %arg4[%c0_26, %c0_27, %c0_28, %c0_29] : memref<1x14x14x384xf32, #tpu.memory_space<vmem>>, vector<1x1x14x384xf32>
    %45 = vector.shape_cast %44 : vector<1x1x14x384xf32> to vector<14x384xf32>
    %46 = vector.shape_cast %43 : vector<14x384xf32> to vector<1x1x14x384xf32>
    tpu.vector_store %arg4[%c0_26, %c0_27, %c0_28, %c0_29], %46 {strides = array<i32>} : memref<1x14x14x384xf32, #tpu.memory_space<vmem>>, vector<1x1x14x384xf32>,
    %c0_30 = arith.constant 0 : index
    %c0_31 = arith.constant 0 : index
    %c0_32 = arith.constant 0 : index
    %c0_33 = arith.constant 0 : index
    %47 = vector.load %arg2[%c0_30, %c0_31, %c0_32, %c0_33] : memref<1x14x14x384xf32, #tpu.memory_space<vmem>>, vector<1x1x14x384xf32>
    %48 = vector.shape_cast %47 : vector<1x1x14x384xf32> to vector<14x384xf32>
    %49 = vector.broadcast %1 : vector<1x384xf32> to vector<14x384xf32>
    %50 = arith.mulf %48, %49 : vector<14x384xf32>
    %51 = vector.broadcast %3 : vector<1x384xf32> to vector<14x384xf32>
    %52 = arith.mulf %48, %51 : vector<14x384xf32>
    %53 = vector.broadcast %5 : vector<1x384xf32> to vector<14x384xf32>
    %54 = arith.mulf %48, %53 : vector<14x384xf32>
    %c0_34 = arith.constant 0 : index
    %c1_35 = arith.constant 1 : index
    %c0_36 = arith.constant 0 : index
    %c0_37 = arith.constant 0 : index
    %55 = vector.load %arg2[%c0_34, %c1_35, %c0_36, %c0_37] : memref<1x14x14x384xf32, #tpu.memory_space<vmem>>, vector<1x1x14x384xf32>
    %56 = vector.shape_cast %55 : vector<1x1x14x384xf32> to vector<14x384xf32>
    %57 = vector.broadcast %7 : vector<1x384xf32> to vector<14x384xf32>
    %58 = arith.mulf %56, %57 : vector<14x384xf32>
    %59 = arith.addf %50, %58 : vector<14x384xf32>
    %60 = vector.broadcast %9 : vector<1x384xf32> to vector<14x384xf32>
    %61 = arith.mulf %56, %60 : vector<14x384xf32>
    %62 = arith.addf %52, %61 : vector<14x384xf32>
    %63 = vector.broadcast %11 : vector<1x384xf32> to vector<14x384xf32>
    %64 = arith.mulf %56, %63 : vector<14x384xf32>
    %65 = arith.addf %54, %64 : vector<14x384xf32>
    %c0_38 = arith.constant 0 : index
    %c2_39 = arith.constant 2 : index
    %c0_40 = arith.constant 0 : index
    %c0_41 = arith.constant 0 : index
    %66 = vector.load %arg2[%c0_38, %c2_39, %c0_40, %c0_41] : memref<1x14x14x384xf32, #tpu.memory_space<vmem>>, vector<1x1x14x384xf32>
    %67 = vector.shape_cast %66 : vector<1x1x14x384xf32> to vector<14x384xf32>
    %68 = vector.broadcast %13 : vector<1x384xf32> to vector<14x384xf32>
    %69 = arith.mulf %67, %68 : vector<14x384xf32>
    %70 = arith.addf %59, %69 : vector<14x384xf32>
    %71 = vector.broadcast %15 : vector<1x384xf32> to vector<14x384xf32>
    %72 = arith.mulf %67, %71 : vector<14x384xf32>
    %73 = arith.addf %62, %72 : vector<14x384xf32>
    %74 = vector.broadcast %17 : vector<1x384xf32> to vector<14x384xf32>
    %75 = arith.mulf %67, %74 : vector<14x384xf32>
    %76 = arith.addf %65, %75 : vector<14x384xf32>
    %77 = vector.extract_strided_slice %70 {offsets = [0, 0], sizes = [13, 384], strides = [1, 1]} : vector<14x384xf32> to vector<13x384xf32>
    %78 = tpu.concatenate %18, %77 in 0 : vector<1x384xf32>, vector<13x384xf32> -> vector<14x384xf32>
    %79 = arith.addf %73, %78 : vector<14x384xf32>
    %80 = vector.extract_strided_slice %76 {offsets = [1, 0], sizes = [13, 384], strides = [1, 1]} : vector<14x384xf32> to vector<13x384xf32>
    %81 = tpu.concatenate %80, %18 in 0 : vector<13x384xf32>, vector<1x384xf32> -> vector<14x384xf32>
    %82 = arith.addf %79, %81 : vector<14x384xf32>
    %c0_42 = arith.constant 0 : index
    %c1_43 = arith.constant 1 : index
    %c0_44 = arith.constant 0 : index
    %c0_45 = arith.constant 0 : index
    %83 = vector.load %arg4[%c0_42, %c1_43, %c0_44, %c0_45] : memref<1x14x14x384xf32, #tpu.memory_space<vmem>>, vector<1x1x14x384xf32>
    %84 = vector.shape_cast %83 : vector<1x1x14x384xf32> to vector<14x384xf32>
    %85 = vector.shape_cast %82 : vector<14x384xf32> to vector<1x1x14x384xf32>
    tpu.vector_store %arg4[%c0_42, %c1_43, %c0_44, %c0_45], %85 {strides = array<i32>} : memref<1x14x14x384xf32, #tpu.memory_space<vmem>>, vector<1x1x14x384xf32>,
    %c0_46 = arith.constant 0 : index
    %c1_47 = arith.constant 1 : index
    %c0_48 = arith.constant 0 : index
    %c0_49 = arith.constant 0 : index
    %86 = vector.load %arg2[%c0_46, %c1_47, %c0_48, %c0_49] : memref<1x14x14x384xf32, #tpu.memory_space<vmem>>, vector<1x1x14x384xf32>
    %87 = vector.shape_cast %86 : vector<1x1x14x384xf32> to vector<14x384xf32>
    %88 = vector.broadcast %1 : vector<1x384xf32> to vector<14x384xf32>
    %89 = arith.mulf %87, %88 : vector<14x384xf32>
    %90 = vector.broadcast %3 : vector<1x384xf32> to vector<14x384xf32>
    %91 = arith.mulf %87, %90 : vector<14x384xf32>
    %92 = vector.broadcast %5 : vector<1x384xf32> to vector<14x384xf32>
    %93 = arith.mulf %87, %92 : vector<14x384xf32>
    %c0_50 = arith.constant 0 : index
    %c2_51 = arith.constant 2 : index
    %c0_52 = arith.constant 0 : index
    %c0_53 = arith.constant 0 : index
    %94 = vector.load %arg2[%c0_50, %c2_51, %c0_52, %c0_53] : memref<1x14x14x384xf32, #tpu.memory_space<vmem>>, vector<1x1x14x384xf32>
    %95 = vector.shape_cast %94 : vector<1x1x14x384xf32> to vector<14x384xf32>
    %96 = vector.broadcast %7 : vector<1x384xf32> to vector<14x384xf32>
    %97 = arith.mulf %95, %96 : vector<14x384xf32>
    %98 = arith.addf %89, %97 : vector<14x384xf32>
    %99 = vector.broadcast %9 : vector<1x384xf32> to vector<14x384xf32>
    %100 = arith.mulf %95, %99 : vector<14x384xf32>
    %101 = arith.addf %91, %100 : vector<14x384xf32>
    %102 = vector.broadcast %11 : vector<1x384xf32> to vector<14x384xf32>
    %103 = arith.mulf %95, %102 : vector<14x384xf32>
    %104 = arith.addf %93, %103 : vector<14x384xf32>
    %c0_54 = arith.constant 0 : index
    %c3_55 = arith.constant 3 : index
    %c0_56 = arith.constant 0 : index
    %c0_57 = arith.constant 0 : index
    %105 = vector.load %arg2[%c0_54, %c3_55, %c0_56, %c0_57] : memref<1x14x14x384xf32, #tpu.memory_space<vmem>>, vector<1x1x14x384xf32>
    %106 = vector.shape_cast %105 : vector<1x1x14x384xf32> to vector<14x384xf32>
    %107 = vector.broadcast %13 : vector<1x384xf32> to vector<14x384xf32>
    %108 = arith.mulf %106, %107 : vector<14x384xf32>
    %109 = arith.addf %98, %108 : vector<14x384xf32>
    %110 = vector.broadcast %15 : vector<1x384xf32> to vector<14x384xf32>
    %111 = arith.mulf %106, %110 : vector<14x384xf32>
    %112 = arith.addf %101, %111 : vector<14x384xf32>
    %113 = vector.broadcast %17 : vector<1x384xf32> to vector<14x384xf32>
    %114 = arith.mulf %106, %113 : vector<14x384xf32>
    %115 = arith.addf %104, %114 : vector<14x384xf32>
    %116 = vector.extract_strided_slice %109 {offsets = [0, 0], sizes = [13, 384], strides = [1, 1]} : vector<14x384xf32> to vector<13x384xf32>
    %117 = tpu.concatenate %18, %116 in 0 : vector<1x384xf32>, vector<13x384xf32> -> vector<14x384xf32>
    %118 = arith.addf %112, %117 : vector<14x384xf32>
    %119 = vector.extract_strided_slice %115 {offsets = [1, 0], sizes = [13, 384], strides = [1, 1]} : vector<14x384xf32> to vector<13x384xf32>
    %120 = tpu.concatenate %119, %18 in 0 : vector<13x384xf32>, vector<1x384xf32> -> vector<14x384xf32>
    %121 = arith.addf %118, %120 : vector<14x384xf32>
    %c0_58 = arith.constant 0 : index
    %c2_59 = arith.constant 2 : index
    %c0_60 = arith.constant 0 : index
    %c0_61 = arith.constant 0 : index
    %122 = vector.load %arg4[%c0_58, %c2_59, %c0_60, %c0_61] : memref<1x14x14x384xf32, #tpu.memory_space<vmem>>, vector<1x1x14x384xf32>
    %123 = vector.shape_cast %122 : vector<1x1x14x384xf32> to vector<14x384xf32>
    %124 = vector.shape_cast %121 : vector<14x384xf32> to vector<1x1x14x384xf32>
    tpu.vector_store %arg4[%c0_58, %c2_59, %c0_60, %c0_61], %124 {strides = array<i32>} : memref<1x14x14x384xf32, #tpu.memory_space<vmem>>, vector<1x1x14x384xf32>,
    %c0_62 = arith.constant 0 : index
    %c2_63 = arith.constant 2 : index
    %c0_64 = arith.constant 0 : index
    %c0_65 = arith.constant 0 : index
    %125 = vector.load %arg2[%c0_62, %c2_63, %c0_64, %c0_65] : memref<1x14x14x384xf32, #tpu.memory_space<vmem>>, vector<1x1x14x384xf32>
    %126 = vector.shape_cast %125 : vector<1x1x14x384xf32> to vector<14x384xf32>
    %127 = vector.broadcast %1 : vector<1x384xf32> to vector<14x384xf32>
    %128 = arith.mulf %126, %127 : vector<14x384xf32>
    %129 = vector.broadcast %3 : vector<1x384xf32> to vector<14x384xf32>
    %130 = arith.mulf %126, %129 : vector<14x384xf32>
    %131 = vector.broadcast %5 : vector<1x384xf32> to vector<14x384xf32>
    %132 = arith.mulf %126, %131 : vector<14x384xf32>
    %c0_66 = arith.constant 0 : index
    %c3_67 = arith.constant 3 : index
    %c0_68 = arith.constant 0 : index
    %c0_69 = arith.constant 0 : index
    %133 = vector.load %arg2[%c0_66, %c3_67, %c0_68, %c0_69] : memref<1x14x14x384xf32, #tpu.memory_space<vmem>>, vector<1x1x14x384xf32>
    %134 = vector.shape_cast %133 : vector<1x1x14x384xf32> to vector<14x384xf32>
    %135 = vector.broadcast %7 : vector<1x384xf32> to vector<14x384xf32>
    %136 = arith.mulf %134, %135 : vector<14x384xf32>
    %137 = arith.addf %128, %136 : vector<14x384xf32>
    %138 = vector.broadcast %9 : vector<1x384xf32> to vector<14x384xf32>
    %139 = arith.mulf %134, %138 : vector<14x384xf32>
    %140 = arith.addf %130, %139 : vector<14x384xf32>
    %141 = vector.broadcast %11 : vector<1x384xf32> to vector<14x384xf32>
    %142 = arith.mulf %134, %141 : vector<14x384xf32>
    %143 = arith.addf %132, %142 : vector<14x384xf32>
    %c0_70 = arith.constant 0 : index
    %c4_71 = arith.constant 4 : index
    %c0_72 = arith.constant 0 : index
    %c0_73 = arith.constant 0 : index
    %144 = vector.load %arg2[%c0_70, %c4_71, %c0_72, %c0_73] : memref<1x14x14x384xf32, #tpu.memory_space<vmem>>, vector<1x1x14x384xf32>
    %145 = vector.shape_cast %144 : vector<1x1x14x384xf32> to vector<14x384xf32>
    %146 = vector.broadcast %13 : vector<1x384xf32> to vector<14x384xf32>
    %147 = arith.mulf %145, %146 : vector<14x384xf32>
    %148 = arith.addf %137, %147 : vector<14x384xf32>
    %149 = vector.broadcast %15 : vector<1x384xf32> to vector<14x384xf32>
    %150 = arith.mulf %145, %149 : vector<14x384xf32>
    %151 = arith.addf %140, %150 : vector<14x384xf32>
    %152 = vector.broadcast %17 : vector<1x384xf32> to vector<14x384xf32>
    %153 = arith.mulf %145, %152 : vector<14x384xf32>
    %154 = arith.addf %143, %153 : vector<14x384xf32>
    %155 = vector.extract_strided_slice %148 {offsets = [0, 0], sizes = [13, 384], strides = [1, 1]} : vector<14x384xf32> to vector<13x384xf32>
    %156 = tpu.concatenate %18, %155 in 0 : vector<1x384xf32>, vector<13x384xf32> -> vector<14x384xf32>
    %157 = arith.addf %151, %156 : vector<14x384xf32>
    %158 = vector.extract_strided_slice %154 {offsets = [1, 0], sizes = [13, 384], strides = [1, 1]} : vector<14x384xf32> to vector<13x384xf32>
    %159 = tpu.concatenate %158, %18 in 0 : vector<13x384xf32>, vector<1x384xf32> -> vector<14x384xf32>
    %160 = arith.addf %157, %159 : vector<14x384xf32>
    %c0_74 = arith.constant 0 : index
    %c3_75 = arith.constant 3 : index
    %c0_76 = arith.constant 0 : index
    %c0_77 = arith.constant 0 : index
    %161 = vector.load %arg4[%c0_74, %c3_75, %c0_76, %c0_77] : memref<1x14x14x384xf32, #tpu.memory_space<vmem>>, vector<1x1x14x384xf32>
    %162 = vector.shape_cast %161 : vector<1x1x14x384xf32> to vector<14x384xf32>
    %163 = vector.shape_cast %160 : vector<14x384xf32> to vector<1x1x14x384xf32>
    tpu.vector_store %arg4[%c0_74, %c3_75, %c0_76, %c0_77], %163 {strides = array<i32>} : memref<1x14x14x384xf32, #tpu.memory_space<vmem>>, vector<1x1x14x384xf32>,
    %c0_78 = arith.constant 0 : index
    %c3_79 = arith.constant 3 : index
    %c0_80 = arith.constant 0 : index
    %c0_81 = arith.constant 0 : index
    %164 = vector.load %arg2[%c0_78, %c3_79, %c0_80, %c0_81] : memref<1x14x14x384xf32, #tpu.memory_space<vmem>>, vector<1x1x14x384xf32>
    %165 = vector.shape_cast %164 : vector<1x1x14x384xf32> to vector<14x384xf32>
    %166 = vector.broadcast %1 : vector<1x384xf32> to vector<14x384xf32>
    %167 = arith.mulf %165, %166 : vector<14x384xf32>
    %168 = vector.broadcast %3 : vector<1x384xf32> to vector<14x384xf32>
    %169 = arith.mulf %165, %168 : vector<14x384xf32>
    %170 = vector.broadcast %5 : vector<1x384xf32> to vector<14x384xf32>
    %171 = arith.mulf %165, %170 : vector<14x384xf32>
    %c0_82 = arith.constant 0 : index
    %c4_83 = arith.constant 4 : index
    %c0_84 = arith.constant 0 : index
    %c0_85 = arith.constant 0 : index
    %172 = vector.load %arg2[%c0_82, %c4_83, %c0_84, %c0_85] : memref<1x14x14x384xf32, #tpu.memory_space<vmem>>, vector<1x1x14x384xf32>
    %173 = vector.shape_cast %172 : vector<1x1x14x384xf32> to vector<14x384xf32>
    %174 = vector.broadcast %7 : vector<1x384xf32> to vector<14x384xf32>
    %175 = arith.mulf %173, %174 : vector<14x384xf32>
    %176 = arith.addf %167, %175 : vector<14x384xf32>
    %177 = vector.broadcast %9 : vector<1x384xf32> to vector<14x384xf32>
    %178 = arith.mulf %173, %177 : vector<14x384xf32>
    %179 = arith.addf %169, %178 : vector<14x384xf32>
    %180 = vector.broadcast %11 : vector<1x384xf32> to vector<14x384xf32>
    %181 = arith.mulf %173, %180 : vector<14x384xf32>
    %182 = arith.addf %171, %181 : vector<14x384xf32>
    %c0_86 = arith.constant 0 : index
    %c5_87 = arith.constant 5 : index
    %c0_88 = arith.constant 0 : index
    %c0_89 = arith.constant 0 : index
    %183 = vector.load %arg2[%c0_86, %c5_87, %c0_88, %c0_89] : memref<1x14x14x384xf32, #tpu.memory_space<vmem>>, vector<1x1x14x384xf32>
    %184 = vector.shape_cast %183 : vector<1x1x14x384xf32> to vector<14x384xf32>
    %185 = vector.broadcast %13 : vector<1x384xf32> to vector<14x384xf32>
    %186 = arith.mulf %184, %185 : vector<14x384xf32>
    %187 = arith.addf %176, %186 : vector<14x384xf32>
    %188 = vector.broadcast %15 : vector<1x384xf32> to vector<14x384xf32>
    %189 = arith.mulf %184, %188 : vector<14x384xf32>
    %190 = arith.addf %179, %189 : vector<14x384xf32>
    %191 = vector.broadcast %17 : vector<1x384xf32> to vector<14x384xf32>
    %192 = arith.mulf %184, %191 : vector<14x384xf32>
    %193 = arith.addf %182, %192 : vector<14x384xf32>
    %194 = vector.extract_strided_slice %187 {offsets = [0, 0], sizes = [13, 384], strides = [1, 1]} : vector<14x384xf32> to vector<13x384xf32>
    %195 = tpu.concatenate %18, %194 in 0 : vector<1x384xf32>, vector<13x384xf32> -> vector<14x384xf32>
    %196 = arith.addf %190, %195 : vector<14x384xf32>
    %197 = vector.extract_strided_slice %193 {offsets = [1, 0], sizes = [13, 384], strides = [1, 1]} : vector<14x384xf32> to vector<13x384xf32>
    %198 = tpu.concatenate %197, %18 in 0 : vector<13x384xf32>, vector<1x384xf32> -> vector<14x384xf32>
    %199 = arith.addf %196, %198 : vector<14x384xf32>
    %c0_90 = arith.constant 0 : index
    %c4_91 = arith.constant 4 : index
    %c0_92 = arith.constant 0 : index
    %c0_93 = arith.constant 0 : index
    %200 = vector.load %arg4[%c0_90, %c4_91, %c0_92, %c0_93] : memref<1x14x14x384xf32, #tpu.memory_space<vmem>>, vector<1x1x14x384xf32>
    %201 = vector.shape_cast %200 : vector<1x1x14x384xf32> to vector<14x384xf32>
    %202 = vector.shape_cast %199 : vector<14x384xf32> to vector<1x1x14x384xf32>
    tpu.vector_store %arg4[%c0_90, %c4_91, %c0_92, %c0_93], %202 {strides = array<i32>} : memref<1x14x14x384xf32, #tpu.memory_space<vmem>>, vector<1x1x14x384xf32>,
    %c0_94 = arith.constant 0 : index
    %c4_95 = arith.constant 4 : index
    %c0_96 = arith.constant 0 : index
    %c0_97 = arith.constant 0 : index
    %203 = vector.load %arg2[%c0_94, %c4_95, %c0_96, %c0_97] : memref<1x14x14x384xf32, #tpu.memory_space<vmem>>, vector<1x1x14x384xf32>
    %204 = vector.shape_cast %203 : vector<1x1x14x384xf32> to vector<14x384xf32>
    %205 = vector.broadcast %1 : vector<1x384xf32> to vector<14x384xf32>
    %206 = arith.mulf %204, %205 : vector<14x384xf32>
    %207 = vector.broadcast %3 : vector<1x384xf32> to vector<14x384xf32>
    %208 = arith.mulf %204, %207 : vector<14x384xf32>
    %209 = vector.broadcast %5 : vector<1x384xf32> to vector<14x384xf32>
    %210 = arith.mulf %204, %209 : vector<14x384xf32>
    %c0_98 = arith.constant 0 : index
    %c5_99 = arith.constant 5 : index
    %c0_100 = arith.constant 0 : index
    %c0_101 = arith.constant 0 : index
    %211 = vector.load %arg2[%c0_98, %c5_99, %c0_100, %c0_101] : memref<1x14x14x384xf32, #tpu.memory_space<vmem>>, vector<1x1x14x384xf32>
    %212 = vector.shape_cast %211 : vector<1x1x14x384xf32> to vector<14x384xf32>
    %213 = vector.broadcast %7 : vector<1x384xf32> to vector<14x384xf32>
    %214 = arith.mulf %212, %213 : vector<14x384xf32>
    %215 = arith.addf %206, %214 : vector<14x384xf32>
    %216 = vector.broadcast %9 : vector<1x384xf32> to vector<14x384xf32>
    %217 = arith.mulf %212, %216 : vector<14x384xf32>
    %218 = arith.addf %208, %217 : vector<14x384xf32>
    %219 = vector.broadcast %11 : vector<1x384xf32> to vector<14x384xf32>
    %220 = arith.mulf %212, %219 : vector<14x384xf32>
    %221 = arith.addf %210, %220 : vector<14x384xf32>
    %c0_102 = arith.constant 0 : index
    %c6_103 = arith.constant 6 : index
    %c0_104 = arith.constant 0 : index
    %c0_105 = arith.constant 0 : index
    %222 = vector.load %arg2[%c0_102, %c6_103, %c0_104, %c0_105] : memref<1x14x14x384xf32, #tpu.memory_space<vmem>>, vector<1x1x14x384xf32>
    %223 = vector.shape_cast %222 : vector<1x1x14x384xf32> to vector<14x384xf32>
    %224 = vector.broadcast %13 : vector<1x384xf32> to vector<14x384xf32>
    %225 = arith.mulf %223, %224 : vector<14x384xf32>
    %226 = arith.addf %215, %225 : vector<14x384xf32>
    %227 = vector.broadcast %15 : vector<1x384xf32> to vector<14x384xf32>
    %228 = arith.mulf %223, %227 : vector<14x384xf32>
    %229 = arith.addf %218, %228 : vector<14x384xf32>
    %230 = vector.broadcast %17 : vector<1x384xf32> to vector<14x384xf32>
    %231 = arith.mulf %223, %230 : vector<14x384xf32>
    %232 = arith.addf %221, %231 : vector<14x384xf32>
    %233 = vector.extract_strided_slice %226 {offsets = [0, 0], sizes = [13, 384], strides = [1, 1]} : vector<14x384xf32> to vector<13x384xf32>
    %234 = tpu.concatenate %18, %233 in 0 : vector<1x384xf32>, vector<13x384xf32> -> vector<14x384xf32>
    %235 = arith.addf %229, %234 : vector<14x384xf32>
    %236 = vector.extract_strided_slice %232 {offsets = [1, 0], sizes = [13, 384], strides = [1, 1]} : vector<14x384xf32> to vector<13x384xf32>
    %237 = tpu.concatenate %236, %18 in 0 : vector<13x384xf32>, vector<1x384xf32> -> vector<14x384xf32>
    %238 = arith.addf %235, %237 : vector<14x384xf32>
    %c0_106 = arith.constant 0 : index
    %c5_107 = arith.constant 5 : index
    %c0_108 = arith.constant 0 : index
    %c0_109 = arith.constant 0 : index
    %239 = vector.load %arg4[%c0_106, %c5_107, %c0_108, %c0_109] : memref<1x14x14x384xf32, #tpu.memory_space<vmem>>, vector<1x1x14x384xf32>
    %240 = vector.shape_cast %239 : vector<1x1x14x384xf32> to vector<14x384xf32>
    %241 = vector.shape_cast %238 : vector<14x384xf32> to vector<1x1x14x384xf32>
    tpu.vector_store %arg4[%c0_106, %c5_107, %c0_108, %c0_109], %241 {strides = array<i32>} : memref<1x14x14x384xf32, #tpu.memory_space<vmem>>, vector<1x1x14x384xf32>,
    %c0_110 = arith.constant 0 : index
    %c5_111 = arith.constant 5 : index
    %c0_112 = arith.constant 0 : index
    %c0_113 = arith.constant 0 : index
    %242 = vector.load %arg2[%c0_110, %c5_111, %c0_112, %c0_113] : memref<1x14x14x384xf32, #tpu.memory_space<vmem>>, vector<1x1x14x384xf32>
    %243 = vector.shape_cast %242 : vector<1x1x14x384xf32> to vector<14x384xf32>
    %244 = vector.broadcast %1 : vector<1x384xf32> to vector<14x384xf32>
    %245 = arith.mulf %243, %244 : vector<14x384xf32>
    %246 = vector.broadcast %3 : vector<1x384xf32> to vector<14x384xf32>
    %247 = arith.mulf %243, %246 : vector<14x384xf32>
    %248 = vector.broadcast %5 : vector<1x384xf32> to vector<14x384xf32>
    %249 = arith.mulf %243, %248 : vector<14x384xf32>
    %c0_114 = arith.constant 0 : index
    %c6_115 = arith.constant 6 : index
    %c0_116 = arith.constant 0 : index
    %c0_117 = arith.constant 0 : index
    %250 = vector.load %arg2[%c0_114, %c6_115, %c0_116, %c0_117] : memref<1x14x14x384xf32, #tpu.memory_space<vmem>>, vector<1x1x14x384xf32>
    %251 = vector.shape_cast %250 : vector<1x1x14x384xf32> to vector<14x384xf32>
    %252 = vector.broadcast %7 : vector<1x384xf32> to vector<14x384xf32>
    %253 = arith.mulf %251, %252 : vector<14x384xf32>
    %254 = arith.addf %245, %253 : vector<14x384xf32>
    %255 = vector.broadcast %9 : vector<1x384xf32> to vector<14x384xf32>
    %256 = arith.mulf %251, %255 : vector<14x384xf32>
    %257 = arith.addf %247, %256 : vector<14x384xf32>
    %258 = vector.broadcast %11 : vector<1x384xf32> to vector<14x384xf32>
    %259 = arith.mulf %251, %258 : vector<14x384xf32>
    %260 = arith.addf %249, %259 : vector<14x384xf32>
    %c0_118 = arith.constant 0 : index
    %c7_119 = arith.constant 7 : index
    %c0_120 = arith.constant 0 : index
    %c0_121 = arith.constant 0 : index
    %261 = vector.load %arg2[%c0_118, %c7_119, %c0_120, %c0_121] : memref<1x14x14x384xf32, #tpu.memory_space<vmem>>, vector<1x1x14x384xf32>
    %262 = vector.shape_cast %261 : vector<1x1x14x384xf32> to vector<14x384xf32>
    %263 = vector.broadcast %13 : vector<1x384xf32> to vector<14x384xf32>
    %264 = arith.mulf %262, %263 : vector<14x384xf32>
    %265 = arith.addf %254, %264 : vector<14x384xf32>
    %266 = vector.broadcast %15 : vector<1x384xf32> to vector<14x384xf32>
    %267 = arith.mulf %262, %266 : vector<14x384xf32>
    %268 = arith.addf %257, %267 : vector<14x384xf32>
    %269 = vector.broadcast %17 : vector<1x384xf32> to vector<14x384xf32>
    %270 = arith.mulf %262, %269 : vector<14x384xf32>
    %271 = arith.addf %260, %270 : vector<14x384xf32>
    %272 = vector.extract_strided_slice %265 {offsets = [0, 0], sizes = [13, 384], strides = [1, 1]} : vector<14x384xf32> to vector<13x384xf32>
    %273 = tpu.concatenate %18, %272 in 0 : vector<1x384xf32>, vector<13x384xf32> -> vector<14x384xf32>
    %274 = arith.addf %268, %273 : vector<14x384xf32>
    %275 = vector.extract_strided_slice %271 {offsets = [1, 0], sizes = [13, 384], strides = [1, 1]} : vector<14x384xf32> to vector<13x384xf32>
    %276 = tpu.concatenate %275, %18 in 0 : vector<13x384xf32>, vector<1x384xf32> -> vector<14x384xf32>
    %277 = arith.addf %274, %276 : vector<14x384xf32>
    %c0_122 = arith.constant 0 : index
    %c6_123 = arith.constant 6 : index
    %c0_124 = arith.constant 0 : index
    %c0_125 = arith.constant 0 : index
    %278 = vector.load %arg4[%c0_122, %c6_123, %c0_124, %c0_125] : memref<1x14x14x384xf32, #tpu.memory_space<vmem>>, vector<1x1x14x384xf32>
    %279 = vector.shape_cast %278 : vector<1x1x14x384xf32> to vector<14x384xf32>
    %280 = vector.shape_cast %277 : vector<14x384xf32> to vector<1x1x14x384xf32>
    tpu.vector_store %arg4[%c0_122, %c6_123, %c0_124, %c0_125], %280 {strides = array<i32>} : memref<1x14x14x384xf32, #tpu.memory_space<vmem>>, vector<1x1x14x384xf32>,
    %c0_126 = arith.constant 0 : index
    %c6_127 = arith.constant 6 : index
    %c0_128 = arith.constant 0 : index
    %c0_129 = arith.constant 0 : index
    %281 = vector.load %arg2[%c0_126, %c6_127, %c0_128, %c0_129] : memref<1x14x14x384xf32, #tpu.memory_space<vmem>>, vector<1x1x14x384xf32>
    %282 = vector.shape_cast %281 : vector<1x1x14x384xf32> to vector<14x384xf32>
    %283 = vector.broadcast %1 : vector<1x384xf32> to vector<14x384xf32>
    %284 = arith.mulf %282, %283 : vector<14x384xf32>
    %285 = vector.broadcast %3 : vector<1x384xf32> to vector<14x384xf32>
    %286 = arith.mulf %282, %285 : vector<14x384xf32>
    %287 = vector.broadcast %5 : vector<1x384xf32> to vector<14x384xf32>
    %288 = arith.mulf %282, %287 : vector<14x384xf32>
    %c0_130 = arith.constant 0 : index
    %c7_131 = arith.constant 7 : index
    %c0_132 = arith.constant 0 : index
    %c0_133 = arith.constant 0 : index
    %289 = vector.load %arg2[%c0_130, %c7_131, %c0_132, %c0_133] : memref<1x14x14x384xf32, #tpu.memory_space<vmem>>, vector<1x1x14x384xf32>
    %290 = vector.shape_cast %289 : vector<1x1x14x384xf32> to vector<14x384xf32>
    %291 = vector.broadcast %7 : vector<1x384xf32> to vector<14x384xf32>
    %292 = arith.mulf %290, %291 : vector<14x384xf32>
    %293 = arith.addf %284, %292 : vector<14x384xf32>
    %294 = vector.broadcast %9 : vector<1x384xf32> to vector<14x384xf32>
    %295 = arith.mulf %290, %294 : vector<14x384xf32>
    %296 = arith.addf %286, %295 : vector<14x384xf32>
    %297 = vector.broadcast %11 : vector<1x384xf32> to vector<14x384xf32>
    %298 = arith.mulf %290, %297 : vector<14x384xf32>
    %299 = arith.addf %288, %298 : vector<14x384xf32>
    %c0_134 = arith.constant 0 : index
    %c8_135 = arith.constant 8 : index
    %c0_136 = arith.constant 0 : index
    %c0_137 = arith.constant 0 : index
    %300 = vector.load %arg2[%c0_134, %c8_135, %c0_136, %c0_137] : memref<1x14x14x384xf32, #tpu.memory_space<vmem>>, vector<1x1x14x384xf32>
    %301 = vector.shape_cast %300 : vector<1x1x14x384xf32> to vector<14x384xf32>
    %302 = vector.broadcast %13 : vector<1x384xf32> to vector<14x384xf32>
    %303 = arith.mulf %301, %302 : vector<14x384xf32>
    %304 = arith.addf %293, %303 : vector<14x384xf32>
    %305 = vector.broadcast %15 : vector<1x384xf32> to vector<14x384xf32>
    %306 = arith.mulf %301, %305 : vector<14x384xf32>
    %307 = arith.addf %296, %306 : vector<14x384xf32>
    %308 = vector.broadcast %17 : vector<1x384xf32> to vector<14x384xf32>
    %309 = arith.mulf %301, %308 : vector<14x384xf32>
    %310 = arith.addf %299, %309 : vector<14x384xf32>
    %311 = vector.extract_strided_slice %304 {offsets = [0, 0], sizes = [13, 384], strides = [1, 1]} : vector<14x384xf32> to vector<13x384xf32>
    %312 = tpu.concatenate %18, %311 in 0 : vector<1x384xf32>, vector<13x384xf32> -> vector<14x384xf32>
    %313 = arith.addf %307, %312 : vector<14x384xf32>
    %314 = vector.extract_strided_slice %310 {offsets = [1, 0], sizes = [13, 384], strides = [1, 1]} : vector<14x384xf32> to vector<13x384xf32>
    %315 = tpu.concatenate %314, %18 in 0 : vector<13x384xf32>, vector<1x384xf32> -> vector<14x384xf32>
    %316 = arith.addf %313, %315 : vector<14x384xf32>
    %c0_138 = arith.constant 0 : index
    %c7_139 = arith.constant 7 : index
    %c0_140 = arith.constant 0 : index
    %c0_141 = arith.constant 0 : index
    %317 = vector.load %arg4[%c0_138, %c7_139, %c0_140, %c0_141] : memref<1x14x14x384xf32, #tpu.memory_space<vmem>>, vector<1x1x14x384xf32>
    %318 = vector.shape_cast %317 : vector<1x1x14x384xf32> to vector<14x384xf32>
    %319 = vector.shape_cast %316 : vector<14x384xf32> to vector<1x1x14x384xf32>
    tpu.vector_store %arg4[%c0_138, %c7_139, %c0_140, %c0_141], %319 {strides = array<i32>} : memref<1x14x14x384xf32, #tpu.memory_space<vmem>>, vector<1x1x14x384xf32>,
    %c0_142 = arith.constant 0 : index
    %c7_143 = arith.constant 7 : index
    %c0_144 = arith.constant 0 : index
    %c0_145 = arith.constant 0 : index
    %320 = vector.load %arg2[%c0_142, %c7_143, %c0_144, %c0_145] : memref<1x14x14x384xf32, #tpu.memory_space<vmem>>, vector<1x1x14x384xf32>
    %321 = vector.shape_cast %320 : vector<1x1x14x384xf32> to vector<14x384xf32>
    %322 = vector.broadcast %1 : vector<1x384xf32> to vector<14x384xf32>
    %323 = arith.mulf %321, %322 : vector<14x384xf32>
    %324 = vector.broadcast %3 : vector<1x384xf32> to vector<14x384xf32>
    %325 = arith.mulf %321, %324 : vector<14x384xf32>
    %326 = vector.broadcast %5 : vector<1x384xf32> to vector<14x384xf32>
    %327 = arith.mulf %321, %326 : vector<14x384xf32>
    %c0_146 = arith.constant 0 : index
    %c8_147 = arith.constant 8 : index
    %c0_148 = arith.constant 0 : index
    %c0_149 = arith.constant 0 : index
    %328 = vector.load %arg2[%c0_146, %c8_147, %c0_148, %c0_149] : memref<1x14x14x384xf32, #tpu.memory_space<vmem>>, vector<1x1x14x384xf32>
    %329 = vector.shape_cast %328 : vector<1x1x14x384xf32> to vector<14x384xf32>
    %330 = vector.broadcast %7 : vector<1x384xf32> to vector<14x384xf32>
    %331 = arith.mulf %329, %330 : vector<14x384xf32>
    %332 = arith.addf %323, %331 : vector<14x384xf32>
    %333 = vector.broadcast %9 : vector<1x384xf32> to vector<14x384xf32>
    %334 = arith.mulf %329, %333 : vector<14x384xf32>
    %335 = arith.addf %325, %334 : vector<14x384xf32>
    %336 = vector.broadcast %11 : vector<1x384xf32> to vector<14x384xf32>
    %337 = arith.mulf %329, %336 : vector<14x384xf32>
    %338 = arith.addf %327, %337 : vector<14x384xf32>
    %c0_150 = arith.constant 0 : index
    %c9 = arith.constant 9 : index
    %c0_151 = arith.constant 0 : index
    %c0_152 = arith.constant 0 : index
    %339 = vector.load %arg2[%c0_150, %c9, %c0_151, %c0_152] : memref<1x14x14x384xf32, #tpu.memory_space<vmem>>, vector<1x1x14x384xf32>
    %340 = vector.shape_cast %339 : vector<1x1x14x384xf32> to vector<14x384xf32>
    %341 = vector.broadcast %13 : vector<1x384xf32> to vector<14x384xf32>
    %342 = arith.mulf %340, %341 : vector<14x384xf32>
    %343 = arith.addf %332, %342 : vector<14x384xf32>
    %344 = vector.broadcast %15 : vector<1x384xf32> to vector<14x384xf32>
    %345 = arith.mulf %340, %344 : vector<14x384xf32>
    %346 = arith.addf %335, %345 : vector<14x384xf32>
    %347 = vector.broadcast %17 : vector<1x384xf32> to vector<14x384xf32>
    %348 = arith.mulf %340, %347 : vector<14x384xf32>
    %349 = arith.addf %338, %348 : vector<14x384xf32>
    %350 = vector.extract_strided_slice %343 {offsets = [0, 0], sizes = [13, 384], strides = [1, 1]} : vector<14x384xf32> to vector<13x384xf32>
    %351 = tpu.concatenate %18, %350 in 0 : vector<1x384xf32>, vector<13x384xf32> -> vector<14x384xf32>
    %352 = arith.addf %346, %351 : vector<14x384xf32>
    %353 = vector.extract_strided_slice %349 {offsets = [1, 0], sizes = [13, 384], strides = [1, 1]} : vector<14x384xf32> to vector<13x384xf32>
    %354 = tpu.concatenate %353, %18 in 0 : vector<13x384xf32>, vector<1x384xf32> -> vector<14x384xf32>
    %355 = arith.addf %352, %354 : vector<14x384xf32>
    %c0_153 = arith.constant 0 : index
    %c8_154 = arith.constant 8 : index
    %c0_155 = arith.constant 0 : index
    %c0_156 = arith.constant 0 : index
    %356 = vector.load %arg4[%c0_153, %c8_154, %c0_155, %c0_156] : memref<1x14x14x384xf32, #tpu.memory_space<vmem>>, vector<1x1x14x384xf32>
    %357 = vector.shape_cast %356 : vector<1x1x14x384xf32> to vector<14x384xf32>
    %358 = vector.shape_cast %355 : vector<14x384xf32> to vector<1x1x14x384xf32>
    tpu.vector_store %arg4[%c0_153, %c8_154, %c0_155, %c0_156], %358 {strides = array<i32>} : memref<1x14x14x384xf32, #tpu.memory_space<vmem>>, vector<1x1x14x384xf32>,
    %c0_157 = arith.constant 0 : index
    %c8_158 = arith.constant 8 : index
    %c0_159 = arith.constant 0 : index
    %c0_160 = arith.constant 0 : index
    %359 = vector.load %arg2[%c0_157, %c8_158, %c0_159, %c0_160] : memref<1x14x14x384xf32, #tpu.memory_space<vmem>>, vector<1x1x14x384xf32>
    %360 = vector.shape_cast %359 : vector<1x1x14x384xf32> to vector<14x384xf32>
    %361 = vector.broadcast %1 : vector<1x384xf32> to vector<14x384xf32>
    %362 = arith.mulf %360, %361 : vector<14x384xf32>
    %363 = vector.broadcast %3 : vector<1x384xf32> to vector<14x384xf32>
    %364 = arith.mulf %360, %363 : vector<14x384xf32>
    %365 = vector.broadcast %5 : vector<1x384xf32> to vector<14x384xf32>
    %366 = arith.mulf %360, %365 : vector<14x384xf32>
    %c0_161 = arith.constant 0 : index
    %c9_162 = arith.constant 9 : index
    %c0_163 = arith.constant 0 : index
    %c0_164 = arith.constant 0 : index
    %367 = vector.load %arg2[%c0_161, %c9_162, %c0_163, %c0_164] : memref<1x14x14x384xf32, #tpu.memory_space<vmem>>, vector<1x1x14x384xf32>
    %368 = vector.shape_cast %367 : vector<1x1x14x384xf32> to vector<14x384xf32>
    %369 = vector.broadcast %7 : vector<1x384xf32> to vector<14x384xf32>
    %370 = arith.mulf %368, %369 : vector<14x384xf32>
    %371 = arith.addf %362, %370 : vector<14x384xf32>
    %372 = vector.broadcast %9 : vector<1x384xf32> to vector<14x384xf32>
    %373 = arith.mulf %368, %372 : vector<14x384xf32>
    %374 = arith.addf %364, %373 : vector<14x384xf32>
    %375 = vector.broadcast %11 : vector<1x384xf32> to vector<14x384xf32>
    %376 = arith.mulf %368, %375 : vector<14x384xf32>
    %377 = arith.addf %366, %376 : vector<14x384xf32>
    %c0_165 = arith.constant 0 : index
    %c10 = arith.constant 10 : index
    %c0_166 = arith.constant 0 : index
    %c0_167 = arith.constant 0 : index
    %378 = vector.load %arg2[%c0_165, %c10, %c0_166, %c0_167] : memref<1x14x14x384xf32, #tpu.memory_space<vmem>>, vector<1x1x14x384xf32>
    %379 = vector.shape_cast %378 : vector<1x1x14x384xf32> to vector<14x384xf32>
    %380 = vector.broadcast %13 : vector<1x384xf32> to vector<14x384xf32>
    %381 = arith.mulf %379, %380 : vector<14x384xf32>
    %382 = arith.addf %371, %381 : vector<14x384xf32>
    %383 = vector.broadcast %15 : vector<1x384xf32> to vector<14x384xf32>
    %384 = arith.mulf %379, %383 : vector<14x384xf32>
    %385 = arith.addf %374, %384 : vector<14x384xf32>
    %386 = vector.broadcast %17 : vector<1x384xf32> to vector<14x384xf32>
    %387 = arith.mulf %379, %386 : vector<14x384xf32>
    %388 = arith.addf %377, %387 : vector<14x384xf32>
    %389 = vector.extract_strided_slice %382 {offsets = [0, 0], sizes = [13, 384], strides = [1, 1]} : vector<14x384xf32> to vector<13x384xf32>
    %390 = tpu.concatenate %18, %389 in 0 : vector<1x384xf32>, vector<13x384xf32> -> vector<14x384xf32>
    %391 = arith.addf %385, %390 : vector<14x384xf32>
    %392 = vector.extract_strided_slice %388 {offsets = [1, 0], sizes = [13, 384], strides = [1, 1]} : vector<14x384xf32> to vector<13x384xf32>
    %393 = tpu.concatenate %392, %18 in 0 : vector<13x384xf32>, vector<1x384xf32> -> vector<14x384xf32>
    %394 = arith.addf %391, %393 : vector<14x384xf32>
    %c0_168 = arith.constant 0 : index
    %c9_169 = arith.constant 9 : index
    %c0_170 = arith.constant 0 : index
    %c0_171 = arith.constant 0 : index
    %395 = vector.load %arg4[%c0_168, %c9_169, %c0_170, %c0_171] : memref<1x14x14x384xf32, #tpu.memory_space<vmem>>, vector<1x1x14x384xf32>
    %396 = vector.shape_cast %395 : vector<1x1x14x384xf32> to vector<14x384xf32>
    %397 = vector.shape_cast %394 : vector<14x384xf32> to vector<1x1x14x384xf32>
    tpu.vector_store %arg4[%c0_168, %c9_169, %c0_170, %c0_171], %397 {strides = array<i32>} : memref<1x14x14x384xf32, #tpu.memory_space<vmem>>, vector<1x1x14x384xf32>,
    %c0_172 = arith.constant 0 : index
    %c9_173 = arith.constant 9 : index
    %c0_174 = arith.constant 0 : index
    %c0_175 = arith.constant 0 : index
    %398 = vector.load %arg2[%c0_172, %c9_173, %c0_174, %c0_175] : memref<1x14x14x384xf32, #tpu.memory_space<vmem>>, vector<1x1x14x384xf32>
    %399 = vector.shape_cast %398 : vector<1x1x14x384xf32> to vector<14x384xf32>
    %400 = vector.broadcast %1 : vector<1x384xf32> to vector<14x384xf32>
    %401 = arith.mulf %399, %400 : vector<14x384xf32>
    %402 = vector.broadcast %3 : vector<1x384xf32> to vector<14x384xf32>
    %403 = arith.mulf %399, %402 : vector<14x384xf32>
    %404 = vector.broadcast %5 : vector<1x384xf32> to vector<14x384xf32>
    %405 = arith.mulf %399, %404 : vector<14x384xf32>
    %c0_176 = arith.constant 0 : index
    %c10_177 = arith.constant 10 : index
    %c0_178 = arith.constant 0 : index
    %c0_179 = arith.constant 0 : index
    %406 = vector.load %arg2[%c0_176, %c10_177, %c0_178, %c0_179] : memref<1x14x14x384xf32, #tpu.memory_space<vmem>>, vector<1x1x14x384xf32>
    %407 = vector.shape_cast %406 : vector<1x1x14x384xf32> to vector<14x384xf32>
    %408 = vector.broadcast %7 : vector<1x384xf32> to vector<14x384xf32>
    %409 = arith.mulf %407, %408 : vector<14x384xf32>
    %410 = arith.addf %401, %409 : vector<14x384xf32>
    %411 = vector.broadcast %9 : vector<1x384xf32> to vector<14x384xf32>
    %412 = arith.mulf %407, %411 : vector<14x384xf32>
    %413 = arith.addf %403, %412 : vector<14x384xf32>
    %414 = vector.broadcast %11 : vector<1x384xf32> to vector<14x384xf32>
    %415 = arith.mulf %407, %414 : vector<14x384xf32>
    %416 = arith.addf %405, %415 : vector<14x384xf32>
    %c0_180 = arith.constant 0 : index
    %c11 = arith.constant 11 : index
    %c0_181 = arith.constant 0 : index
    %c0_182 = arith.constant 0 : index
    %417 = vector.load %arg2[%c0_180, %c11, %c0_181, %c0_182] : memref<1x14x14x384xf32, #tpu.memory_space<vmem>>, vector<1x1x14x384xf32>
    %418 = vector.shape_cast %417 : vector<1x1x14x384xf32> to vector<14x384xf32>
    %419 = vector.broadcast %13 : vector<1x384xf32> to vector<14x384xf32>
    %420 = arith.mulf %418, %419 : vector<14x384xf32>
    %421 = arith.addf %410, %420 : vector<14x384xf32>
    %422 = vector.broadcast %15 : vector<1x384xf32> to vector<14x384xf32>
    %423 = arith.mulf %418, %422 : vector<14x384xf32>
    %424 = arith.addf %413, %423 : vector<14x384xf32>
    %425 = vector.broadcast %17 : vector<1x384xf32> to vector<14x384xf32>
    %426 = arith.mulf %418, %425 : vector<14x384xf32>
    %427 = arith.addf %416, %426 : vector<14x384xf32>
    %428 = vector.extract_strided_slice %421 {offsets = [0, 0], sizes = [13, 384], strides = [1, 1]} : vector<14x384xf32> to vector<13x384xf32>
    %429 = tpu.concatenate %18, %428 in 0 : vector<1x384xf32>, vector<13x384xf32> -> vector<14x384xf32>
    %430 = arith.addf %424, %429 : vector<14x384xf32>
    %431 = vector.extract_strided_slice %427 {offsets = [1, 0], sizes = [13, 384], strides = [1, 1]} : vector<14x384xf32> to vector<13x384xf32>
    %432 = tpu.concatenate %431, %18 in 0 : vector<13x384xf32>, vector<1x384xf32> -> vector<14x384xf32>
    %433 = arith.addf %430, %432 : vector<14x384xf32>
    %c0_183 = arith.constant 0 : index
    %c10_184 = arith.constant 10 : index
    %c0_185 = arith.constant 0 : index
    %c0_186 = arith.constant 0 : index
    %434 = vector.load %arg4[%c0_183, %c10_184, %c0_185, %c0_186] : memref<1x14x14x384xf32, #tpu.memory_space<vmem>>, vector<1x1x14x384xf32>
    %435 = vector.shape_cast %434 : vector<1x1x14x384xf32> to vector<14x384xf32>
    %436 = vector.shape_cast %433 : vector<14x384xf32> to vector<1x1x14x384xf32>
    tpu.vector_store %arg4[%c0_183, %c10_184, %c0_185, %c0_186], %436 {strides = array<i32>} : memref<1x14x14x384xf32, #tpu.memory_space<vmem>>, vector<1x1x14x384xf32>,
    %c0_187 = arith.constant 0 : index
    %c10_188 = arith.constant 10 : index
    %c0_189 = arith.constant 0 : index
    %c0_190 = arith.constant 0 : index
    %437 = vector.load %arg2[%c0_187, %c10_188, %c0_189, %c0_190] : memref<1x14x14x384xf32, #tpu.memory_space<vmem>>, vector<1x1x14x384xf32>
    %438 = vector.shape_cast %437 : vector<1x1x14x384xf32> to vector<14x384xf32>
    %439 = vector.broadcast %1 : vector<1x384xf32> to vector<14x384xf32>
    %440 = arith.mulf %438, %439 : vector<14x384xf32>
    %441 = vector.broadcast %3 : vector<1x384xf32> to vector<14x384xf32>
    %442 = arith.mulf %438, %441 : vector<14x384xf32>
    %443 = vector.broadcast %5 : vector<1x384xf32> to vector<14x384xf32>
    %444 = arith.mulf %438, %443 : vector<14x384xf32>
    %c0_191 = arith.constant 0 : index
    %c11_192 = arith.constant 11 : index
    %c0_193 = arith.constant 0 : index
    %c0_194 = arith.constant 0 : index
    %445 = vector.load %arg2[%c0_191, %c11_192, %c0_193, %c0_194] : memref<1x14x14x384xf32, #tpu.memory_space<vmem>>, vector<1x1x14x384xf32>
    %446 = vector.shape_cast %445 : vector<1x1x14x384xf32> to vector<14x384xf32>
    %447 = vector.broadcast %7 : vector<1x384xf32> to vector<14x384xf32>
    %448 = arith.mulf %446, %447 : vector<14x384xf32>
    %449 = arith.addf %440, %448 : vector<14x384xf32>
    %450 = vector.broadcast %9 : vector<1x384xf32> to vector<14x384xf32>
    %451 = arith.mulf %446, %450 : vector<14x384xf32>
    %452 = arith.addf %442, %451 : vector<14x384xf32>
    %453 = vector.broadcast %11 : vector<1x384xf32> to vector<14x384xf32>
    %454 = arith.mulf %446, %453 : vector<14x384xf32>
    %455 = arith.addf %444, %454 : vector<14x384xf32>
    %c0_195 = arith.constant 0 : index
    %c12 = arith.constant 12 : index
    %c0_196 = arith.constant 0 : index
    %c0_197 = arith.constant 0 : index
    %456 = vector.load %arg2[%c0_195, %c12, %c0_196, %c0_197] : memref<1x14x14x384xf32, #tpu.memory_space<vmem>>, vector<1x1x14x384xf32>
    %457 = vector.shape_cast %456 : vector<1x1x14x384xf32> to vector<14x384xf32>
    %458 = vector.broadcast %13 : vector<1x384xf32> to vector<14x384xf32>
    %459 = arith.mulf %457, %458 : vector<14x384xf32>
    %460 = arith.addf %449, %459 : vector<14x384xf32>
    %461 = vector.broadcast %15 : vector<1x384xf32> to vector<14x384xf32>
    %462 = arith.mulf %457, %461 : vector<14x384xf32>
    %463 = arith.addf %452, %462 : vector<14x384xf32>
    %464 = vector.broadcast %17 : vector<1x384xf32> to vector<14x384xf32>
    %465 = arith.mulf %457, %464 : vector<14x384xf32>
    %466 = arith.addf %455, %465 : vector<14x384xf32>
    %467 = vector.extract_strided_slice %460 {offsets = [0, 0], sizes = [13, 384], strides = [1, 1]} : vector<14x384xf32> to vector<13x384xf32>
    %468 = tpu.concatenate %18, %467 in 0 : vector<1x384xf32>, vector<13x384xf32> -> vector<14x384xf32>
    %469 = arith.addf %463, %468 : vector<14x384xf32>
    %470 = vector.extract_strided_slice %466 {offsets = [1, 0], sizes = [13, 384], strides = [1, 1]} : vector<14x384xf32> to vector<13x384xf32>
    %471 = tpu.concatenate %470, %18 in 0 : vector<13x384xf32>, vector<1x384xf32> -> vector<14x384xf32>
    %472 = arith.addf %469, %471 : vector<14x384xf32>
    %c0_198 = arith.constant 0 : index
    %c11_199 = arith.constant 11 : index
    %c0_200 = arith.constant 0 : index
    %c0_201 = arith.constant 0 : index
    %473 = vector.load %arg4[%c0_198, %c11_199, %c0_200, %c0_201] : memref<1x14x14x384xf32, #tpu.memory_space<vmem>>, vector<1x1x14x384xf32>
    %474 = vector.shape_cast %473 : vector<1x1x14x384xf32> to vector<14x384xf32>
    %475 = vector.shape_cast %472 : vector<14x384xf32> to vector<1x1x14x384xf32>
    tpu.vector_store %arg4[%c0_198, %c11_199, %c0_200, %c0_201], %475 {strides = array<i32>} : memref<1x14x14x384xf32, #tpu.memory_space<vmem>>, vector<1x1x14x384xf32>,
    %c0_202 = arith.constant 0 : index
    %c11_203 = arith.constant 11 : index
    %c0_204 = arith.constant 0 : index
    %c0_205 = arith.constant 0 : index
    %476 = vector.load %arg2[%c0_202, %c11_203, %c0_204, %c0_205] : memref<1x14x14x384xf32, #tpu.memory_space<vmem>>, vector<1x1x14x384xf32>
    %477 = vector.shape_cast %476 : vector<1x1x14x384xf32> to vector<14x384xf32>
    %478 = vector.broadcast %1 : vector<1x384xf32> to vector<14x384xf32>
    %479 = arith.mulf %477, %478 : vector<14x384xf32>
    %480 = vector.broadcast %3 : vector<1x384xf32> to vector<14x384xf32>
    %481 = arith.mulf %477, %480 : vector<14x384xf32>
    %482 = vector.broadcast %5 : vector<1x384xf32> to vector<14x384xf32>
    %483 = arith.mulf %477, %482 : vector<14x384xf32>
    %c0_206 = arith.constant 0 : index
    %c12_207 = arith.constant 12 : index
    %c0_208 = arith.constant 0 : index
    %c0_209 = arith.constant 0 : index
    %484 = vector.load %arg2[%c0_206, %c12_207, %c0_208, %c0_209] : memref<1x14x14x384xf32, #tpu.memory_space<vmem>>, vector<1x1x14x384xf32>
    %485 = vector.shape_cast %484 : vector<1x1x14x384xf32> to vector<14x384xf32>
    %486 = vector.broadcast %7 : vector<1x384xf32> to vector<14x384xf32>
    %487 = arith.mulf %485, %486 : vector<14x384xf32>
    %488 = arith.addf %479, %487 : vector<14x384xf32>
    %489 = vector.broadcast %9 : vector<1x384xf32> to vector<14x384xf32>
    %490 = arith.mulf %485, %489 : vector<14x384xf32>
    %491 = arith.addf %481, %490 : vector<14x384xf32>
    %492 = vector.broadcast %11 : vector<1x384xf32> to vector<14x384xf32>
    %493 = arith.mulf %485, %492 : vector<14x384xf32>
    %494 = arith.addf %483, %493 : vector<14x384xf32>
    %c0_210 = arith.constant 0 : index
    %c13 = arith.constant 13 : index
    %c0_211 = arith.constant 0 : index
    %c0_212 = arith.constant 0 : index
    %495 = vector.load %arg2[%c0_210, %c13, %c0_211, %c0_212] : memref<1x14x14x384xf32, #tpu.memory_space<vmem>>, vector<1x1x14x384xf32>
    %496 = vector.shape_cast %495 : vector<1x1x14x384xf32> to vector<14x384xf32>
    %497 = vector.broadcast %13 : vector<1x384xf32> to vector<14x384xf32>
    %498 = arith.mulf %496, %497 : vector<14x384xf32>
    %499 = arith.addf %488, %498 : vector<14x384xf32>
    %500 = vector.broadcast %15 : vector<1x384xf32> to vector<14x384xf32>
    %501 = arith.mulf %496, %500 : vector<14x384xf32>
    %502 = arith.addf %491, %501 : vector<14x384xf32>
    %503 = vector.broadcast %17 : vector<1x384xf32> to vector<14x384xf32>
    %504 = arith.mulf %496, %503 : vector<14x384xf32>
    %505 = arith.addf %494, %504 : vector<14x384xf32>
    %506 = vector.extract_strided_slice %499 {offsets = [0, 0], sizes = [13, 384], strides = [1, 1]} : vector<14x384xf32> to vector<13x384xf32>
    %507 = tpu.concatenate %18, %506 in 0 : vector<1x384xf32>, vector<13x384xf32> -> vector<14x384xf32>
    %508 = arith.addf %502, %507 : vector<14x384xf32>
    %509 = vector.extract_strided_slice %505 {offsets = [1, 0], sizes = [13, 384], strides = [1, 1]} : vector<14x384xf32> to vector<13x384xf32>
    %510 = tpu.concatenate %509, %18 in 0 : vector<13x384xf32>, vector<1x384xf32> -> vector<14x384xf32>
    %511 = arith.addf %508, %510 : vector<14x384xf32>
    %c0_213 = arith.constant 0 : index
    %c12_214 = arith.constant 12 : index
    %c0_215 = arith.constant 0 : index
    %c0_216 = arith.constant 0 : index
    %512 = vector.load %arg4[%c0_213, %c12_214, %c0_215, %c0_216] : memref<1x14x14x384xf32, #tpu.memory_space<vmem>>, vector<1x1x14x384xf32>
    %513 = vector.shape_cast %512 : vector<1x1x14x384xf32> to vector<14x384xf32>
    %514 = vector.shape_cast %511 : vector<14x384xf32> to vector<1x1x14x384xf32>
    tpu.vector_store %arg4[%c0_213, %c12_214, %c0_215, %c0_216], %514 {strides = array<i32>} : memref<1x14x14x384xf32, #tpu.memory_space<vmem>>, vector<1x1x14x384xf32>,
    %c0_217 = arith.constant 0 : index
    %c12_218 = arith.constant 12 : index
    %c0_219 = arith.constant 0 : index
    %c0_220 = arith.constant 0 : index
    %515 = vector.load %arg2[%c0_217, %c12_218, %c0_219, %c0_220] : memref<1x14x14x384xf32, #tpu.memory_space<vmem>>, vector<1x1x14x384xf32>
    %516 = vector.shape_cast %515 : vector<1x1x14x384xf32> to vector<14x384xf32>
    %517 = vector.broadcast %1 : vector<1x384xf32> to vector<14x384xf32>
    %518 = arith.mulf %516, %517 : vector<14x384xf32>
    %519 = vector.broadcast %3 : vector<1x384xf32> to vector<14x384xf32>
    %520 = arith.mulf %516, %519 : vector<14x384xf32>
    %521 = vector.broadcast %5 : vector<1x384xf32> to vector<14x384xf32>
    %522 = arith.mulf %516, %521 : vector<14x384xf32>
    %c0_221 = arith.constant 0 : index
    %c13_222 = arith.constant 13 : index
    %c0_223 = arith.constant 0 : index
    %c0_224 = arith.constant 0 : index
    %523 = vector.load %arg2[%c0_221, %c13_222, %c0_223, %c0_224] : memref<1x14x14x384xf32, #tpu.memory_space<vmem>>, vector<1x1x14x384xf32>
    %524 = vector.shape_cast %523 : vector<1x1x14x384xf32> to vector<14x384xf32>
    %525 = vector.broadcast %7 : vector<1x384xf32> to vector<14x384xf32>
    %526 = arith.mulf %524, %525 : vector<14x384xf32>
    %527 = arith.addf %518, %526 : vector<14x384xf32>
    %528 = vector.broadcast %9 : vector<1x384xf32> to vector<14x384xf32>
    %529 = arith.mulf %524, %528 : vector<14x384xf32>
    %530 = arith.addf %520, %529 : vector<14x384xf32>
    %531 = vector.broadcast %11 : vector<1x384xf32> to vector<14x384xf32>
    %532 = arith.mulf %524, %531 : vector<14x384xf32>
    %533 = arith.addf %522, %532 : vector<14x384xf32>
    %534 = vector.extract_strided_slice %527 {offsets = [0, 0], sizes = [13, 384], strides = [1, 1]} : vector<14x384xf32> to vector<13x384xf32>
    %535 = tpu.concatenate %18, %534 in 0 : vector<1x384xf32>, vector<13x384xf32> -> vector<14x384xf32>
    %536 = arith.addf %530, %535 : vector<14x384xf32>
    %537 = vector.extract_strided_slice %533 {offsets = [1, 0], sizes = [13, 384], strides = [1, 1]} : vector<14x384xf32> to vector<13x384xf32>
    %538 = tpu.concatenate %537, %18 in 0 : vector<13x384xf32>, vector<1x384xf32> -> vector<14x384xf32>
    %539 = arith.addf %536, %538 : vector<14x384xf32>
    %c0_225 = arith.constant 0 : index
    %c13_226 = arith.constant 13 : index
    %c0_227 = arith.constant 0 : index
    %c0_228 = arith.constant 0 : index
    %540 = vector.load %arg4[%c0_225, %c13_226, %c0_227, %c0_228] : memref<1x14x14x384xf32, #tpu.memory_space<vmem>>, vector<1x1x14x384xf32>
    %541 = vector.shape_cast %540 : vector<1x1x14x384xf32> to vector<14x384xf32>
    %542 = vector.shape_cast %539 : vector<14x384xf32> to vector<1x1x14x384xf32>
    tpu.vector_store %arg4[%c0_225, %c13_226, %c0_227, %c0_228], %542 {strides = array<i32>} : memref<1x14x14x384xf32, #tpu.memory_space<vmem>>, vector<1x1x14x384xf32>,
    return
  }
  func.func @transform_0(%arg0: i32, %arg1: i32) -> (i32, i32, i32, i32) {
    %c0_i32 = arith.constant 0 : i32
    %c0_i32_0 = arith.constant 0 : i32
    %c0_i32_1 = arith.constant 0 : i32
    return %arg0, %c0_i32, %c0_i32_0, %arg1 : i32, i32, i32, i32
  }
  func.func @transform_1(%arg0: i32, %arg1: i32) -> (i32, i32, i32) {
    %c0_i32 = arith.constant 0 : i32
    %c0_i32_0 = arith.constant 0 : i32
    %c0_i32_1 = arith.constant 0 : i32
    return %c0_i32, %c0_i32_0, %arg1 : i32, i32, i32
  }
  func.func @transform_2(%arg0: i32, %arg1: i32) -> (i32, i32, i32, i32) {
    %c0_i32 = arith.constant 0 : i32
    %c0_i32_0 = arith.constant 0 : i32
    %c0_i32_1 = arith.constant 0 : i32
    return %arg0, %c0_i32, %c0_i32_0, %arg1 : i32, i32, i32, i32
  }
}

</mosaic_0001>

<bundles_post_ra>
// kernel: module_forward.1
= control target key start
LH: loop header
LB: loop body
LE: loop exit
PB: predicated region body
PF: predicated region fallthrough
CT: control target
= control target key end

     0   :  { %s3688_s9 = smov 0   ;;  %s3690_s10 = smov 0   ;;  %s6545_s0 = inlined_call_operand.vmem [shape: f32[1,14,14,672], index: 0, kind: input, shape index: {}]   ;;  %s6546_s1 = inlined_call_operand.vmem [shape: f32[9,1,672], index: 1, kind: input, shape index: {}]   ;;  %s6547_s2 = inlined_call_operand.vmem [shape: f32[1,14,14,672], index: 2, kind: output, shape index: {}]  }
   0x1   :  { %s3692_s11 = smov 0   ;;  %s3694_s12 = smov 0  }
   0x2   :  { %s3696_s13 = smov 0  }
   0x3 LB: > { %s21_s14 = sadd.s32 1, %s3667_s12  ;;  %s3264_s15 = sadd.s32 4294967295, %s3671_s13   ;;  %s3671_s13 = sphi %s3696_s13, %s12_s13   ;;  %s3667_s12 = sphi %s3694_s12, %s6707_s12   ;;  %s3663_s11 = sphi %s3692_s11, %s6706_s11   ;;  %s3659_s10 = sphi %s3690_s10, %s6705_s10   ;;  %s3655_s9 = sphi %s3688_s9, %s6704_s9  }
   0x4   : > { %p22_p0 = scmp.ge.s32.totalorder %s21_s14, 2  ;;  %p40_p1 = scmp.ne.s32.totalorder %s3659_s10, %s3655_s9 }
   0x5   : > { %p41_p2 = scmp.eq.s32.totalorder %s3671_s13, 0  ;;  %p98_p4 = scmp.eq.s32.totalorder %s3264_s15, 1 }
   0x6   : > { %s6709_s14 = smov (%p22_p0, %s21_s14), 0  ;;  %s33_s18 = sadd.s32 1, %s3659_s10 }
   0x7   : > { %p3720_p3 = por %p41_p2, %p40_p1  ;;  %s29_s17 = ssub.s32 %s3667_s12, %s6709_s14 }
   0x8   : > { %p31_p5 = scmp.eq.s32.totalorder %s29_s17, 0  ;;  %p3727_p6 = por %p98_p4, %p40_p1 }
   0x9   : > { %p3267_p7 = scmp.ge.s32.totalorder %s3671_s13, 2 }
   0xa   : > { %s3732_s20 = scalar_select %p31_p5, %s3659_s10, %s33_s18  }
   0xb   : > { %120 = sbr.rel (%p3267_p7) target bundleno = 76 (0x4c), region = 16 }
  0x12   : > { %123 = sbr.rel (!%p3720_p3) target bundleno = 65 (0x41), region = 20  ;;  %s125_s21 = sand.u32 (%p3720_p3), 1, %s3659_s10  }
  0x13   : > { %s3587_s22 = smul.u32 (%p3720_p3), 24, %s3667_s12 }
  0x14   : > { %s3589_s23 = smul.u32 (%p3720_p3), 672, %s125_s21 }
  0x15   : > { %s3742_s26 = scalar_lea.vmem (%p3720_p3), %s6545_s0, %s3587_s22 }
  0x16   : > { %v145_v0 = vld [vmem:[%s3742_s26] sm:$0xff] (%p3720_p3)  ;;  %v147_v1 = vld [vmem:[%s3742_s26 + $0x8] sm:$0xff] (%p3720_p3)  ;;  %v149_v2 = vld [vmem:[%s3742_s26 + $0x10] sm:$0xff] (%p3720_p3)  ;;  %s3747_s27 = scalar_lea.vmem (%p3720_p3), [#allocation2], %s3589_s23 }
  0x17   : > { %146 = vst [vmem:[%s3747_s27] sm:$0xff] (%p3720_p3), %v145_v0  ;;  %148 = vst [vmem:[%s3747_s27 + $0x8] sm:$0xff] (%p3720_p3), %v147_v1  ;;  %v151_v3 = vld [vmem:[%s3742_s26 + $0x30] sm:$0xff] (%p3720_p3)  ;;  %v153_v4 = vld [vmem:[%s3742_s26 + $0x38] sm:$0xff] (%p3720_p3) }
  0x18   : > { %150 = vst [vmem:[%s3747_s27 + $0x10] sm:$0xff] (%p3720_p3), %v149_v2  ;;  %v155_v5 = vld [vmem:[%s3742_s26 + $0x40] sm:$0xff] (%p3720_p3)  ;;  %152 = vst [vmem:[%s3747_s27 + $0x18] sm:$0xff] (%p3720_p3), %v151_v3  ;;  %v159_v7 = vld [vmem:[%s3742_s26 + $0x68] sm:$0xff] (%p3720_p3) }
  0x19   : > { %154 = vst [vmem:[%s3747_s27 + $0x20] sm:$0xff] %v153_v4  ;;  %156 = vst [vmem:[%s3747_s27 + $0x28] sm:$0xff] %v155_v5  ;;  %v157_v6 = vld [vmem:[%s3742_s26 + $0x60] sm:$0xff]  ;;  %v161_v8 = vld [vmem:[%s3742_s26 + $0x70] sm:$0xff] }
  0x1a   : > { %158 = vst [vmem:[%s3747_s27 + $0x30] sm:$0xff] %v157_v6  ;;  %160 = vst [vmem:[%s3747_s27 + $0x38] sm:$0xff] %v159_v7  ;;  %v163_v9 = vld [vmem:[%s3742_s26 + $0x90] sm:$0xff]  ;;  %v165_v10 = vld [vmem:[%s3742_s26 + $0x98] sm:$0xff] }
  0x1b   : > { %162 = vst [vmem:[%s3747_s27 + $0x40] sm:$0xff] %v161_v8  ;;  %v167_v11 = vld [vmem:[%s3742_s26 + $0xa0] sm:$0xff]  ;;  %164 = vst [vmem:[%s3747_s27 + $0x48] sm:$0xff] %v163_v9  ;;  %v171_v13 = vld [vmem:[%s3742_s26 + $0xc8] sm:$0xff] }
  0x1c   : > { %166 = vst [vmem:[%s3747_s27 + $0x50] sm:$0xff] %v165_v10  ;;  %168 = vst [vmem:[%s3747_s27 + $0x58] sm:$0xff] %v167_v11  ;;  %v169_v12 = vld [vmem:[%s3742_s26 + $0xc0] sm:$0xff]  ;;  %v173_v14 = vld [vmem:[%s3742_s26 + $0xd0] sm:$0xff] }
  0x1d   : > { %170 = vst [vmem:[%s3747_s27 + $0x60] sm:$0xff] %v169_v12  ;;  %172 = vst [vmem:[%s3747_s27 + $0x68] sm:$0xff] %v171_v13  ;;  %v175_v15 = vld [vmem:[%s3742_s26 + $0xf0] sm:$0xff]  ;;  %v177_v16 = vld [vmem:[%s3742_s26 + $0xf8] sm:$0xff] }
  0x1e   : > { %174 = vst [vmem:[%s3747_s27 + $0x70] sm:$0xff] %v173_v14  ;;  %v179_v17 = vld [vmem:[%s3742_s26 + $0x100] sm:$0xff]  ;;  %176 = vst [vmem:[%s3747_s27 + $0x78] sm:$0xff] %v175_v15  ;;  %v183_v19 = vld [vmem:[%s3742_s26 + $0x128] sm:$0xff] }
  0x1f   : > { %178 = vst [vmem:[%s3747_s27 + $0x80] sm:$0xff] %v177_v16  ;;  %180 = vst [vmem:[%s3747_s27 + $0x88] sm:$0xff] %v179_v17  ;;  %v181_v18 = vld [vmem:[%s3742_s26 + $0x120] sm:$0xff]  ;;  %v185_v20 = vld [vmem:[%s3742_s26 + $0x130] sm:$0xff] }
  0x20   : > { %182 = vst [vmem:[%s3747_s27 + $0x90] sm:$0xff] %v181_v18  ;;  %184 = vst [vmem:[%s3747_s27 + $0x98] sm:$0xff] %v183_v19  ;;  %v187_v21 = vld [vmem:[%s3742_s26 + $0x150] sm:$0xff]  ;;  %v189_v22 = vld [vmem:[%s3742_s26 + $0x158] sm:$0xff] }
  0x21   : > { %186 = vst [vmem:[%s3747_s27 + $0xa0] sm:$0xff] %v185_v20  ;;  %v191_v23 = vld [vmem:[%s3742_s26 + $0x160] sm:$0xff]  ;;  %188 = vst [vmem:[%s3747_s27 + $0xa8] sm:$0xff] %v187_v21  ;;  %v195_v25 = vld [vmem:[%s3742_s26 + $0x188] sm:$0xff] }
  0x22   : > { %190 = vst [vmem:[%s3747_s27 + $0xb0] sm:$0xff] %v189_v22  ;;  %192 = vst [vmem:[%s3747_s27 + $0xb8] sm:$0xff] %v191_v23  ;;  %v193_v24 = vld [vmem:[%s3742_s26 + $0x180] sm:$0xff]  ;;  %v197_v26 = vld [vmem:[%s3742_s26 + $0x190] sm:$0xff] }
  0x23   : > { %194 = vst [vmem:[%s3747_s27 + $0xc0] sm:$0xff] %v193_v24  ;;  %196 = vst [vmem:[%s3747_s27 + $0xc8] sm:$0xff] %v195_v25  ;;  %v199_v27 = vld [vmem:[%s3742_s26 + $0x1b0] sm:$0xff]  ;;  %v201_v28 = vld [vmem:[%s3742_s26 + $0x1b8] sm:$0xff] }
  0x24   : > { %198 = vst [vmem:[%s3747_s27 + $0xd0] sm:$0xff] %v197_v26  ;;  %v203_v29 = vld [vmem:[%s3742_s26 + $0x1c0] sm:$0xff]  ;;  %200 = vst [vmem:[%s3747_s27 + $0xd8] sm:$0xff] %v199_v27  ;;  %v207_v31 = vld [vmem:[%s3742_s26 + $0x1e8] sm:$0xff] }
  0x25   : > { %202 = vst [vmem:[%s3747_s27 + $0xe0] sm:$0xff] %v201_v28  ;;  %204 = vst [vmem:[%s3747_s27 + $0xe8] sm:$0xff] %v203_v29  ;;  %v205_v30 = vld [vmem:[%s3742_s26 + $0x1e0] sm:$0xff]  ;;  %v209_v32 = vld [vmem:[%s3742_s26 + $0x1f0] sm:$0xff] }
  0x26   : > { %206 = vst [vmem:[%s3747_s27 + $0xf0] sm:$0xff] %v205_v30  ;;  %208 = vst [vmem:[%s3747_s27 + $0xf8] sm:$0xff] %v207_v31  ;;  %v211_v33 = vld [vmem:[%s3742_s26 + $0x210] sm:$0xff]  ;;  %v213_v34 = vld [vmem:[%s3742_s26 + $0x218] sm:$0xff] }
  0x27   : > { %210 = vst [vmem:[%s3747_s27 + $0x100] sm:$0xff] %v209_v32  ;;  %v215_v35 = vld [vmem:[%s3742_s26 + $0x220] sm:$0xff]  ;;  %212 = vst [vmem:[%s3747_s27 + $0x108] sm:$0xff] %v211_v33  ;;  %v219_v37 = vld [vmem:[%s3742_s26 + $0x248] sm:$0xff] }
  0x28   : > { %214 = vst [vmem:[%s3747_s27 + $0x110] sm:$0xff] %v213_v34  ;;  %216 = vst [vmem:[%s3747_s27 + $0x118] sm:$0xff] %v215_v35  ;;  %v217_v36 = vld [vmem:[%s3742_s26 + $0x240] sm:$0xff]  ;;  %v221_v38 = vld [vmem:[%s3742_s26 + $0x250] sm:$0xff] }
  0x29   : > { %218 = vst [vmem:[%s3747_s27 + $0x120] sm:$0xff] %v217_v36  ;;  %220 = vst [vmem:[%s3747_s27 + $0x128] sm:$0xff] %v219_v37  ;;  %v223_v39 = vld [vmem:[%s3742_s26 + $0x270] sm:$0xff]  ;;  %v225_v40 = vld [vmem:[%s3742_s26 + $0x278] sm:$0xff] }
  0x2a   : > { %222 = vst [vmem:[%s3747_s27 + $0x130] sm:$0xff] %v221_v38  ;;  %v227_v41 = vld [vmem:[%s3742_s26 + $0x280] sm:$0xff]  ;;  %224 = vst [vmem:[%s3747_s27 + $0x138] sm:$0xff] %v223_v39  ;;  %v231_v43 = vld [vmem:[%s3742_s26 + $0x2a8] sm:$0xff] }
  0x2b   : > { %226 = vst [vmem:[%s3747_s27 + $0x140] sm:$0xff] %v225_v40  ;;  %228 = vst [vmem:[%s3747_s27 + $0x148] sm:$0xff] %v227_v41  ;;  %v229_v42 = vld [vmem:[%s3742_s26 + $0x2a0] sm:$0xff]  ;;  %v233_v44 = vld [vmem:[%s3742_s26 + $0x2b0] sm:$0xff] }
  0x2c   : > { %230 = vst [vmem:[%s3747_s27 + $0x150] sm:$0xff] %v229_v42  ;;  %232 = vst [vmem:[%s3747_s27 + $0x158] sm:$0xff] %v231_v43  ;;  %v235_v45 = vld [vmem:[%s3742_s26 + $0x2d0] sm:$0xff]  ;;  %v237_v46 = vld [vmem:[%s3742_s26 + $0x2d8] sm:$0xff] }
  0x2d   : > { %234 = vst [vmem:[%s3747_s27 + $0x160] sm:$0xff] %v233_v44  ;;  %v239_v47 = vld [vmem:[%s3742_s26 + $0x2e0] sm:$0xff]  ;;  %236 = vst [vmem:[%s3747_s27 + $0x168] sm:$0xff] %v235_v45  ;;  %v243_v49 = vld [vmem:[%s3742_s26 + $0x308] sm:$0xff] }
  0x2e   : > { %238 = vst [vmem:[%s3747_s27 + $0x170] sm:$0xff] %v237_v46  ;;  %240 = vst [vmem:[%s3747_s27 + $0x178] sm:$0xff] %v239_v47  ;;  %v241_v48 = vld [vmem:[%s3742_s26 + $0x300] sm:$0xff]  ;;  %v245_v50 = vld [vmem:[%s3742_s26 + $0x310] sm:$0xff] }
  0x2f   : > { %242 = vst [vmem:[%s3747_s27 + $0x180] sm:$0xff] %v241_v48  ;;  %244 = vst [vmem:[%s3747_s27 + $0x188] sm:$0xff] %v243_v49  ;;  %v247_v51 = vld [vmem:[%s3742_s26 + $0x330] sm:$0xff]  ;;  %v249_v52 = vld [vmem:[%s3742_s26 + $0x338] sm:$0xff] }
  0x30   : > { %246 = vst [vmem:[%s3747_s27 + $0x190] sm:$0xff] %v245_v50  ;;  %v251_v53 = vld [vmem:[%s3742_s26 + $0x340] sm:$0xff]  ;;  %248 = vst [vmem:[%s3747_s27 + $0x198] sm:$0xff] %v247_v51  ;;  %v255_v55 = vld [vmem:[%s3742_s26 + $0x368] sm:$0xff] }
  0x31   : > { %250 = vst [vmem:[%s3747_s27 + $0x1a0] sm:$0xff] %v249_v52  ;;  %252 = vst [vmem:[%s3747_s27 + $0x1a8] sm:$0xff] %v251_v53  ;;  %v253_v54 = vld [vmem:[%s3742_s26 + $0x360] sm:$0xff]  ;;  %v257_v56 = vld [vmem:[%s3742_s26 + $0x370] sm:$0xff] }
  0x32   : > { %254 = vst [vmem:[%s3747_s27 + $0x1b0] sm:$0xff] %v253_v54  ;;  %256 = vst [vmem:[%s3747_s27 + $0x1b8] sm:$0xff] %v255_v55  ;;  %v259_v57 = vld [vmem:[%s3742_s26 + $0x390] sm:$0xff]  ;;  %v261_v58 = vld [vmem:[%s3742_s26 + $0x398] sm:$0xff] }
  0x33   : > { %258 = vst [vmem:[%s3747_s27 + $0x1c0] sm:$0xff] %v257_v56  ;;  %v263_v59 = vld [vmem:[%s3742_s26 + $0x3a0] sm:$0xff]  ;;  %260 = vst [vmem:[%s3747_s27 + $0x1c8] sm:$0xff] %v259_v57  ;;  %v267_v61 = vld [vmem:[%s3742_s26 + $0x3c8] sm:$0xff] }
  0x34   : > { %262 = vst [vmem:[%s3747_s27 + $0x1d0] sm:$0xff] %v261_v58  ;;  %264 = vst [vmem:[%s3747_s27 + $0x1d8] sm:$0xff] %v263_v59  ;;  %v265_v60 = vld [vmem:[%s3742_s26 + $0x3c0] sm:$0xff]  ;;  %v269_v62 = vld [vmem:[%s3742_s26 + $0x3d0] sm:$0xff] }
  0x35   : > { %266 = vst [vmem:[%s3747_s27 + $0x1e0] sm:$0xff] %v265_v60  ;;  %268 = vst [vmem:[%s3747_s27 + $0x1e8] sm:$0xff] %v267_v61  ;;  %v271_v63 = vld [vmem:[%s3742_s26 + $0x3f0] sm:$0xff]  ;;  %v273_v0 = vld [vmem:[%s3742_s26 + $0x3f8] sm:$0xff] }
  0x36   : > { %270 = vst [vmem:[%s3747_s27 + $0x1f0] sm:$0xff] %v269_v62  ;;  %v275_v1 = vld [vmem:[%s3742_s26 + $0x400] sm:$0xff]  ;;  %272 = vst [vmem:[%s3747_s27 + $0x1f8] sm:$0xff] %v271_v63  ;;  %v279_v3 = vld [vmem:[%s3742_s26 + $0x428] sm:$0xff] }
  0x37   : > { %274 = vst [vmem:[%s3747_s27 + $0x200] sm:$0xff] %v273_v0  ;;  %276 = vst [vmem:[%s3747_s27 + $0x208] sm:$0xff] %v275_v1  ;;  %v277_v2 = vld [vmem:[%s3742_s26 + $0x420] sm:$0xff]  ;;  %v281_v4 = vld [vmem:[%s3742_s26 + $0x430] sm:$0xff] }
  0x38   : > { %278 = vst [vmem:[%s3747_s27 + $0x210] sm:$0xff] %v277_v2  ;;  %280 = vst [vmem:[%s3747_s27 + $0x218] sm:$0xff] %v279_v3  ;;  %v283_v5 = vld [vmem:[%s3742_s26 + $0x450] sm:$0xff]  ;;  %v285_v6 = vld [vmem:[%s3742_s26 + $0x458] sm:$0xff] }
  0x39   : > { %282 = vst [vmem:[%s3747_s27 + $0x220] sm:$0xff] %v281_v4  ;;  %v287_v7 = vld [vmem:[%s3742_s26 + $0x460] sm:$0xff]  ;;  %284 = vst [vmem:[%s3747_s27 + $0x228] sm:$0xff] %v283_v5  ;;  %v291_v9 = vld [vmem:[%s3742_s26 + $0x488] sm:$0xff] }
  0x3a   : > { %286 = vst [vmem:[%s3747_s27 + $0x230] sm:$0xff] %v285_v6  ;;  %288 = vst [vmem:[%s3747_s27 + $0x238] sm:$0xff] %v287_v7  ;;  %v289_v8 = vld [vmem:[%s3742_s26 + $0x480] sm:$0xff]  ;;  %v293_v10 = vld [vmem:[%s3742_s26 + $0x490] sm:$0xff] }
  0x3b   : > { %290 = vst [vmem:[%s3747_s27 + $0x240] sm:$0xff] %v289_v8  ;;  %292 = vst [vmem:[%s3747_s27 + $0x248] sm:$0xff] %v291_v9  ;;  %v295_v11 = vld [vmem:[%s3742_s26 + $0x4b0] sm:$0xff]  ;;  %v297_v12 = vld [vmem:[%s3742_s26 + $0x4b8] sm:$0xff] }
  0x3c   : > { %294 = vst [vmem:[%s3747_s27 + $0x250] sm:$0xff] %v293_v10  ;;  %v299_v13 = vld [vmem:[%s3742_s26 + $0x4c0] sm:$0xff]  ;;  %296 = vst [vmem:[%s3747_s27 + $0x258] sm:$0xff] %v295_v11  ;;  %v303_v15 = vld [vmem:[%s3742_s26 + $0x4e8] sm:$0xff] }
  0x3d   : > { %298 = vst [vmem:[%s3747_s27 + $0x260] sm:$0xff] %v297_v12  ;;  %300 = vst [vmem:[%s3747_s27 + $0x268] sm:$0xff] %v299_v13  ;;  %v301_v14 = vld [vmem:[%s3742_s26 + $0x4e0] sm:$0xff]  ;;  %v305_v16 = vld [vmem:[%s3742_s26 + $0x4f0] sm:$0xff] }
  0x3e   : > { %302 = vst [vmem:[%s3747_s27 + $0x270] sm:$0xff] %v301_v14  ;;  %304 = vst [vmem:[%s3747_s27 + $0x278] sm:$0xff] %v303_v15  ;;  %v307_v17 = vld [vmem:[%s3742_s26 + $0x510] sm:$0xff]  ;;  %v309_v18 = vld [vmem:[%s3742_s26 + $0x518] sm:$0xff] }
  0x3f   : > { %306 = vst [vmem:[%s3747_s27 + $0x280] sm:$0xff] %v305_v16  ;;  %v311_v19 = vld [vmem:[%s3742_s26 + $0x520] sm:$0xff]  ;;  %308 = vst [vmem:[%s3747_s27 + $0x288] sm:$0xff] %v307_v17 }
  0x40   : > { %310 = vst [vmem:[%s3747_s27 + $0x290] sm:$0xff] %v309_v18  ;;  %312 = vst [vmem:[%s3747_s27 + $0x298] sm:$0xff] %v311_v19 }
  0x41 PF: > { %318 = sbr.rel (!%p3720_p3) target bundleno = 76 (0x4c), region = 43  ;;  %s320_s28 = sand.u32 (%p3720_p3), 1, %s3659_s10  }
  0x42   : > { %s323_s29 = smul.u32 (%p3720_p3), 3, %s3667_s12 }
  0x43   : > { %s3590_s30 = smul.u32 (%p3720_p3), 27, %s320_s28 }
  0x44   : > { %s324_s5 = scalar_lea.vmem (%p3720_p3), %s6546_s1, %s323_s29 }
  0x45   : > { %v340_v20 = vld [vmem:[%s324_s5] sm:$0x7] (%p3720_p3)  ;;  %v342_v21 = vld [vmem:[%s324_s5 + $0x6] sm:$0x7] (%p3720_p3)  ;;  %s322_s6 = scalar_lea.vmem (%p3720_p3), [#allocation3], %s3590_s30 }
  0x46   : > { %341 = vst [vmem:[%s322_s6] sm:$0x7] (%p3720_p3), %v340_v20  ;;  %343 = vst [vmem:[%s322_s6 + $0x3] sm:$0x7] (%p3720_p3), %v342_v21  ;;  %v344_v22 = vld [vmem:[%s324_s5 + $0xc] sm:$0x7] (%p3720_p3) }
  0x47   : > { %v346_v23 = vld [vmem:[%s324_s5 + $0x12] sm:$0x7] (%p3720_p3)  ;;  %v348_v24 = vld [vmem:[%s324_s5 + $0x18] sm:$0x7] (%p3720_p3)  ;;  %345 = vst [vmem:[%s322_s6 + $0x6] sm:$0x7] (%p3720_p3), %v344_v22 }
  0x48   : > { %347 = vst [vmem:[%s322_s6 + $0x9] sm:$0x7] %v346_v23  ;;  %349 = vst [vmem:[%s322_s6 + $0xc] sm:$0x7] %v348_v24  ;;  %v350_v25 = vld [vmem:[%s324_s5 + $0x1e] sm:$0x7] }
  0x49   : > { %v352_v26 = vld [vmem:[%s324_s5 + $0x24] sm:$0x7]  ;;  %v354_v27 = vld [vmem:[%s324_s5 + $0x2a] sm:$0x7]  ;;  %351 = vst [vmem:[%s322_s6 + $0xf] sm:$0x7] %v350_v25 }
  0x4a   : > { %353 = vst [vmem:[%s322_s6 + $0x12] sm:$0x7] %v352_v26  ;;  %355 = vst [vmem:[%s322_s6 + $0x15] sm:$0x7] %v354_v27  ;;  %v356_v28 = vld [vmem:[%s324_s5 + $0x30] sm:$0x7] }
  0x4b   : > { %357 = vst [vmem:[%s322_s6 + $0x18] sm:$0x7] %v356_v28 }
  0x4c PF: > { %p3269_p8 = scmp.ge.s32.totalorder %s3671_s13, 1  ;;  %p397_p9 = scmp.lt.s32.totalorder %s3671_s13, 3 }
  0x4e   : > { %p398_p10 = pnand %p3269_p8, %p397_p9 }
  0x50   : > { %401 = sbr.rel (%p398_p10) target bundleno = 564 (0x234), region = 84 }
  0x57   : > { %s404_s7 = sand.u32 1, %s3655_s9   ;;  %v462_v29 = vlaneseq  ;;  %vm624_vm0 = vcmask 1040384   ;;  %vm655_vm1 = vcmask 1046528   ;;  %vm671_vm2 = vcmask 1044480   ;;  %s3588_s18 = smul.u32 (%p3727_p6), 24, %s3663_s11 }
  0x58   : > { %s3924_s8 = smul.u32 672, %s404_s7 }
  0x59   : > { %s3592_s15 = smul.u32 27, %s404_s7  ;;  %v463_v30 = vshrl.u32 %v462_v29, 7  ;;  %s6366_s22 = scalar_lea.vmem (%p3727_p6), %s6547_s2, %s3588_s18 }
  0x5a   : > { %s3952_s9 = scalar_lea.vmem [#allocation2], %s3924_s8  ;;  %s4073_s17 = scalar_lea.vmem [#allocation4], %s3924_s8 }
  0x5b   : > { %v3926_v31 = vsub.s32 0, %v463_v30  ;;  %s3928_s16 = scalar_lea.vmem [#allocation3], %s3592_s15  ;;  %v3955_v41 = vld [vmem:[%s3952_s9] sm:$0xff]  ;;  %v458_v42 = vld [vmem:[%s3952_s9 + $0x18] sm:$0x3f]  ;;  %v3970_v46 = vsub.s32 1, %v463_v30 }
  0x5c   : > { %v3272_v32 = vld [vmem:[%s3928_s16 + $0x9] sm:$0x7]  ;;  %v3273_v33 = vld [vmem:[%s3928_s16 + $0xc] sm:$0x7]  ;;  %v3274_v34 = vld [vmem:[%s3928_s16 + $0xf] sm:$0x7] }
  0x5d   : > { %v3934_v35 = vld [vmem:[%s3928_s16 + $0x12] sm:$0x7]  ;;  %v3937_v36 = vld [vmem:[%s3928_s16 + $0x15] sm:$0x7]  ;;  %v3940_v37 = vld [vmem:[%s3928_s16 + $0x18] sm:$0x7]  ;;  %v3943_v38 = vrot.slane %v3272_v32, %v3926_v31  ;;  %v3946_v39 = vrot.slane %v3273_v33, %v3926_v31  ;;  %v3949_v40 = vrot.slane %v3274_v34, %v3926_v31  ;;  %v3994_v57 = vrot.slane %v3272_v32, %v3970_v46 }
  0x5e   : > { %v3960_v43 = vrot.slane %v3934_v35, %v3926_v31  ;;  %v3964_v44 = vrot.slane %v3937_v36, %v3926_v31  ;;  %v3968_v45 = vrot.slane %v3940_v37, %v3926_v31  ;;  %v3980_v51 = vld [vmem:[%s3952_s9 + $0x30] sm:$0xff]  ;;  %v3983_v52 = vld [vmem:[%s3952_s9 + $0x48] sm:$0x3f]  ;;  %v3997_v58 = vrot.slane %v3273_v33, %v3970_v46  ;;  %v459_v2 = vld [vmem:[%s3952_s9 + $0x20] sm:$0x3f] }
  0x5f   : > { %v477_v47 = vmul.f32 %v3943_v38, %v3955_v41  ;;  %v499_v48 = vmul.f32 %v3946_v39, %v3955_v41  ;;  %v521_v49 = vmul.f32 %v3949_v40, %v3955_v41  ;;  %v524_v50 = vmul.f32 %v3949_v40, %v458_v42  ;;  %v4009_v1 = vld [vmem:[%s3952_s9 + $0x8] sm:$0xff]  ;;  %v4020_v7 = vld [vmem:[%s3952_s9 + $0x38] sm:$0xff]  ;;  %v3282_v18 = vld [vmem:[%s3952_s9 + $0x50] sm:$0x3f] }
  0x60   : > { %v550_v53 = vmul.f32 %v3980_v51, %v3960_v43  ;;  %v578_v54 = vmul.f32 %v3980_v51, %v3964_v44  ;;  %v606_v55 = vmul.f32 %v3980_v51, %v3968_v45  ;;  %v609_v56 = vmul.f32 %v3983_v52, %v3968_v45 }
  0x61   : > { %v4000_v59 = vrot.slane %v3274_v34, %v3970_v46  ;;  %v4004_v60 = vrot.slane %v3934_v35, %v3970_v46  ;;  %v478_v3 = vmul.f32 %v3994_v57, %v4009_v1  ;;  %v500_v4 = vmul.f32 %v3997_v58, %v4009_v1 }
  0x62   : > { %v4006_v61 = vadd.f32 %v550_v53, %v477_v47  ;;  %v584_v62 = vadd.f32 %v578_v54, %v499_v48  ;;  %v612_v63 = vadd.f32 %v606_v55, %v521_v49  ;;  %v615_v0 = vadd.f32 %v609_v56, %v524_v50  ;;  %v4060_v48 = vld [vmem:[%s3952_s9 + $0x10] sm:$0xff]  ;;  %v460_v50 = vld [vmem:[%s3952_s9 + $0x28] sm:$0x3f] }
  0x63   : > { %6627 = vst [vmem:[#allocation5_spill] sm:$0xff] %v4000_v59  ;;  %v522_v5 = vmul.f32 %v4000_v59, %v4009_v1  ;;  %v525_v6 = vmul.f32 %v4000_v59, %v459_v2  ;;  %v551_v11 = vmul.f32 %v4020_v7, %v4004_v60  ;;  %v4027_v12 = vrot.slane %v3937_v36, %v3970_v46 }
  0x64   : > { %v625_v8 = vrot.slane %v4006_v61, 7  ;;  %v656_v9 = vrot.slane %v612_v63, 1  ;;  %v657_v10 = vrot.slane %v615_v0, 1  ;;  %v4031_v13 = vrot.slane %v3940_v37, %v3970_v46 }
  0x65   : > { %v4033_v14 = vsub.s32 2, %v463_v30  ;;  %v480_v15 = vmul.f32 %v3943_v38, %v458_v42  ;;  %v4041_v19 = vadd.f32 %v551_v11, %v478_v3  ;;  %v502_v20 = vmul.f32 %v3946_v39, %v458_v42  ;;  %v3283_v11 = vld [vmem:[%s3952_s9 + $0x58] sm:$0x3f] }
  0x66   : > { %6628 = vst [vmem:[#allocation6_spill] sm:$0xff] %v4031_v13  ;;  %v640_v16 = vsel %vm624_vm0, 0.0, %v625_v8  ;;  %v658_v17 = vsel %vm655_vm1, %v656_v9, %v657_v10  ;;  %v579_v22 = vmul.f32 %v4020_v7, %v4027_v12  ;;  %v607_v23 = vmul.f32 %v4020_v7, %v4031_v13 }
  0x67   : > { %v643_v21 = vadd.f32 %v640_v16, %v584_v62  ;;  %v610_v24 = vmul.f32 %v3282_v18, %v4031_v13  ;;  %v626_v25 = vrot.slane %v4041_v19, 7  ;;  %v4051_v26 = vrot.slane %v3272_v32, %v4033_v14 }
  0x68   : > { %v4054_v27 = vrot.slane %v3273_v33, %v4033_v14  ;;  %v4057_v28 = vrot.slane %v3274_v34, %v4033_v14  ;;  %v585_v30 = vadd.f32 %v579_v22, %v500_v4  ;;  %v613_v42 = vadd.f32 %v607_v23, %v522_v5  ;;  %v4093_v5 = vld [vmem:[%s3952_s9 + $0x40] sm:$0xff] }
  0x69   : > { %v675_v29 = vadd.f32 %v658_v17, %v643_v21  ;;  %v616_v47 = vadd.f32 %v610_v24, %v525_v6  ;;  %v641_v49 = vsel %vm624_vm0, 0.0, %v626_v25  ;;  %v479_v32 = vmul.f32 %v4051_v26, %v4060_v48  ;;  %6631 = vst [vmem:[#allocation9_spill] sm:$0xff] %v4093_v5 }
  0x6a   : > { %6629 = vst [vmem:[#allocation7_spill] sm:$0xff] %v4057_v28  ;;  %v501_v33 = vmul.f32 %v4054_v27, %v4060_v48  ;;  %v523_v34 = vmul.f32 %v4057_v28, %v4060_v48  ;;  %v644_v53 = vadd.f32 %v641_v49, %v585_v30  ;;  %v659_v54 = vrot.slane %v613_v42, 1 }
  0x6b   : > { %681 = vst [vmem:[%s4073_s17] sm:$0xff] %v675_v29  ;;  %v660_v55 = vrot.slane %v616_v47, 1  ;;  %v526_v56 = vmul.f32 %v4057_v28, %v460_v50  ;;  %v4079_v62 = vrot.slane %v3934_v35, %v4033_v14  ;;  %v4083_v63 = vrot.slane %v3937_v36, %v4033_v14 }
  0x6c   : > { %v4087_v0 = vrot.slane %v3940_v37, %v4033_v14  ;;  %v553_v3 = vmul.f32 %v3983_v52, %v3960_v43  ;;  %v581_v35 = vmul.f32 %v3983_v52, %v3964_v44  ;;  %v672_v6 = vsel %vm671_vm2, %v657_v10, 0.0 }
  0x6d   : > { %v661_v4 = vsel %vm655_vm1, %v659_v54, %v660_v55  ;;  %v481_v36 = vmul.f32 %v3994_v57, %v459_v2  ;;  %v552_v37 = vmul.f32 %v4093_v5, %v4079_v62  ;;  %v580_v16 = vmul.f32 %v4093_v5, %v4083_v63 }
  0x6e   : > { %6630 = vst [vmem:[#allocation8_spill] sm:$0xff] %v4087_v0  ;;  %v676_v9 = vadd.f32 %v661_v4, %v644_v53  ;;  %v608_v17 = vmul.f32 %v4093_v5, %v4087_v0  ;;  %v611_v21 = vmul.f32 %v3283_v11, %v4087_v0  ;;  %v559_v22 = vadd.f32 %v553_v3, %v480_v15 }
  0x6f   : > { %v587_v23 = vadd.f32 %v581_v35, %v502_v20  ;;  %v503_v52 = vmul.f32 %v3997_v58, %v459_v2  ;;  %v558_v10 = vadd.f32 %v552_v37, %v479_v32  ;;  %v586_v24 = vadd.f32 %v580_v16, %v501_v33 }
  0x70   : > { %682 = vst [vmem:[%s4073_s17 + $0x8] sm:$0xff] %v676_v9  ;;  %v614_v29 = vadd.f32 %v608_v17, %v523_v34  ;;  %v554_v30 = vmul.f32 %v3282_v18, %v4004_v60  ;;  %v617_v42 = vadd.f32 %v611_v21, %v526_v56  ;;  %v628_v47 = vrot.slane %v559_v22, 7  ;;  %v4118_v56 = vld [vmem:[%s3928_s16] sm:$0x7] }
  0x71   : > { %v582_v49 = vmul.f32 %v3282_v18, %v4027_v12  ;;  %v673_v53 = vsel %vm671_vm2, %v660_v55, 0.0  ;;  %v627_v54 = vrot.slane %v558_v10, 7  ;;  %v482_v2 = vmul.f32 %v4051_v26, %v460_v50 }
  0x72   : > { %v662_v4 = vrot.slane %v614_v29, 1  ;;  %v560_v15 = vadd.f32 %v554_v30, %v481_v36  ;;  %v663_v20 = vrot.slane %v617_v42, 1  ;;  %v629_v32 = vsel %vm624_vm0, %v625_v8, %v628_v47  ;;  %v4123_v36 = vld [vmem:[%s3928_s16 + $0x3] sm:$0x7]  ;;  %v4153_v30 = vld [vmem:[%s3952_s9 + $0x18] sm:$0x3f] }
  0x73   : > { %v588_v33 = vadd.f32 %v582_v49, %v503_v52  ;;  %v504_v34 = vmul.f32 %v4054_v27, %v460_v50  ;;  %v642_v18 = vsel %vm624_vm0, 0.0, %v627_v54  ;;  %v646_v3 = vadd.f32 %v629_v32, %v587_v23  ;;  %v4129_v50 = vld [vmem:[%s3928_s16 + $0x6] sm:$0x7] }
  0x74   : > { %v630_v55 = vrot.slane %v560_v15, 7  ;;  %v555_v35 = vmul.f32 %v3283_v11, %v4079_v62  ;;  %v645_v9 = vadd.f32 %v642_v18, %v586_v24  ;;  %v664_v37 = vsel %vm655_vm1, %v662_v4, %v663_v20  ;;  %v4176_v18 = vld [vmem:[%s3952_s9 + $0x78] sm:$0x3f] }
  0x75   : > { %v583_v61 = vmul.f32 %v3283_v11, %v4083_v63  ;;  %v674_v8 = vsel %vm671_vm2, %v663_v20, 0.0  ;;  %v678_v16 = vadd.f32 %v672_v6, %v646_v3  ;;  %v4136_v22 = vrot.slane %v4118_v56, %v3926_v31  ;;  %v4170_v20 = vld [vmem:[%s3952_s9 + $0x60] sm:$0xff] }
  0x76   : > { %v631_v17 = vsel %vm624_vm0, %v626_v25, %v630_v55  ;;  %v561_v21 = vadd.f32 %v555_v35, %v482_v2  ;;  %v677_v23 = vadd.f32 %v664_v37, %v645_v9  ;;  %v4140_v11 = vrot.slane %v4123_v36, %v3926_v31 }
  0x77   : > { %v647_v52 = vadd.f32 %v631_v17, %v588_v33  ;;  %v589_v10 = vadd.f32 %v583_v61, %v504_v34  ;;  %684 = vst [vmem:[%s4073_s17 + $0x18] sm:$0x3f] %v678_v16  ;;  %v709_v19 = vmul.f32 %v4136_v22, %v3955_v41  ;;  %v4147_v25 = vrot.slane %v4129_v50, %v3926_v31 }
  0x78   : > { %v632_v6 = vrot.slane %v561_v21, 7  ;;  %v765_v24 = vmul.f32 %v3980_v51, %v3943_v38  ;;  %683 = vst [vmem:[%s4073_s17 + $0x10] sm:$0xff] %v677_v23  ;;  %v731_v42 = vmul.f32 %v4140_v11, %v3955_v41  ;;  %v777_v47 = vmul.f32 %v3980_v51, %v3946_v39 }
  0x79   : > { %v679_v29 = vadd.f32 %v673_v53, %v647_v52  ;;  %v789_v49 = vmul.f32 %v3980_v51, %v3949_v40  ;;  %v753_v4 = vmul.f32 %v4147_v25, %v3955_v41  ;;  %v756_v15 = vmul.f32 %v4147_v25, %v4153_v30  ;;  %v4167_v53 = vld [vmem:[%s3952_s9 + $0x48] sm:$0x3f] }
  0x7a   : > { %v633_v31 = vsel %vm624_vm0, %v627_v54, %v632_v6  ;;  %v771_v2 = vadd.f32 %v765_v24, %v709_v19  ;;  %v783_v33 = vadd.f32 %v777_v47, %v731_v42  ;;  %v792_v34 = vmul.f32 %v4167_v53, %v3949_v40  ;;  %v4205_v6 = vld [vmem:[%s3952_s9 + $0x20] sm:$0x3f] }
  0x7b   : > { %685 = vst [vmem:[%s4073_s17 + $0x20] sm:$0x3f] %v679_v29  ;;  %v648_v32 = vadd.f32 %v633_v31, %v589_v10  ;;  %v808_v41 = vmul.f32 %v4170_v20, %v3960_v43  ;;  %v795_v54 = vadd.f32 %v789_v49, %v753_v4  ;;  %v820_v3 = vmul.f32 %v4170_v20, %v3964_v44  ;;  %v4222_v4 = vld [vmem:[%s3952_s9 + $0x50] sm:$0x3f] }
  0x7c   : > { %v832_v55 = vmul.f32 %v4170_v20, %v3968_v45  ;;  %v835_v35 = vmul.f32 %v4176_v18, %v3968_v45  ;;  %v798_v37 = vadd.f32 %v792_v34, %v756_v15  ;;  %v4190_v16 = vrot.slane %v4118_v56, %v3970_v46 }
  0x7d   : > { %v680_v9 = vadd.f32 %v674_v8, %v648_v32  ;;  %v4186_v61 = vadd.f32 %v808_v41, %v771_v2  ;;  %v826_v17 = vadd.f32 %v820_v3, %v783_v33  ;;  %v4194_v23 = vrot.slane %v4123_v36, %v3970_v46  ;;  %v4227_v32 = vld [vmem:[%s3952_s9 + $0x68] sm:$0xff] }
  0x7e   : > { %v838_v21 = vadd.f32 %v832_v55, %v795_v54  ;;  %v4198_v52 = vrot.slane %v4129_v50, %v3970_v46  ;;  %v4201_v8 = vadd.f32 %v835_v35, %v798_v37  ;;  %v710_v19 = vmul.f32 %v4190_v16, %v4009_v1 }
  0x7f   : > { %686 = vst [vmem:[%s4073_s17 + $0x28] sm:$0x3f] %v680_v9  ;;  %v6548_v10 = vrot.slane %v4186_v61, 7  ;;  %v766_v24 = vmul.f32 %v4020_v7, %v3994_v57  ;;  %v732_v42 = vmul.f32 %v4194_v23, %v4009_v1  ;;  %v778_v2 = vmul.f32 %v4020_v7, %v3997_v58 }
  0x80   : > { %v880_v29 = vrot.slane %v838_v21, 1  ;;  %v754_v46 = vmul.f32 %v4198_v52, %v4009_v1  ;;  %v757_v47 = vmul.f32 %v4198_v52, %v4205_v6  ;;  %v6550_v31 = vrot.slane %v4201_v8, 1  ;;  %v4243_v21 = vld [vmem:[%s3952_s9 + $0x80] sm:$0x3f] }
  0x81   : > { %v865_v49 = vsel %vm624_vm0, 0.0, %v6548_v10  ;;  %v772_v15 = vadd.f32 %v766_v24, %v710_v19  ;;  %v790_v1 = vmul.f32 %v4020_v7, %v4000_v59  ;;  %v793_v34 = vmul.f32 %v4222_v4, %v4000_v59 }
  0x82   : > { %v868_v33 = vadd.f32 %v865_v49, %v826_v17  ;;  %v809_v41 = vmul.f32 %v4227_v32, %v4004_v60  ;;  %v882_v54 = vsel %vm655_vm1, %v880_v29, %v6550_v31  ;;  %v784_v3 = vadd.f32 %v778_v2, %v732_v42 }
  0x83   : > { %v821_v55 = vmul.f32 %v4227_v32, %v4027_v12  ;;  %v833_v35 = vmul.f32 %v4227_v32, %v4031_v13  ;;  %v796_v37 = vadd.f32 %v790_v1, %v754_v46  ;;  %v799_v17 = vadd.f32 %v793_v34, %v757_v47 }
  0x84   : > { %v898_v9 = vadd.f32 %v882_v54, %v868_v33  ;;  %v4245_v19 = vadd.f32 %v809_v41, %v772_v15  ;;  %v836_v49 = vmul.f32 %v4243_v21, %v4031_v13  ;;  %v4251_v29 = vrot.slane %v4118_v56, %v4033_v14  ;;  %v692_v56 = vld [vmem:[%s3952_s9 + $0x28] sm:$0x3f] }
  0x85   : > { %v827_v24 = vadd.f32 %v821_v55, %v784_v3  ;;  %v4255_v42 = vrot.slane %v4123_v36, %v4033_v14  ;;  %v839_v46 = vadd.f32 %v833_v35, %v796_v37  ;;  %v4261_v15 = vrot.slane %v4129_v50, %v4033_v14  ;;  %v3289_v35 = vld [vmem:[%s3952_s9 + $0x58] sm:$0x3f] }
  0x86   : > { %3296 = vst [vmem:[%s4073_s17 + $0x30] sm:$0xff] %v898_v9  ;;  %v6549_v47 = vrot.slane %v4245_v19, 7  ;;  %v767_v2 = vmul.f32 %v4093_v5, %v4051_v26  ;;  %v842_v33 = vadd.f32 %v836_v49, %v799_v17  ;;  %v711_v36 = vmul.f32 %v4251_v29, %v4060_v48  ;;  %v4280_v17 = vld [vmem:[%s3952_s9 + $0x70] sm:$0xff] }
  0x87   : > { %6632 = vst [vmem:[#allocation10_spill] sm:$0xff] %v4261_v15  ;;  %v733_v1 = vmul.f32 %v4255_v42, %v4060_v48  ;;  %v779_v34 = vmul.f32 %v4093_v5, %v4054_v27  ;;  %v883_v50 = vrot.slane %v839_v46, 1  ;;  %v755_v41 = vmul.f32 %v4261_v15, %v4060_v48  ;;  %6633 = vst [vmem:[#allocation11_spill] sm:$0xff] %v4280_v17 }
  0x88   : > { %v866_v14 = vsel %vm624_vm0, 0.0, %v6549_v47  ;;  %v758_v54 = vmul.f32 %v4261_v15, %v692_v56  ;;  %v884_v55 = vrot.slane %v842_v33, 1  ;;  %v773_v9 = vadd.f32 %v767_v2, %v711_v36  ;;  %v3295_v47 = vld [vmem:[%s3952_s9 + $0x88] sm:$0x3f] }
  0x89   : > { %v869_v3 = vadd.f32 %v866_v14, %v827_v24  ;;  %v785_v37 = vadd.f32 %v779_v34, %v733_v1  ;;  %v791_v49 = vmul.f32 %v4093_v5, %v4057_v28  ;;  %v794_v10 = vmul.f32 %v3289_v35, %v4057_v28 }
  0x8a   : > { %v810_v46 = vmul.f32 %v4280_v17, %v4079_v62  ;;  %v822_v48 = vmul.f32 %v4280_v17, %v4083_v63  ;;  %v885_v24 = vsel %vm655_vm1, %v883_v50, %v884_v55  ;;  %v834_v2 = vmul.f32 %v4280_v17, %v4087_v0 }
  0x8b   : > { %v837_v33 = vmul.f32 %v3295_v47, %v4087_v0  ;;  %v712_v36 = vmul.f32 %v4136_v22, %v4153_v30  ;;  %v899_v1 = vadd.f32 %v885_v24, %v869_v3  ;;  %v797_v34 = vadd.f32 %v791_v49, %v755_v41 }
  0x8c   : > { %v800_v14 = vadd.f32 %v794_v10, %v758_v54  ;;  %v4296_v31 = vadd.f32 %v810_v46, %v773_v9  ;;  %v828_v28 = vadd.f32 %v822_v48, %v785_v37  ;;  %v734_v15 = vmul.f32 %v4140_v11, %v4153_v30 }
  0x8d   : > { %v768_v50 = vmul.f32 %v4167_v53, %v3943_v38  ;;  %v780_v17 = vmul.f32 %v4167_v53, %v3946_v39  ;;  %3297 = vst [vmem:[%s4073_s17 + $0x38] sm:$0xff] %v899_v1  ;;  %v840_v0 = vadd.f32 %v834_v2, %v797_v34  ;;  %v811_v10 = vmul.f32 %v4176_v18, %v3960_v43 }
  0x8e   : > { %v843_v5 = vadd.f32 %v837_v33, %v800_v14  ;;  %v852_v13 = vrot.slane %v4296_v31, 7  ;;  %v823_v3 = vmul.f32 %v4176_v18, %v3964_v44  ;;  %v6634_v30 = vrot.slane %v4201_v8, 1 }
  0x8f   : > { %v774_v41 = vadd.f32 %v768_v50, %v712_v36  ;;  %v786_v54 = vadd.f32 %v780_v17, %v734_v15  ;;  %v886_v37 = vrot.slane %v840_v0, 1  ;;  %v713_v46 = vmul.f32 %v4190_v16, %v4205_v6 }
  0x90   : > { %v895_v9 = vsel %vm671_vm2, %v6634_v30, 0.0  ;;  %v867_v53 = vsel %vm624_vm0, 0.0, %v852_v13  ;;  %v887_v49 = vrot.slane %v843_v5, 1  ;;  %v735_v18 = vmul.f32 %v4194_v23, %v4205_v6 }
  0x91   : > { %v870_v48 = vadd.f32 %v867_v53, %v828_v28  ;;  %v817_v24 = vadd.f32 %v811_v10, %v774_v41  ;;  %v829_v15 = vadd.f32 %v823_v3, %v786_v54  ;;  %v769_v17 = vmul.f32 %v4222_v4, %v3994_v57 }
  0x92   : > { %v888_v8 = vsel %vm655_vm1, %v886_v37, %v887_v49  ;;  %v781_v2 = vmul.f32 %v4222_v4, %v3997_v58  ;;  %v812_v0 = vmul.f32 %v4243_v21, %v4004_v60  ;;  %v824_v28 = vmul.f32 %v4243_v21, %v4027_v12 }
  0x93   : > { %v900_v5 = vadd.f32 %v888_v8, %v870_v48  ;;  %v853_v33 = vrot.slane %v817_v24, 7  ;;  %v896_v36 = vsel %vm671_vm2, %v884_v55, 0.0  ;;  %v775_v1 = vadd.f32 %v769_v17, %v713_v46 }
  0x94   : > { %v787_v6 = vadd.f32 %v781_v2, %v735_v18  ;;  %v714_v34 = vmul.f32 %v4251_v29, %v692_v56  ;;  %v736_v14 = vmul.f32 %v4255_v42, %v692_v56  ;;  %v6635_v4 = vrot.slane %v4186_v61, 7 }
  0x95   : > { %3298 = vst [vmem:[%s4073_s17 + $0x40] sm:$0xff] %v900_v5  ;;  %v770_v10 = vmul.f32 %v3289_v35, %v4051_v26  ;;  %v782_v41 = vmul.f32 %v3289_v35, %v4054_v27  ;;  %v813_v21 = vmul.f32 %v3295_v47, %v4079_v62  ;;  %v818_v55 = vadd.f32 %v812_v0, %v775_v1  ;;  %v4344_v35 = vld [vmem:[%s3952_s9 + $0x48] sm:$0x3f] }
  0x96   : > { %v854_v50 = vsel %vm624_vm0, %v6635_v4, %v853_v33  ;;  %v830_v3 = vadd.f32 %v824_v28, %v787_v6  ;;  %v825_v30 = vmul.f32 %v3295_v47, %v4083_v63  ;;  %v897_v37 = vsel %vm671_vm2, %v887_v49, 0.0  ;;  %v4353_v49 = vld [vmem:[%s3952_s9 + $0x78] sm:$0x3f]  ;;  %v4368_v33 = vld [vmem:[%s3952_s9 + $0x90] sm:$0xff] }
  0x97   : > { %v871_v54 = vadd.f32 %v854_v50, %v829_v15  ;;  %v776_v56 = vadd.f32 %v770_v10, %v714_v34  ;;  %v788_v53 = vadd.f32 %v782_v41, %v736_v14  ;;  %v917_v61 = vmul.f32 %v3980_v51, %v4136_v22 }
  0x98   : > { %v855_v48 = vrot.slane %v818_v55, 7  ;;  %v923_v24 = vmul.f32 %v3980_v51, %v4140_v11  ;;  %v929_v15 = vmul.f32 %v3980_v51, %v4147_v25  ;;  %v932_v8 = vmul.f32 %v4344_v35, %v4147_v25 }
  0x99   : > { %v901_v46 = vadd.f32 %v895_v9, %v871_v54  ;;  %v819_v18 = vadd.f32 %v813_v21, %v776_v56  ;;  %v831_v47 = vadd.f32 %v825_v30, %v788_v53  ;;  %v941_v17 = vmul.f32 %v4170_v20, %v3943_v38  ;;  %v4378_v21 = vld [vmem:[%s3952_s9 + $0xa8] sm:$0x3f]  ;;  %v4391_v53 = vld [vmem:[%s3952_s9 + $0x50] sm:$0x3f] }
  0x9a   : > { %v6636_v9 = vrot.slane %v4245_v19, 7  ;;  %v953_v0 = vmul.f32 %v4170_v20, %v3946_v39  ;;  %v965_v51 = vmul.f32 %v4170_v20, %v3949_v40  ;;  %v968_v5 = vmul.f32 %v4353_v49, %v3949_v40 }
  0x9b   : > { %3299 = vst [vmem:[%s4073_s17 + $0x48] sm:$0x3f] %v901_v46  ;;  %v857_v1 = vrot.slane %v819_v18, 7  ;;  %v947_v6 = vadd.f32 %v941_v17, %v917_v61  ;;  %v984_v19 = vmul.f32 %v4368_v33, %v3960_v43  ;;  %v996_v50 = vmul.f32 %v4368_v33, %v3964_v44  ;;  %v4407_v17 = vld [vmem:[%s3952_s9 + $0x80] sm:$0x3f] }
  0x9c   : > { %v856_v2 = vsel %vm624_vm0, %v6636_v9, %v855_v48  ;;  %v959_v34 = vadd.f32 %v953_v0, %v923_v24  ;;  %v971_v14 = vadd.f32 %v965_v51, %v929_v15  ;;  %v974_v4 = vadd.f32 %v968_v5, %v932_v8  ;;  %v4418_v5 = vld [vmem:[%s3952_s9 + $0x98] sm:$0xff] }
  0x9d   : > { %v872_v28 = vadd.f32 %v856_v2, %v830_v3  ;;  %v858_v41 = vsel %vm624_vm0, %v852_v13, %v857_v1  ;;  %v4380_v54 = vadd.f32 %v984_v19, %v947_v6  ;;  %v1008_v55 = vmul.f32 %v4368_v33, %v3968_v45  ;;  %v4421_v6 = vld [vmem:[%s3952_s9 + $0xb0] sm:$0x3f] }
  0x9e   : > { %v873_v3 = vadd.f32 %v858_v41, %v831_v47  ;;  %v1002_v30 = vadd.f32 %v996_v50, %v959_v34  ;;  %v1011_v56 = vmul.f32 %v4378_v21, %v3968_v45  ;;  %v924_v61 = vmul.f32 %v4020_v7, %v4194_v23  ;;  %v6637_v50 = vld [vmem:[#allocation6_spill] sm:$0xff] }
  0x9f   : > { %v902_v10 = vadd.f32 %v896_v36, %v872_v28  ;;  %v918_v36 = vmul.f32 %v4020_v7, %v4190_v16  ;;  %v1014_v31 = vadd.f32 %v1008_v55, %v971_v14  ;;  %v6563_v13 = vrot.slane %v4380_v54, 7 }
  0xa0   : > { %v930_v46 = vmul.f32 %v4020_v7, %v4198_v52  ;;  %v903_v48 = vadd.f32 %v897_v37, %v873_v3  ;;  %v4397_v24 = vadd.f32 %v1011_v56, %v974_v4  ;;  %v933_v15 = vmul.f32 %v4391_v53, %v4198_v52  ;;  %v6638_v56 = vld [vmem:[#allocation9_spill] sm:$0xff] }
  0xa1   : > { %3300 = vst [vmem:[%s4073_s17 + $0x50] sm:$0x3f] %v902_v10  ;;  %v942_v18 = vmul.f32 %v4227_v32, %v3994_v57  ;;  %v1041_v47 = vsel %vm624_vm0, 0.0, %v6563_v13  ;;  %v1056_v8 = vrot.slane %v1014_v31, 1  ;;  %v954_v7 = vmul.f32 %v4227_v32, %v3997_v58  ;;  %v3319_v13 = vld [vmem:[%s3952_s9 + $0xb8] sm:$0x3f] }
  0xa2   : > { %v966_v37 = vmul.f32 %v4227_v32, %v4000_v59  ;;  %3301 = vst [vmem:[%s4073_s17 + $0x58] sm:$0x3f] %v903_v48  ;;  %v1044_v9 = vadd.f32 %v1041_v47, %v1002_v30  ;;  %v1057_v2 = vrot.slane %v4397_v24, 1  ;;  %v969_v51 = vmul.f32 %v4407_v17, %v4000_v59  ;;  %v6639_v24 = vld [vmem:[#allocation10_spill] sm:$0xff] }
  0xa3   : > { %v948_v0 = vadd.f32 %v942_v18, %v918_v36  ;;  %v960_v28 = vadd.f32 %v954_v7, %v924_v61  ;;  %v985_v19 = vmul.f32 %v4418_v5, %v4004_v60  ;;  %v997_v34 = vmul.f32 %v4418_v5, %v4027_v12  ;;  %v6640_v7 = vld [vmem:[#allocation11_spill] sm:$0xff] }
  0xa4   : > { %v972_v1 = vadd.f32 %v966_v37, %v930_v46  ;;  %v1058_v14 = vsel %vm655_vm1, %v1056_v8, %v1057_v2  ;;  %v975_v4 = vadd.f32 %v969_v51, %v933_v15  ;;  %v1009_v10 = vmul.f32 %v4418_v5, %v6637_v50  ;;  %v4437_v46 = vld [vmem:[%s3952_s9 + $0x58] sm:$0x3f]  ;;  %v3313_v8 = vld [vmem:[%s3952_s9 + $0x88] sm:$0x3f] }
  0xa5   : > { %v1012_v41 = vmul.f32 %v4421_v6, %v6637_v50  ;;  %v1074_v55 = vadd.f32 %v1058_v14, %v1044_v9  ;;  %v4432_v3 = vadd.f32 %v985_v19, %v948_v0  ;;  %v1003_v30 = vadd.f32 %v997_v34, %v960_v28  ;;  %v6641_v28 = vld [vmem:[#allocation7_spill] sm:$0xff] }
  0xa6   : > { %v919_v36 = vmul.f32 %v6638_v56, %v4251_v29  ;;  %v1015_v31 = vadd.f32 %v1009_v10, %v972_v1  ;;  %v925_v48 = vmul.f32 %v6638_v56, %v4255_v42  ;;  %v931_v15 = vmul.f32 %v6638_v56, %v6639_v24  ;;  %v4456_v34 = vld [vmem:[%s3952_s9 + $0xa0] sm:$0xff] }
  0xa7   : > { %v1018_v61 = vadd.f32 %v1012_v41, %v975_v4  ;;  %3320 = vst [vmem:[%s4073_s17 + $0x60] sm:$0xff] %v1074_v55  ;;  %v6567_v18 = vrot.slane %v4432_v3, 7  ;;  %v934_v47 = vmul.f32 %v4437_v46, %v6639_v24  ;;  %v943_v37 = vmul.f32 %v6640_v7, %v4051_v26  ;;  %6642 = vst [vmem:[#allocation9_spill] sm:$0xff] %v4456_v34 }
  0xa8   : > { %v955_v9 = vmul.f32 %v6640_v7, %v4054_v27  ;;  %v1059_v0 = vrot.slane %v1015_v31, 1  ;;  %v967_v1 = vmul.f32 %v6640_v7, %v6641_v28  ;;  %v970_v19 = vmul.f32 %v3313_v8, %v6641_v28  ;;  %v6643_v7 = vld [vmem:[#allocation8_spill] sm:$0xff] }
  0xa9   : > { %v1060_v51 = vrot.slane %v1018_v61, 1  ;;  %v1042_v14 = vsel %vm624_vm0, 0.0, %v6567_v18  ;;  %v949_v4 = vadd.f32 %v943_v37, %v919_v36  ;;  %v986_v41 = vmul.f32 %v4456_v34, %v4079_v62 }
  0xaa   : > { %v961_v10 = vadd.f32 %v955_v9, %v925_v48  ;;  %v1045_v55 = vadd.f32 %v1042_v14, %v1003_v30  ;;  %v973_v31 = vadd.f32 %v967_v1, %v931_v15  ;;  %v976_v61 = vadd.f32 %v970_v19, %v934_v47 }
  0xab   : > { %v1061_v56 = vsel %vm655_vm1, %v1059_v0, %v1060_v51  ;;  %v4465_v24 = vadd.f32 %v986_v41, %v949_v4  ;;  %v998_v28 = vmul.f32 %v4456_v34, %v4083_v63  ;;  %v1010_v18 = vmul.f32 %v4456_v34, %v6643_v7 }
  0xac   : > { %v1013_v36 = vmul.f32 %v3319_v13, %v6643_v7  ;;  %v1075_v48 = vadd.f32 %v1061_v56, %v1045_v55  ;;  %v920_v30 = vmul.f32 %v4344_v35, %v4136_v22  ;;  %v926_v37 = vmul.f32 %v4344_v35, %v4140_v11 }
  0xad   : > { %v944_v15 = vmul.f32 %v4353_v49, %v3943_v38  ;;  %v1004_v47 = vadd.f32 %v998_v28, %v961_v10  ;;  %v1016_v9 = vadd.f32 %v1010_v18, %v973_v31  ;;  %v1028_v1 = vrot.slane %v4465_v24, 7 }
  0xae   : > { %v1019_v0 = vadd.f32 %v1013_v36, %v976_v61  ;;  %3321 = vst [vmem:[%s4073_s17 + $0x68] sm:$0xff] %v1075_v48  ;;  %v956_v14 = vmul.f32 %v4353_v49, %v3946_v39  ;;  %v987_v4 = vmul.f32 %v4378_v21, %v3960_v43  ;;  %v999_v41 = vmul.f32 %v4378_v21, %v3964_v44 }
  0xaf   : > { %v950_v19 = vadd.f32 %v944_v15, %v920_v30  ;;  %v1043_v35 = vsel %vm624_vm0, 0.0, %v1028_v1  ;;  %v1062_v28 = vrot.slane %v1016_v9, 1  ;;  %v1071_v10 = vsel %vm671_vm2, %v1057_v2, 0.0 }
  0xb0   : > { %v1063_v18 = vrot.slane %v1019_v0, 1  ;;  %v1046_v55 = vadd.f32 %v1043_v35, %v1004_v47  ;;  %v962_v56 = vadd.f32 %v956_v14, %v926_v37  ;;  %v921_v49 = vmul.f32 %v4391_v53, %v4190_v16 }
  0xb1   : > { %v993_v31 = vadd.f32 %v987_v4, %v950_v19  ;;  %v927_v21 = vmul.f32 %v4391_v53, %v4194_v23  ;;  %v945_v36 = vmul.f32 %v4407_v17, %v3994_v57  ;;  %v957_v48 = vmul.f32 %v4407_v17, %v3997_v58 }
  0xb2   : > { %v1064_v61 = vsel %vm655_vm1, %v1062_v28, %v1063_v18  ;;  %v1005_v2 = vadd.f32 %v999_v41, %v962_v56  ;;  %v988_v37 = vmul.f32 %v4421_v6, %v4004_v60  ;;  %v1000_v0 = vmul.f32 %v4421_v6, %v4027_v12 }
  0xb3   : > { %v1076_v30 = vadd.f32 %v1064_v61, %v1046_v55  ;;  %v1029_v15 = vrot.slane %v993_v31, 7  ;;  %v951_v47 = vadd.f32 %v945_v36, %v921_v49  ;;  %v963_v9 = vadd.f32 %v957_v48, %v927_v21 }
  0xb4   : > { %v1072_v19 = vsel %vm671_vm2, %v1060_v51, 0.0  ;;  %v6644_v53 = vrot.slane %v4380_v54, 7  ;;  %v922_v17 = vmul.f32 %v4437_v46, %v4251_v29  ;;  %v928_v4 = vmul.f32 %v4437_v46, %v4255_v42  ;;  %v4518_v46 = vld [vmem:[%s3952_s9 + $0x78] sm:$0x3f] }
  0xb5   : > { %3322 = vst [vmem:[%s4073_s17 + $0x70] sm:$0xff] %v1076_v30  ;;  %v946_v41 = vmul.f32 %v3313_v8, %v4051_v26  ;;  %v994_v28 = vadd.f32 %v988_v37, %v951_v47  ;;  %v1006_v6 = vadd.f32 %v1000_v0, %v963_v9  ;;  %v958_v51 = vmul.f32 %v3313_v8, %v4054_v27 }
  0xb6   : > { %v1030_v14 = vsel %vm624_vm0, %v6644_v53, %v1029_v15  ;;  %v989_v54 = vmul.f32 %v3319_v13, %v4079_v62  ;;  %v1001_v56 = vmul.f32 %v3319_v13, %v4083_v63  ;;  %v1073_v31 = vsel %vm671_vm2, %v1063_v18, 0.0  ;;  %v4533_v15 = vld [vmem:[%s3952_s9 + $0xa8] sm:$0x3f]  ;;  %v4544_v53 = vld [vmem:[%s3952_s9 + $0xc0] sm:$0xff] }
  0xb7   : > { %v1047_v35 = vadd.f32 %v1030_v14, %v1005_v2  ;;  %v952_v55 = vadd.f32 %v946_v41, %v922_v17  ;;  %v1031_v61 = vrot.slane %v994_v28, 7  ;;  %v964_v21 = vadd.f32 %v958_v51, %v928_v4 }
  0xb8   : > { %v1093_v36 = vmul.f32 %v4170_v20, %v4136_v22  ;;  %v1099_v8 = vmul.f32 %v4170_v20, %v4140_v11  ;;  %v1105_v30 = vmul.f32 %v4170_v20, %v4147_v25  ;;  %v1108_v13 = vmul.f32 %v4518_v46, %v4147_v25 }
  0xb9   : > { %v1077_v49 = vadd.f32 %v1071_v10, %v1047_v35  ;;  %v995_v48 = vadd.f32 %v989_v54, %v952_v55  ;;  %v6645_v18 = vrot.slane %v4432_v3, 7  ;;  %v1007_v2 = vadd.f32 %v1001_v56, %v964_v21  ;;  %v4554_v54 = vld [vmem:[%s3952_s9 + $0xd8] sm:$0x3f] }
  0xba   : > { %v1117_v37 = vmul.f32 %v4368_v33, %v3943_v38  ;;  %v1129_v47 = vmul.f32 %v4368_v33, %v3946_v39  ;;  %v1141_v0 = vmul.f32 %v4368_v33, %v3949_v40  ;;  %v1144_v3 = vmul.f32 %v4533_v15, %v3949_v40 }
  0xbb   : > { %3323 = vst [vmem:[%s4073_s17 + $0x78] sm:$0x3f] %v1077_v49  ;;  %v1032_v10 = vsel %vm624_vm0, %v6645_v18, %v1031_v61  ;;  %v1033_v20 = vrot.slane %v995_v48, 7  ;;  %v1160_v4 = vmul.f32 %v4544_v53, %v3960_v43  ;;  %v1172_v41 = vmul.f32 %v4544_v53, %v3964_v44 }
  0xbc   : > { %v1048_v9 = vadd.f32 %v1032_v10, %v1006_v6  ;;  %v1123_v14 = vadd.f32 %v1117_v37, %v1093_v36  ;;  %v1135_v17 = vadd.f32 %v1129_v47, %v1099_v8  ;;  %v1147_v6 = vadd.f32 %v1141_v0, %v1105_v30  ;;  %v4578_v10 = vld [vmem:[%s3952_s9 + $0xb0] sm:$0x3f] }
  0xbd   : > { %v1034_v28 = vsel %vm624_vm0, %v1028_v1, %v1033_v20  ;;  %v1150_v51 = vadd.f32 %v1144_v3, %v1108_v13  ;;  %v1184_v61 = vmul.f32 %v4544_v53, %v3968_v45  ;;  %v1187_v24 = vmul.f32 %v4554_v54, %v3968_v45 }
  0xbe   : > { %v1078_v35 = vadd.f32 %v1072_v19, %v1048_v9  ;;  %v1049_v55 = vadd.f32 %v1034_v28, %v1007_v2  ;;  %v4556_v56 = vadd.f32 %v1160_v4, %v1123_v14  ;;  %v1178_v49 = vadd.f32 %v1172_v41, %v1135_v17  ;;  %v4564_v19 = vld [vmem:[%s3952_s9 + $0x80] sm:$0x3f] }
  0xbf   : > { %v1094_v1 = vmul.f32 %v4227_v32, %v4190_v16  ;;  %v1100_v21 = vmul.f32 %v4227_v32, %v4194_v23  ;;  %v1106_v36 = vmul.f32 %v4227_v32, %v4198_v52  ;;  %v1190_v8 = vadd.f32 %v1184_v61, %v1147_v6  ;;  %v4599_v28 = vld [vmem:[%s3952_s9 + $0xe0] sm:$0x3f] }
  0xc0   : > { %3324 = vst [vmem:[%s4073_s17 + $0x80] sm:$0x3f] %v1078_v35  ;;  %v1079_v48 = vadd.f32 %v1073_v31, %v1049_v55  ;;  %v6568_v30 = vrot.slane %v4556_v56, 7  ;;  %v1109_v13 = vmul.f32 %v4564_v19, %v4198_v52  ;;  %v4575_v18 = vadd.f32 %v1187_v24, %v1150_v51  ;;  %v4587_v31 = vld [vmem:[%s3952_s9 + $0xc8] sm:$0xff] }
  0xc1   : > { %v1118_v2 = vmul.f32 %v4418_v5, %v3994_v57  ;;  %v1130_v37 = vmul.f32 %v4418_v5, %v3997_v58  ;;  %v1142_v32 = vmul.f32 %v4418_v5, %v4000_v59  ;;  %v1232_v9 = vrot.slane %v1190_v8, 1  ;;  %v6646_v24 = vld [vmem:[#allocation11_spill] sm:$0xff] }
  0xc2   : > { %3325 = vst [vmem:[%s4073_s17 + $0x88] sm:$0x3f] %v1079_v48  ;;  %v1217_v47 = vsel %vm624_vm0, 0.0, %v6568_v30  ;;  %v1145_v20 = vmul.f32 %v4578_v10, %v4000_v59  ;;  %v1161_v0 = vmul.f32 %v4587_v31, %v4004_v60  ;;  %v1233_v14 = vrot.slane %v4575_v18, 1  ;;  %v3331_v8 = vld [vmem:[%s3952_s9 + $0x88] sm:$0x3f] }
  0xc3   : > { %v1220_v3 = vadd.f32 %v1217_v47, %v1178_v49  ;;  %v1124_v17 = vadd.f32 %v1118_v2, %v1094_v1  ;;  %v1136_v4 = vadd.f32 %v1130_v37, %v1100_v21  ;;  %v1148_v41 = vadd.f32 %v1142_v32, %v1106_v36  ;;  %v6647_v37 = vld [vmem:[#allocation10_spill] sm:$0xff] }
  0xc4   : > { %v1151_v35 = vadd.f32 %v1145_v20, %v1109_v13  ;;  %v1173_v6 = vmul.f32 %v4587_v31, %v4027_v12  ;;  %v1185_v51 = vmul.f32 %v4587_v31, %v6637_v50  ;;  %v1234_v55 = vsel %vm655_vm1, %v1232_v9, %v1233_v14  ;;  %v3337_v20 = vld [vmem:[%s3952_s9 + $0xb8] sm:$0x3f] }
  0xc5   : > { %v4606_v49 = vadd.f32 %v1161_v0, %v1124_v17  ;;  %v1188_v61 = vmul.f32 %v4599_v28, %v6637_v50  ;;  %v1095_v1 = vmul.f32 %v6646_v24, %v4251_v29  ;;  %v1250_v21 = vadd.f32 %v1234_v55, %v1220_v3  ;;  %v6648_v17 = vld [vmem:[#allocation7_spill] sm:$0xff] }
  0xc6   : > { %v1179_v36 = vadd.f32 %v1173_v6, %v1136_v4  ;;  %v1191_v48 = vadd.f32 %v1185_v51, %v1148_v41  ;;  %v1101_v13 = vmul.f32 %v6646_v24, %v4255_v42  ;;  %v1107_v32 = vmul.f32 %v6646_v24, %v6647_v37  ;;  %v4628_v41 = vld [vmem:[%s3952_s9 + $0xd0] sm:$0xff] }
  0xc7   : > { %v1194_v18 = vadd.f32 %v1188_v61, %v1151_v35  ;;  %v6573_v2 = vrot.slane %v4606_v49, 7  ;;  %v1110_v47 = vmul.f32 %v3331_v8, %v6647_v37  ;;  %3344 = vst [vmem:[%s4073_s17 + $0x90] sm:$0xff] %v1250_v21  ;;  %v1119_v0 = vmul.f32 %v4456_v34, %v4051_v26 }
  0xc8   : > { %v1235_v9 = vrot.slane %v1191_v48, 1  ;;  %v1131_v3 = vmul.f32 %v4456_v34, %v4054_v27  ;;  %v1143_v4 = vmul.f32 %v4456_v34, %v6648_v17  ;;  %v1146_v51 = vmul.f32 %v3337_v20, %v6648_v17  ;;  %v3343_v34 = vld [vmem:[%s3952_s9 + $0xe8] sm:$0x3f] }
  0xc9   : > { %v1218_v35 = vsel %vm624_vm0, 0.0, %v6573_v2  ;;  %v1236_v6 = vrot.slane %v1194_v18, 1  ;;  %v1162_v55 = vmul.f32 %v4628_v41, %v4079_v62  ;;  %v1125_v24 = vadd.f32 %v1119_v0, %v1095_v1 }
  0xca   : > { %v1221_v61 = vadd.f32 %v1218_v35, %v1179_v36  ;;  %v1137_v21 = vadd.f32 %v1131_v3, %v1101_v13  ;;  %v1149_v48 = vadd.f32 %v1143_v4, %v1107_v32  ;;  %v1152_v37 = vadd.f32 %v1146_v51, %v1110_v47 }
  0xcb   : > { %v1237_v30 = vsel %vm655_vm1, %v1235_v9, %v1236_v6  ;;  %v1174_v50 = vmul.f32 %v4628_v41, %v4083_v63  ;;  %v1186_v18 = vmul.f32 %v4628_v41, %v6643_v7  ;;  %v4642_v17 = vadd.f32 %v1162_v55, %v1125_v24 }
  0xcc   : > { %v1251_v2 = vadd.f32 %v1237_v30, %v1221_v61  ;;  %v1189_v59 = vmul.f32 %v3343_v34, %v6643_v7  ;;  %v1096_v1 = vmul.f32 %v4518_v46, %v4136_v22  ;;  %v1102_v32 = vmul.f32 %v4518_v46, %v4140_v11 }
  0xcd   : > { %v1180_v36 = vadd.f32 %v1174_v50, %v1137_v21  ;;  %v1192_v13 = vadd.f32 %v1186_v18, %v1149_v48  ;;  %v1120_v47 = vmul.f32 %v4533_v15, %v3943_v38  ;;  %v1204_v0 = vrot.slane %v4642_v17, 7 }
  0xce   : > { %3345 = vst [vmem:[%s4073_s17 + $0x98] sm:$0xff] %v1251_v2  ;;  %v1195_v9 = vadd.f32 %v1189_v59, %v1152_v37  ;;  %v1132_v30 = vmul.f32 %v4533_v15, %v3946_v39  ;;  %v1163_v3 = vmul.f32 %v4554_v54, %v3960_v43  ;;  %v1175_v50 = vmul.f32 %v4554_v54, %v3964_v44 }
  0xcf   : > { %v1238_v4 = vrot.slane %v1192_v13, 1  ;;  %v1126_v35 = vadd.f32 %v1120_v47, %v1096_v1  ;;  %v1247_v46 = vsel %vm671_vm2, %v1233_v14, 0.0  ;;  %v1219_v2 = vsel %vm624_vm0, 0.0, %v1204_v0 }
  0xd0   : > { %v1239_v59 = vrot.slane %v1195_v9, 1  ;;  %v1138_v37 = vadd.f32 %v1132_v30, %v1102_v32  ;;  %v1097_v51 = vmul.f32 %v4564_v19, %v4190_v16  ;;  %v1222_v15 = vadd.f32 %v1219_v2, %v1180_v36 }
  0xd1   : > { %v1169_v55 = vadd.f32 %v1163_v3, %v1126_v35  ;;  %v1103_v61 = vmul.f32 %v4564_v19, %v4194_v23  ;;  %v1121_v54 = vmul.f32 %v4578_v10, %v3994_v57  ;;  %v1133_v21 = vmul.f32 %v4578_v10, %v3997_v58 }
  0xd2   : > { %v1240_v14 = vsel %vm655_vm1, %v1238_v4, %v1239_v59  ;;  %v1181_v24 = vadd.f32 %v1175_v50, %v1138_v37  ;;  %v1164_v48 = vmul.f32 %v4599_v28, %v4004_v60  ;;  %v1176_v13 = vmul.f32 %v4599_v28, %v4027_v12 }
  0xd3   : > { %v1252_v18 = vadd.f32 %v1240_v14, %v1222_v15  ;;  %v1205_v1 = vrot.slane %v1169_v55, 7  ;;  %v1127_v36 = vadd.f32 %v1121_v54, %v1097_v51  ;;  %v1139_v32 = vadd.f32 %v1133_v21, %v1103_v61  ;;  %v4689_v55 = vld [vmem:[%s3952_s9 + $0xa8] sm:$0x3f] }
  0xd4   : > { %v1248_v19 = vsel %vm671_vm2, %v1236_v6, 0.0  ;;  %v1098_v47 = vmul.f32 %v3331_v8, %v4251_v29  ;;  %v1104_v9 = vmul.f32 %v3331_v8, %v4255_v42  ;;  %v6649_v10 = vrot.slane %v4556_v56, 7 }
  0xd5   : > { %3346 = vst [vmem:[%s4073_s17 + $0xa0] sm:$0xff] %v1252_v18  ;;  %v1170_v3 = vadd.f32 %v1164_v48, %v1127_v36  ;;  %v1122_v4 = vmul.f32 %v3337_v20, %v4051_v26  ;;  %v1134_v35 = vmul.f32 %v3337_v20, %v4054_v27  ;;  %v1182_v28 = vadd.f32 %v1176_v13, %v1139_v32  ;;  %v4704_v48 = vld [vmem:[%s3952_s9 + $0xd8] sm:$0x3f] }
  0xd6   : > { %v1206_v30 = vsel %vm624_vm0, %v6649_v10, %v1205_v1  ;;  %v1165_v6 = vmul.f32 %v3343_v34, %v4079_v62  ;;  %v1177_v2 = vmul.f32 %v3343_v34, %v4083_v63  ;;  %v1249_v56 = vsel %vm671_vm2, %v1239_v59, 0.0  ;;  %v4713_v1 = vld [vmem:[%s3952_s9 + $0xf0] sm:$0xff] }
  0xd7   : > { %v1223_v50 = vadd.f32 %v1206_v30, %v1181_v24  ;;  %v1207_v37 = vrot.slane %v1170_v3, 7  ;;  %v1128_v8 = vadd.f32 %v1122_v4, %v1098_v47  ;;  %v1140_v51 = vadd.f32 %v1134_v35, %v1104_v9  ;;  %v4722_v4 = vld [vmem:[%s3952_s9 + $0x108] sm:$0x3f] }
  0xd8   : > { %v1269_v20 = vmul.f32 %v4368_v33, %v4136_v22  ;;  %v1275_v61 = vmul.f32 %v4368_v33, %v4140_v11  ;;  %v1281_v54 = vmul.f32 %v4368_v33, %v4147_v25  ;;  %v6650_v34 = vrot.slane %v4606_v49, 7 }
  0xd9   : > { %v1253_v15 = vadd.f32 %v1247_v46, %v1223_v50  ;;  %v1171_v24 = vadd.f32 %v1165_v6, %v1128_v8  ;;  %v1183_v21 = vadd.f32 %v1177_v2, %v1140_v51  ;;  %v1284_v46 = vmul.f32 %v4689_v55, %v4147_v25  ;;  %v4739_v51 = vld [vmem:[%s3952_s9 + $0xb0] sm:$0x3f] }
  0xda   : > { %v1208_v14 = vsel %vm624_vm0, %v6650_v34, %v1207_v37  ;;  %v1293_v18 = vmul.f32 %v4544_v53, %v3943_v38  ;;  %v1305_v33 = vmul.f32 %v4544_v53, %v3946_v39  ;;  %v1317_v49 = vmul.f32 %v4544_v53, %v3949_v40 }
  0xdb   : > { %3347 = vst [vmem:[%s4073_s17 + $0xa8] sm:$0x3f] %v1253_v15  ;;  %v1224_v59 = vadd.f32 %v1208_v14, %v1182_v28  ;;  %v1209_v36 = vrot.slane %v1171_v24, 7  ;;  %v1320_v13 = vmul.f32 %v4704_v48, %v3949_v40  ;;  %v1336_v32 = vmul.f32 %v4713_v1, %v3960_v43 }
  0xdc   : > { %v1348_v47 = vmul.f32 %v4713_v1, %v3964_v44  ;;  %v1299_v10 = vadd.f32 %v1293_v18, %v1269_v20  ;;  %v1311_v30 = vadd.f32 %v1305_v33, %v1275_v61  ;;  %v1323_v3 = vadd.f32 %v1317_v49, %v1281_v54  ;;  %v6651_v18 = vld [vmem:[#allocation5_spill] sm:$0xff] }
  0xdd   : > { %v1254_v9 = vadd.f32 %v1248_v19, %v1224_v59  ;;  %v1210_v35 = vsel %vm624_vm0, %v1204_v0, %v1209_v36  ;;  %v1326_v50 = vadd.f32 %v1320_v13, %v1284_v46  ;;  %v1360_v28 = vmul.f32 %v4713_v1, %v3968_v45  ;;  %v4752_v46 = vld [vmem:[%s3952_s9 + $0xe0] sm:$0x3f] }
  0xde   : > { %v1363_v6 = vmul.f32 %v4722_v4, %v3968_v45  ;;  %v1225_v19 = vadd.f32 %v1210_v35, %v1183_v21  ;;  %v4732_v2 = vadd.f32 %v1336_v32, %v1299_v10  ;;  %v1354_v37 = vadd.f32 %v1348_v47, %v1311_v30 }
  0xdf   : > { %3348 = vst [vmem:[%s4073_s17 + $0xb0] sm:$0x3f] %v1254_v9  ;;  %v1270_v8 = vmul.f32 %v4418_v5, %v4190_v16  ;;  %v1366_v17 = vadd.f32 %v1360_v28, %v1323_v3  ;;  %v1276_v15 = vmul.f32 %v4418_v5, %v4194_v23  ;;  %v1282_v20 = vmul.f32 %v4418_v5, %v4198_v52  ;;  %v4773_v3 = vld [vmem:[%s3952_s9 + $0x110] sm:$0x3f]  ;;  %v6652_v28 = vld [vmem:[#allocation6_spill] sm:$0xff] }
  0xe0   : > { %v4736_v0 = vadd.f32 %v1363_v6, %v1326_v50  ;;  %v1255_v61 = vadd.f32 %v1249_v56, %v1225_v19  ;;  %v6577_v54 = vrot.slane %v4732_v2, 7  ;;  %v1285_v34 = vmul.f32 %v4739_v51, %v4198_v52  ;;  %v4759_v56 = vld [vmem:[%s3952_s9 + $0xf8] sm:$0xff] }
  0xe1   : > { %v1294_v14 = vmul.f32 %v4587_v31, %v3994_v57  ;;  %v1408_v24 = vrot.slane %v1366_v17, 1  ;;  %v1306_v59 = vmul.f32 %v4587_v31, %v3997_v58  ;;  %v1318_v5 = vmul.f32 %v4587_v31, %v6651_v18 }
  0xe2   : > { %v6578_v21 = vrot.slane %v4736_v0, 1  ;;  %3349 = vst [vmem:[%s4073_s17 + $0xb8] sm:$0x3f] %v1255_v61  ;;  %v1393_v33 = vsel %vm624_vm0, 0.0, %v6577_v54  ;;  %v1321_v36 = vmul.f32 %v4752_v46, %v6651_v18  ;;  %v1337_v13 = vmul.f32 %v4759_v56, %v4004_v60 }
  0xe3   : > { %v1300_v49 = vadd.f32 %v1294_v14, %v1270_v8  ;;  %v1396_v32 = vadd.f32 %v1393_v33, %v1354_v37  ;;  %v1312_v9 = vadd.f32 %v1306_v59, %v1276_v15  ;;  %v1324_v10 = vadd.f32 %v1318_v5, %v1282_v20  ;;  %v6653_v8 = vld [vmem:[#allocation9_spill] sm:$0xff] }
  0xe4   : > { %v1410_v47 = vsel %vm655_vm1, %v1408_v24, %v6578_v21  ;;  %v1327_v30 = vadd.f32 %v1321_v36, %v1285_v34  ;;  %v1349_v50 = vmul.f32 %v4759_v56, %v4027_v12  ;;  %v1361_v6 = vmul.f32 %v4759_v56, %v6652_v28  ;;  %v3355_v14 = vld [vmem:[%s3952_s9 + $0xb8] sm:$0x3f]  ;;  %v6654_v24 = vld [vmem:[#allocation10_spill] sm:$0xff] }
  0xe5   : > { %v4775_v35 = vadd.f32 %v1337_v13, %v1300_v49  ;;  %v1426_v19 = vadd.f32 %v1410_v47, %v1396_v32  ;;  %v1364_v37 = vmul.f32 %v4773_v3, %v6652_v28  ;;  %v1271_v17 = vmul.f32 %v6653_v8, %v4251_v29  ;;  %v3361_v49 = vld [vmem:[%s3952_s9 + $0xe8] sm:$0x3f] }
  0xe6   : > { %v1277_v15 = vmul.f32 %v6653_v8, %v4255_v42  ;;  %v1355_v20 = vadd.f32 %v1349_v50, %v1312_v9  ;;  %v1367_v61 = vadd.f32 %v1361_v6, %v1324_v10  ;;  %v1283_v59 = vmul.f32 %v6653_v8, %v6654_v24  ;;  %v6655_v9 = vld [vmem:[#allocation7_spill] sm:$0xff] }
  0xe7   : > { %v6581_v34 = vrot.slane %v4775_v35, 7  ;;  %3368 = vst [vmem:[%s4073_s17 + $0xc0] sm:$0xff] %v1426_v19  ;;  %v1370_v5 = vadd.f32 %v1364_v37, %v1327_v30  ;;  %v1286_v33 = vmul.f32 %v3355_v14, %v6654_v24  ;;  %v1295_v36 = vmul.f32 %v4628_v41, %v4051_v26  ;;  %v4805_v8 = vld [vmem:[%s3952_s9 + $0x100] sm:$0xff]  ;;  %v3367_v24 = vld [vmem:[%s3952_s9 + $0x118] sm:$0x3f] }
  0xe8   : > { %v1307_v13 = vmul.f32 %v4628_v41, %v4054_v27  ;;  %v1411_v47 = vrot.slane %v1367_v61, 1  ;;  %v1319_v10 = vmul.f32 %v4628_v41, %v6655_v9  ;;  %v1322_v30 = vmul.f32 %v3361_v49, %v6655_v9  ;;  %6656 = vst [vmem:[#allocation8_spill] sm:$0xff] %v4805_v8 }
  0xe9   : > { %v1394_v32 = vsel %vm624_vm0, 0.0, %v6581_v34  ;;  %v1412_v6 = vrot.slane %v1370_v5, 1  ;;  %v1301_v19 = vadd.f32 %v1295_v36, %v1271_v17  ;;  %v1338_v28 = vmul.f32 %v4805_v8, %v4079_v62 }
  0xea   : > { %v1397_v50 = vadd.f32 %v1394_v32, %v1355_v20  ;;  %v1313_v37 = vadd.f32 %v1307_v13, %v1277_v15  ;;  %v1325_v54 = vadd.f32 %v1319_v10, %v1283_v59  ;;  %v1328_v21 = vadd.f32 %v1322_v30, %v1286_v33 }
  0xeb   : > { %v1350_v61 = vmul.f32 %v4805_v8, %v4083_v63  ;;  %v1413_v34 = vsel %vm655_vm1, %v1411_v47, %v1412_v6  ;;  %v1362_v20 = vmul.f32 %v4805_v8, %v6643_v7  ;;  %v1365_v17 = vmul.f32 %v3367_v24, %v6643_v7 }
  0xec   : > { %v1272_v15 = vmul.f32 %v4689_v55, %v4136_v22  ;;  %v1427_v59 = vadd.f32 %v1413_v34, %v1397_v50  ;;  %v4818_v5 = vadd.f32 %v1338_v28, %v1301_v19  ;;  %v1278_v36 = vmul.f32 %v4689_v55, %v4140_v11 }
  0xed   : > { %v1356_v33 = vadd.f32 %v1350_v61, %v1313_v37  ;;  %v1368_v13 = vadd.f32 %v1362_v20, %v1325_v54  ;;  %v1371_v32 = vadd.f32 %v1365_v17, %v1328_v21  ;;  %v1296_v47 = vmul.f32 %v4704_v48, %v3943_v38 }
  0xee   : > { %v1308_v10 = vmul.f32 %v4704_v48, %v3946_v39  ;;  %3369 = vst [vmem:[%s4073_s17 + $0xc8] sm:$0xff] %v1427_v59  ;;  %v1380_v30 = vrot.slane %v4818_v5, 7  ;;  %v1339_v34 = vmul.f32 %v4722_v4, %v3960_v43  ;;  %v1351_v28 = vmul.f32 %v4722_v4, %v3964_v44 }
  0xef   : > { %v6657_v50 = vrot.slane %v4736_v0, 1  ;;  %v1414_v54 = vrot.slane %v1368_v13, 1  ;;  %v1415_v21 = vrot.slane %v1371_v32, 1  ;;  %v1302_v19 = vadd.f32 %v1296_v47, %v1272_v15 }
  0xf0   : > { %v1314_v37 = vadd.f32 %v1308_v10, %v1278_v36  ;;  %v1395_v61 = vsel %vm624_vm0, 0.0, %v1380_v30  ;;  %v1273_v48 = vmul.f32 %v4739_v51, %v4190_v16  ;;  %v1279_v20 = vmul.f32 %v4739_v51, %v4194_v23 }
  0xf1   : > { %v1423_v55 = vsel %vm671_vm2, %v6657_v50, 0.0  ;;  %v1297_v17 = vmul.f32 %v4752_v46, %v3994_v57  ;;  %v1398_v4 = vadd.f32 %v1395_v61, %v1356_v33  ;;  %v1416_v0 = vsel %vm655_vm1, %v1414_v54, %v1415_v21 }
  0xf2   : > { %v1345_v59 = vadd.f32 %v1339_v34, %v1302_v19  ;;  %v1357_v5 = vadd.f32 %v1351_v28, %v1314_v37  ;;  %v1309_v15 = vmul.f32 %v4752_v46, %v3997_v58  ;;  %v1340_v36 = vmul.f32 %v4773_v3, %v4004_v60 }
  0xf3   : > { %v1303_v13 = vadd.f32 %v1297_v17, %v1273_v48  ;;  %v1352_v32 = vmul.f32 %v4773_v3, %v4027_v12  ;;  %v1428_v51 = vadd.f32 %v1416_v0, %v1398_v4  ;;  %v1424_v10 = vsel %vm671_vm2, %v1412_v6, 0.0 }
  0xf4   : > { %v1381_v47 = vrot.slane %v1345_v59, 7  ;;  %v1274_v33 = vmul.f32 %v3355_v14, %v4251_v29  ;;  %v1315_v50 = vadd.f32 %v1309_v15, %v1279_v20  ;;  %v1280_v34 = vmul.f32 %v3355_v14, %v4255_v42 }
  0xf5   : > { %v1346_v54 = vadd.f32 %v1340_v36, %v1303_v13  ;;  %v1298_v28 = vmul.f32 %v3361_v49, %v4051_v26  ;;  %3370 = vst [vmem:[%s4073_s17 + $0xd0] sm:$0xff] %v1428_v51  ;;  %v6658_v46 = vrot.slane %v4732_v2, 7  ;;  %v1310_v3 = vmul.f32 %v3361_v49, %v4054_v27  ;;  %v4869_v13 = vld [vmem:[%s3952_s9 + $0xd8] sm:$0x3f]  ;;  %v4876_v51 = vld [vmem:[%s3952_s9 + $0x108] sm:$0x3f] }
  0xf6   : > { %v1341_v37 = vmul.f32 %v3367_v24, %v4079_v62  ;;  %v1353_v6 = vmul.f32 %v3367_v24, %v4083_v63  ;;  %v1358_v48 = vadd.f32 %v1352_v32, %v1315_v50  ;;  %v1425_v4 = vsel %vm671_vm2, %v1415_v21, 0.0  ;;  %v4888_v50 = vld [vmem:[%s3952_s9 + $0x120] sm:$0xff] }
  0xf7   : > { %v1382_v19 = vsel %vm624_vm0, %v6658_v46, %v1381_v47  ;;  %v1383_v20 = vrot.slane %v1346_v54, 7  ;;  %v1304_v14 = vadd.f32 %v1298_v28, %v1274_v33  ;;  %v1316_v17 = vadd.f32 %v1310_v3, %v1280_v34 }
  0xf8   : > { %v1399_v61 = vadd.f32 %v1382_v19, %v1357_v5  ;;  %v1445_v2 = vmul.f32 %v4544_v53, %v4136_v22  ;;  %v1451_v0 = vmul.f32 %v4544_v53, %v4140_v11  ;;  %v6659_v59 = vrot.slane %v4775_v35, 7 }
  0xf9   : > { %v1347_v5 = vadd.f32 %v1341_v37, %v1304_v14  ;;  %v1457_v15 = vmul.f32 %v4544_v53, %v4147_v25  ;;  %v1359_v21 = vadd.f32 %v1353_v6, %v1316_v17  ;;  %v1460_v32 = vmul.f32 %v4869_v13, %v4147_v25 }
  0xfa   : > { %v1429_v49 = vadd.f32 %v1423_v55, %v1399_v61  ;;  %v1384_v24 = vsel %vm624_vm0, %v6659_v59, %v1383_v20  ;;  %v1469_v55 = vmul.f32 %v4713_v1, %v3943_v38  ;;  %v1481_v47 = vmul.f32 %v4713_v1, %v3946_v39  ;;  %v4896_v61 = vld [vmem:[%s3952_s9 + $0x138] sm:$0x3f] }
  0xfb   : > { %v1400_v36 = vadd.f32 %v1384_v24, %v1358_v48  ;;  %v1385_v35 = vrot.slane %v1347_v5, 7  ;;  %v1493_v53 = vmul.f32 %v4713_v1, %v3949_v40  ;;  %v1496_v33 = vmul.f32 %v4876_v51, %v3949_v40 }
  0xfc   : > { %3371 = vst [vmem:[%s4073_s17 + $0xd8] sm:$0x3f] %v1429_v49  ;;  %v1475_v34 = vadd.f32 %v1469_v55, %v1445_v2  ;;  %v1512_v28 = vmul.f32 %v4888_v50, %v3960_v43  ;;  %v1524_v46 = vmul.f32 %v4888_v50, %v3964_v44  ;;  %v1487_v3 = vadd.f32 %v1481_v47, %v1451_v0 }
  0xfd   : > { %v1430_v54 = vadd.f32 %v1424_v10, %v1400_v36  ;;  %v1386_v19 = vsel %vm624_vm0, %v1380_v30, %v1385_v35  ;;  %v1499_v37 = vadd.f32 %v1493_v53, %v1457_v15  ;;  %v1502_v6 = vadd.f32 %v1496_v33, %v1460_v32  ;;  %v4915_v15 = vld [vmem:[%s3952_s9 + $0xe0] sm:$0x3f] }
  0xfe   : > { %v1401_v48 = vadd.f32 %v1386_v19, %v1359_v21  ;;  %v4899_v20 = vadd.f32 %v1512_v28, %v1475_v34  ;;  %v1536_v10 = vmul.f32 %v4888_v50, %v3968_v45  ;;  %v1539_v14 = vmul.f32 %v4896_v61, %v3968_v45  ;;  %v4920_v21 = vld [vmem:[%s3952_s9 + $0x110] sm:$0x3f] }
  0xff   : > { %3372 = vst [vmem:[%s4073_s17 + $0xe0] sm:$0x3f] %v1430_v54  ;;  %v1530_v17 = vadd.f32 %v1524_v46, %v1487_v3  ;;  %v1446_v30 = vmul.f32 %v4587_v31, %v4190_v16  ;;  %v1452_v2 = vmul.f32 %v4587_v31, %v4194_v23  ;;  %v1458_v0 = vmul.f32 %v4587_v31, %v4198_v52  ;;  %v4936_v46 = vld [vmem:[%s3952_s9 + $0x128] sm:$0xff] }
 0x100   : > { %v1431_v49 = vadd.f32 %v1425_v4, %v1401_v48  ;;  %v1542_v59 = vadd.f32 %v1536_v10, %v1499_v37  ;;  %v4911_v24 = vadd.f32 %v1539_v14, %v1502_v6  ;;  %v6582_v5 = vrot.slane %v4899_v20, 7  ;;  %v4940_v37 = vld [vmem:[%s3952_s9 + $0x140] sm:$0x3f] }
 0x101   : > { %v1461_v36 = vmul.f32 %v4915_v15, %v4198_v52  ;;  %v1470_v32 = vmul.f32 %v4759_v56, %v3994_v57  ;;  %v1482_v31 = vmul.f32 %v4759_v56, %v3997_v58  ;;  %v1494_v4 = vmul.f32 %v4759_v56, %v6651_v18  ;;  %v6660_v14 = vld [vmem:[#allocation6_spill] sm:$0xff] }
 0x102   : > { %3373 = vst [vmem:[%s4073_s17 + $0xe8] sm:$0x3f] %v1431_v49  ;;  %v1569_v55 = vsel %vm624_vm0, 0.0, %v6582_v5  ;;  %v1584_v35 = vrot.slane %v1542_v59, 1  ;;  %v1585_v47 = vrot.slane %v4911_v24, 1  ;;  %v1497_v53 = vmul.f32 %v4920_v21, %v6651_v18 }
 0x103   : > { %v1572_v33 = vadd.f32 %v1569_v55, %v1530_v17  ;;  %v1476_v54 = vadd.f32 %v1470_v32, %v1446_v30  ;;  %v1488_v34 = vadd.f32 %v1482_v31, %v1452_v2  ;;  %v1500_v28 = vadd.f32 %v1494_v4, %v1458_v0  ;;  %v4955_v59 = vld [vmem:[%s3952_s9 + $0xe8] sm:$0x3f] }
 0x104   : > { %v1586_v19 = vsel %vm655_vm1, %v1584_v35, %v1585_v47  ;;  %v1503_v3 = vadd.f32 %v1497_v53, %v1461_v36  ;;  %v1513_v6 = vmul.f32 %v4936_v46, %v4004_v60  ;;  %v1525_v48 = vmul.f32 %v4936_v46, %v4027_v12  ;;  %v6661_v36 = vld [vmem:[#allocation10_spill] sm:$0xff]  ;;  %v3385_v35 = vld [vmem:[%s3952_s9 + $0x118] sm:$0x3f] }
 0x105   : > { %v1602_v10 = vadd.f32 %v1586_v19, %v1572_v33  ;;  %v1537_v17 = vmul.f32 %v4936_v46, %v6660_v14  ;;  %v1540_v30 = vmul.f32 %v4940_v37, %v6660_v14  ;;  %v1447_v2 = vmul.f32 %v4628_v41, %v4251_v29 }
 0x106   : > { %v4952_v0 = vadd.f32 %v1513_v6, %v1476_v54  ;;  %v1531_v49 = vadd.f32 %v1525_v48, %v1488_v34  ;;  %v1453_v24 = vmul.f32 %v4628_v41, %v4255_v42  ;;  %v1459_v32 = vmul.f32 %v4628_v41, %v6661_v36 }
 0x107   : > { %3392 = vst [vmem:[%s4073_s17 + $0xf0] sm:$0xff] %v1602_v10  ;;  %v1543_v31 = vadd.f32 %v1537_v17, %v1500_v28  ;;  %v1546_v4 = vadd.f32 %v1540_v30, %v1503_v3  ;;  %v1462_v55 = vmul.f32 %v4955_v59, %v6661_v36  ;;  %v1471_v53 = vmul.f32 %v4805_v8, %v4051_v26  ;;  %v4974_v28 = vld [vmem:[%s3952_s9 + $0x130] sm:$0xff] }
 0x108   : > { %v1555_v33 = vrot.slane %v4952_v0, 7  ;;  %v1483_v54 = vmul.f32 %v4805_v8, %v4054_v27  ;;  %v1495_v34 = vmul.f32 %v4805_v8, %v6655_v9  ;;  %v1498_v41 = vmul.f32 %v3385_v35, %v6655_v9  ;;  %v3391_v9 = vld [vmem:[%s3952_s9 + $0x148] sm:$0x3f] }
 0x109   : > { %v1587_v19 = vrot.slane %v1543_v31, 1  ;;  %v1588_v3 = vrot.slane %v1546_v4, 1  ;;  %v1477_v6 = vadd.f32 %v1471_v53, %v1447_v2  ;;  %v1514_v48 = vmul.f32 %v4974_v28, %v4079_v62 }
 0x10a   : > { %v1570_v10 = vsel %vm624_vm0, 0.0, %v1555_v33  ;;  %v1489_v17 = vadd.f32 %v1483_v54, %v1453_v24  ;;  %v1501_v30 = vadd.f32 %v1495_v34, %v1459_v32  ;;  %v1504_v5 = vadd.f32 %v1498_v41, %v1462_v55 }
 0x10b   : > { %v1573_v36 = vadd.f32 %v1570_v10, %v1531_v49  ;;  %v1589_v8 = vsel %vm655_vm1, %v1587_v19, %v1588_v3  ;;  %v4983_v14 = vadd.f32 %v1514_v48, %v1477_v6  ;;  %v1526_v2 = vmul.f32 %v4974_v28, %v4083_v63 }
 0x10c   : > { %v1538_v31 = vmul.f32 %v4974_v28, %v6643_v7  ;;  %v1541_v4 = vmul.f32 %v3391_v9, %v6643_v7  ;;  %v1448_v24 = vmul.f32 %v4869_v13, %v4136_v22  ;;  %v1454_v49 = vmul.f32 %v4869_v13, %v4140_v11 }
 0x10d   : > { %v1603_v32 = vadd.f32 %v1589_v8, %v1573_v36  ;;  %v1532_v55 = vadd.f32 %v1526_v2, %v1489_v17  ;;  %v1556_v53 = vrot.slane %v4983_v14, 7  ;;  %v1472_v54 = vmul.f32 %v4876_v51, %v3943_v38 }
 0x10e   : > { %v1544_v34 = vadd.f32 %v1538_v31, %v1501_v30  ;;  %v1547_v41 = vadd.f32 %v1541_v4, %v1504_v5  ;;  %v1484_v19 = vmul.f32 %v4876_v51, %v3946_v39  ;;  %v1515_v6 = vmul.f32 %v4896_v61, %v3960_v43 }
 0x10f   : > { %3393 = vst [vmem:[%s4073_s17 + $0xf8] sm:$0xff] %v1603_v32  ;;  %v1571_v13 = vsel %vm624_vm0, 0.0, %v1556_v53  ;;  %v1478_v8 = vadd.f32 %v1472_v54, %v1448_v24  ;;  %v1527_v36 = vmul.f32 %v4896_v61, %v3964_v44  ;;  %v1599_v48 = vsel %vm671_vm2, %v1585_v47, 0.0 }
 0x110   : > { %v1574_v10 = vadd.f32 %v1571_v13, %v1532_v55  ;;  %v1590_v17 = vrot.slane %v1544_v34, 1  ;;  %v1591_v5 = vrot.slane %v1547_v41, 1  ;;  %v1490_v30 = vadd.f32 %v1484_v19, %v1454_v49 }
 0x111   : > { %v1521_v2 = vadd.f32 %v1515_v6, %v1478_v8  ;;  %v1449_v51 = vmul.f32 %v4915_v15, %v4190_v16  ;;  %v1455_v31 = vmul.f32 %v4915_v15, %v4194_v23  ;;  %v1473_v4 = vmul.f32 %v4920_v21, %v3994_v57 }
 0x112   : > { %v1592_v24 = vsel %vm655_vm1, %v1590_v17, %v1591_v5  ;;  %v1533_v61 = vadd.f32 %v1527_v36, %v1490_v30  ;;  %v1485_v47 = vmul.f32 %v4920_v21, %v3997_v58  ;;  %v1516_v49 = vmul.f32 %v4940_v37, %v4004_v60 }
 0x113   : > { %v1604_v32 = vadd.f32 %v1592_v24, %v1574_v10  ;;  %v1557_v55 = vrot.slane %v1521_v2, 7  ;;  %v1479_v54 = vadd.f32 %v1473_v4, %v1449_v51  ;;  %v1528_v34 = vmul.f32 %v4940_v37, %v4027_v12  ;;  %v5036_v4 = vld [vmem:[%s3952_s9 + $0x108] sm:$0x3f] }
 0x114   : > { %v1491_v41 = vadd.f32 %v1485_v47, %v1455_v31  ;;  %v1600_v15 = vsel %vm671_vm2, %v1588_v3, 0.0  ;;  %v1450_v19 = vmul.f32 %v4955_v59, %v4251_v29  ;;  %v1456_v6 = vmul.f32 %v4955_v59, %v4255_v42 }
 0x115   : > { %3394 = vst [vmem:[%s4073_s17 + $0x100] sm:$0xff] %v1604_v32  ;;  %v6662_v21 = vrot.slane %v4899_v20, 7  ;;  %v1522_v8 = vadd.f32 %v1516_v49, %v1479_v54  ;;  %v1474_v36 = vmul.f32 %v3385_v35, %v4051_v26  ;;  %v1486_v37 = vmul.f32 %v3385_v35, %v4054_v27  ;;  %v5051_v32 = vld [vmem:[%s3952_s9 + $0x138] sm:$0x3f] }
 0x116   : > { %v1534_v17 = vadd.f32 %v1528_v34, %v1491_v41  ;;  %v1517_v3 = vmul.f32 %v3391_v9, %v4079_v62  ;;  %v1529_v30 = vmul.f32 %v3391_v9, %v4083_v63  ;;  %v1601_v20 = vsel %vm671_vm2, %v1591_v5, 0.0 }
 0x117   : > { %v1558_v13 = vsel %vm624_vm0, %v6662_v21, %v1557_v55  ;;  %v1559_v2 = vrot.slane %v1522_v8, 7  ;;  %v1480_v59 = vadd.f32 %v1474_v36, %v1450_v19  ;;  %v1492_v51 = vadd.f32 %v1486_v37, %v1456_v6  ;;  %v5069_v36 = vld [vmem:[%s3952_s9 + $0x168] sm:$0x3f] }
 0x118   : > { %v1575_v10 = vadd.f32 %v1558_v13, %v1533_v61  ;;  %v1621_v35 = vmul.f32 %v4713_v1, %v4136_v22  ;;  %v1627_v24 = vmul.f32 %v4713_v1, %v4140_v11  ;;  %v1633_v61 = vmul.f32 %v4713_v1, %v4147_v25 }
 0x119   : > { %v1560_v9 = vsel %vm624_vm0, %v1555_v33, %v1559_v2  ;;  %v1523_v47 = vadd.f32 %v1517_v3, %v1480_v59  ;;  %v1535_v49 = vadd.f32 %v1529_v30, %v1492_v51  ;;  %v1645_v55 = vmul.f32 %v4888_v50, %v3943_v38  ;;  %v5060_v33 = vld [vmem:[%s3952_s9 + $0x150] sm:$0xff] }
 0x11a   : > { %v1605_v31 = vadd.f32 %v1599_v48, %v1575_v10  ;;  %v1636_v48 = vmul.f32 %v5036_v4, %v4147_v25  ;;  %v1576_v5 = vadd.f32 %v1560_v9, %v1534_v17  ;;  %v1657_v1 = vmul.f32 %v4888_v50, %v3946_v39  ;;  %v5086_v51 = vld [vmem:[%s3952_s9 + $0x110] sm:$0x3f] }
 0x11b   : > { %v1669_v0 = vmul.f32 %v4888_v50, %v3949_v40  ;;  %v1561_v54 = vrot.slane %v1523_v47, 7  ;;  %v1672_v34 = vmul.f32 %v5051_v32, %v3949_v40  ;;  %v1688_v41 = vmul.f32 %v5060_v33, %v3960_v43 }
 0x11c   : > { %3395 = vst [vmem:[%s4073_s17 + $0x108] sm:$0x3f] %v1605_v31  ;;  %v1700_v19 = vmul.f32 %v5060_v33, %v3964_v44  ;;  %v1606_v6 = vadd.f32 %v1600_v15, %v1576_v5  ;;  %v1651_v21 = vadd.f32 %v1645_v55, %v1621_v35  ;;  %v1663_v13 = vadd.f32 %v1657_v1, %v1627_v24  ;;  %v5099_v5 = vld [vmem:[%s3952_s9 + $0x140] sm:$0x3f] }
 0x11d   : > { %v1675_v8 = vadd.f32 %v1669_v0, %v1633_v61  ;;  %v1562_v37 = vsel %vm624_vm0, %v1556_v53, %v1561_v54  ;;  %v1678_v10 = vadd.f32 %v1672_v34, %v1636_v48  ;;  %v1712_v17 = vmul.f32 %v5060_v33, %v3968_v45 }
 0x11e   : > { %v1715_v3 = vmul.f32 %v5069_v36, %v3968_v45  ;;  %3396 = vst [vmem:[%s4073_s17 + $0x110] sm:$0x3f] %v1606_v6  ;;  %v1577_v15 = vadd.f32 %v1562_v37, %v1535_v49  ;;  %v5079_v30 = vadd.f32 %v1688_v41, %v1651_v21  ;;  %v1706_v2 = vadd.f32 %v1700_v19, %v1663_v13 }
 0x11f   : > { %v1622_v59 = vmul.f32 %v4759_v56, %v4190_v16  ;;  %v1718_v14 = vadd.f32 %v1712_v17, %v1675_v8  ;;  %v1628_v31 = vmul.f32 %v4759_v56, %v4194_v23  ;;  %v1634_v35 = vmul.f32 %v4759_v56, %v4198_v52  ;;  %v5120_v8 = vld [vmem:[%s3952_s9 + $0x170] sm:$0x3f]  ;;  %v6663_v17 = vld [vmem:[#allocation6_spill] sm:$0xff] }
 0x120   : > { %v5083_v53 = vadd.f32 %v1715_v3, %v1678_v10  ;;  %v1607_v24 = vadd.f32 %v1601_v20, %v1577_v15  ;;  %v6588_v61 = vrot.slane %v5079_v30, 7  ;;  %v1637_v9 = vmul.f32 %v5086_v51, %v4198_v52  ;;  %v5106_v20 = vld [vmem:[%s3952_s9 + $0x158] sm:$0xff] }
 0x121   : > { %v1646_v47 = vmul.f32 %v4936_v46, %v3994_v57  ;;  %v1760_v49 = vrot.slane %v1718_v14, 1  ;;  %v1658_v55 = vmul.f32 %v4936_v46, %v3997_v58  ;;  %v1670_v56 = vmul.f32 %v4936_v46, %v6651_v18 }
 0x122   : > { %v6589_v48 = vrot.slane %v5083_v53, 1  ;;  %3397 = vst [vmem:[%s4073_s17 + $0x118] sm:$0x3f] %v1607_v24  ;;  %v1745_v1 = vsel %vm624_vm0, 0.0, %v6588_v61  ;;  %v1673_v54 = vmul.f32 %v5099_v5, %v6651_v18  ;;  %v1689_v34 = vmul.f32 %v5106_v20, %v4004_v60 }
 0x123   : > { %v1652_v0 = vadd.f32 %v1646_v47, %v1622_v59  ;;  %v1748_v41 = vadd.f32 %v1745_v1, %v1706_v2  ;;  %v1664_v6 = vadd.f32 %v1658_v55, %v1628_v31  ;;  %v1676_v21 = vadd.f32 %v1670_v56, %v1634_v35  ;;  %v6664_v59 = vld [vmem:[#allocation8_spill] sm:$0xff]  ;;  %v3403_v47 = vld [vmem:[%s3952_s9 + $0x118] sm:$0x3f] }
 0x124   : > { %v1762_v19 = vsel %vm655_vm1, %v1760_v49, %v6589_v48  ;;  %v1679_v13 = vadd.f32 %v1673_v54, %v1637_v9  ;;  %v1701_v10 = vmul.f32 %v5106_v20, %v4027_v12  ;;  %v1713_v3 = vmul.f32 %v5106_v20, %v6663_v17  ;;  %v6665_v49 = vld [vmem:[#allocation10_spill] sm:$0xff] }
 0x125   : > { %v5122_v37 = vadd.f32 %v1689_v34, %v1652_v0  ;;  %v1778_v15 = vadd.f32 %v1762_v19, %v1748_v41  ;;  %v1716_v2 = vmul.f32 %v5120_v8, %v6663_v17  ;;  %v1623_v14 = vmul.f32 %v6664_v59, %v4251_v29  ;;  %v3409_v0 = vld [vmem:[%s3952_s9 + $0x148] sm:$0x3f] }
 0x126   : > { %v1629_v31 = vmul.f32 %v6664_v59, %v4255_v42  ;;  %v1707_v35 = vadd.f32 %v1701_v10, %v1664_v6  ;;  %v1719_v24 = vadd.f32 %v1713_v3, %v1676_v21  ;;  %v1635_v55 = vmul.f32 %v6664_v59, %v6665_v49  ;;  %v6666_v6 = vld [vmem:[#allocation7_spill] sm:$0xff] }
 0x127   : > { %v6592_v9 = vrot.slane %v5122_v37, 7  ;;  %3416 = vst [vmem:[%s4073_s17 + $0x120] sm:$0xff] %v1778_v15  ;;  %v1722_v56 = vadd.f32 %v1716_v2, %v1679_v13  ;;  %v1638_v1 = vmul.f32 %v3403_v47, %v6665_v49  ;;  %v1647_v54 = vmul.f32 %v4974_v28, %v4051_v26  ;;  %v5152_v59 = vld [vmem:[%s3952_s9 + $0x160] sm:$0xff]  ;;  %v3415_v49 = vld [vmem:[%s3952_s9 + $0x178] sm:$0x3f] }
 0x128   : > { %v1659_v34 = vmul.f32 %v4974_v28, %v4054_v27  ;;  %v1763_v19 = vrot.slane %v1719_v24, 1  ;;  %v1671_v21 = vmul.f32 %v4974_v28, %v6666_v6  ;;  %v1674_v13 = vmul.f32 %v3409_v0, %v6666_v6  ;;  %6667 = vst [vmem:[#allocation11_spill] sm:$0xff] %v5152_v59 }
 0x129   : > { %v1746_v41 = vsel %vm624_vm0, 0.0, %v6592_v9  ;;  %v1764_v3 = vrot.slane %v1722_v56, 1  ;;  %v1653_v15 = vadd.f32 %v1647_v54, %v1623_v14  ;;  %v1690_v17 = vmul.f32 %v5152_v59, %v4079_v62 }
 0x12a   : > { %v1749_v10 = vadd.f32 %v1746_v41, %v1707_v35  ;;  %v1665_v2 = vadd.f32 %v1659_v34, %v1629_v31  ;;  %v1677_v61 = vadd.f32 %v1671_v21, %v1635_v55  ;;  %v1680_v48 = vadd.f32 %v1674_v13, %v1638_v1 }
 0x12b   : > { %v1702_v24 = vmul.f32 %v5152_v59, %v4083_v63  ;;  %v1765_v9 = vsel %vm655_vm1, %v1763_v19, %v1764_v3  ;;  %v1714_v35 = vmul.f32 %v5152_v59, %v6643_v7  ;;  %v1717_v14 = vmul.f32 %v3415_v49, %v6643_v7 }
 0x12c   : > { %v1624_v31 = vmul.f32 %v5036_v4, %v4136_v22  ;;  %v1779_v55 = vadd.f32 %v1765_v9, %v1749_v10  ;;  %v5165_v56 = vadd.f32 %v1690_v17, %v1653_v15  ;;  %v1630_v54 = vmul.f32 %v5036_v4, %v4140_v11 }
 0x12d   : > { %v1708_v1 = vadd.f32 %v1702_v24, %v1665_v2  ;;  %v1720_v34 = vadd.f32 %v1714_v35, %v1677_v61  ;;  %v1723_v41 = vadd.f32 %v1717_v14, %v1680_v48  ;;  %v1648_v19 = vmul.f32 %v5051_v32, %v3943_v38 }
 0x12e   : > { %v1660_v21 = vmul.f32 %v5051_v32, %v3946_v39  ;;  %3417 = vst [vmem:[%s4073_s17 + $0x128] sm:$0xff] %v1779_v55  ;;  %v1732_v13 = vrot.slane %v5165_v56, 7  ;;  %v1691_v9 = vmul.f32 %v5069_v36, %v3960_v43  ;;  %v1703_v17 = vmul.f32 %v5069_v36, %v3964_v44 }
 0x12f   : > { %v6668_v10 = vrot.slane %v5083_v53, 1  ;;  %v1766_v61 = vrot.slane %v1720_v34, 1  ;;  %v1767_v48 = vrot.slane %v1723_v41, 1  ;;  %v1654_v15 = vadd.f32 %v1648_v19, %v1624_v31 }
 0x130   : > { %v1666_v2 = vadd.f32 %v1660_v21, %v1630_v54  ;;  %v1747_v24 = vsel %vm624_vm0, 0.0, %v1732_v13  ;;  %v1625_v32 = vmul.f32 %v5086_v51, %v4190_v16  ;;  %v1631_v35 = vmul.f32 %v5086_v51, %v4194_v23 }
 0x131   : > { %v1775_v4 = vsel %vm671_vm2, %v6668_v10, 0.0  ;;  %v1649_v14 = vmul.f32 %v5099_v5, %v3994_v57  ;;  %v1750_v36 = vadd.f32 %v1747_v24, %v1708_v1  ;;  %v1768_v53 = vsel %vm655_vm1, %v1766_v61, %v1767_v48 }
 0x132   : > { %v1697_v55 = vadd.f32 %v1691_v9, %v1654_v15  ;;  %v1709_v56 = vadd.f32 %v1703_v17, %v1666_v2  ;;  %v1661_v31 = vmul.f32 %v5099_v5, %v3997_v58  ;;  %v1692_v54 = vmul.f32 %v5120_v8, %v4004_v60 }
 0x133   : > { %v1655_v34 = vadd.f32 %v1649_v14, %v1625_v32  ;;  %v1704_v41 = vmul.f32 %v5120_v8, %v4027_v12  ;;  %v1780_v51 = vadd.f32 %v1768_v53, %v1750_v36  ;;  %v1776_v21 = vsel %vm671_vm2, %v1764_v3, 0.0 }
 0x134   : > { %v1733_v19 = vrot.slane %v1697_v55, 7  ;;  %v1626_v1 = vmul.f32 %v3403_v47, %v4251_v29  ;;  %v1667_v10 = vadd.f32 %v1661_v31, %v1631_v35  ;;  %v1632_v9 = vmul.f32 %v3403_v47, %v4255_v42 }
 0x135   : > { %v1698_v61 = vadd.f32 %v1692_v54, %v1655_v34  ;;  %v1650_v17 = vmul.f32 %v3409_v0, %v4051_v26  ;;  %3418 = vst [vmem:[%s4073_s17 + $0x130] sm:$0xff] %v1780_v51  ;;  %v6669_v5 = vrot.slane %v5079_v30, 7  ;;  %v1662_v8 = vmul.f32 %v3409_v0, %v4054_v27  ;;  %v5216_v34 = vld [vmem:[%s3952_s9 + $0x138] sm:$0x3f]  ;;  %v5223_v51 = vld [vmem:[%s3952_s9 + $0x168] sm:$0x3f] }
 0x136   : > { %v1693_v2 = vmul.f32 %v3415_v49, %v4079_v62  ;;  %v1705_v3 = vmul.f32 %v3415_v49, %v4083_v63  ;;  %v1710_v32 = vadd.f32 %v1704_v41, %v1667_v10  ;;  %v1777_v36 = vsel %vm671_vm2, %v1767_v48, 0.0  ;;  %v5235_v10 = vld [vmem:[%s3952_s9 + $0x180] sm:$0xff] }
 0x137   : > { %v1734_v15 = vsel %vm624_vm0, %v6669_v5, %v1733_v19  ;;  %v1735_v35 = vrot.slane %v1698_v61, 7  ;;  %v1656_v47 = vadd.f32 %v1650_v17, %v1626_v1  ;;  %v1668_v14 = vadd.f32 %v1662_v8, %v1632_v9 }
 0x138   : > { %v1751_v24 = vadd.f32 %v1734_v15, %v1709_v56  ;;  %v1797_v30 = vmul.f32 %v4888_v50, %v4136_v22  ;;  %v1803_v53 = vmul.f32 %v4888_v50, %v4140_v11  ;;  %v6670_v55 = vrot.slane %v5122_v37, 7 }
 0x139   : > { %v1699_v56 = vadd.f32 %v1693_v2, %v1656_v47  ;;  %v1809_v31 = vmul.f32 %v4888_v50, %v4147_v25  ;;  %v1711_v48 = vadd.f32 %v1705_v3, %v1668_v14  ;;  %v1812_v41 = vmul.f32 %v5216_v34, %v4147_v25 }
 0x13a   : > { %v1781_v0 = vadd.f32 %v1775_v4, %v1751_v24  ;;  %v1736_v49 = vsel %vm624_vm0, %v6670_v55, %v1735_v35  ;;  %v1821_v4 = vmul.f32 %v5060_v33, %v3943_v38  ;;  %v1833_v19 = vmul.f32 %v5060_v33, %v3946_v39  ;;  %v5243_v24 = vld [vmem:[%s3952_s9 + $0x198] sm:$0x3f] }
 0x13b   : > { %v1752_v54 = vadd.f32 %v1736_v49, %v1710_v32  ;;  %v1737_v37 = vrot.slane %v1699_v56, 7  ;;  %v1845_v50 = vmul.f32 %v5060_v33, %v3949_v40  ;;  %v1848_v1 = vmul.f32 %v5223_v51, %v3949_v40 }
 0x13c   : > { %3419 = vst [vmem:[%s4073_s17 + $0x138] sm:$0x3f] %v1781_v0  ;;  %v1827_v9 = vadd.f32 %v1821_v4, %v1797_v30  ;;  %v1864_v17 = vmul.f32 %v5235_v10, %v3960_v43  ;;  %v1876_v5 = vmul.f32 %v5235_v10, %v3964_v44  ;;  %v1839_v8 = vadd.f32 %v1833_v19, %v1803_v53 }
 0x13d   : > { %v1782_v61 = vadd.f32 %v1776_v21, %v1752_v54  ;;  %v1738_v15 = vsel %vm624_vm0, %v1732_v13, %v1737_v37  ;;  %v1851_v2 = vadd.f32 %v1845_v50, %v1809_v31  ;;  %v1854_v3 = vadd.f32 %v1848_v1, %v1812_v41  ;;  %v5262_v31 = vld [vmem:[%s3952_s9 + $0x140] sm:$0x3f] }
 0x13e   : > { %v1753_v32 = vadd.f32 %v1738_v15, %v1711_v48  ;;  %v5246_v35 = vadd.f32 %v1864_v17, %v1827_v9  ;;  %v1888_v21 = vmul.f32 %v5235_v10, %v3968_v45  ;;  %v1891_v47 = vmul.f32 %v5243_v24, %v3968_v45  ;;  %v5267_v48 = vld [vmem:[%s3952_s9 + $0x170] sm:$0x3f] }
 0x13f   : > { %3420 = vst [vmem:[%s4073_s17 + $0x140] sm:$0x3f] %v1782_v61  ;;  %v1882_v14 = vadd.f32 %v1876_v5, %v1839_v8  ;;  %v1798_v13 = vmul.f32 %v4936_v46, %v4190_v16  ;;  %v1804_v30 = vmul.f32 %v4936_v46, %v4194_v23  ;;  %v1810_v53 = vmul.f32 %v4936_v46, %v4198_v52  ;;  %v5283_v5 = vld [vmem:[%s3952_s9 + $0x188] sm:$0xff] }
 0x140   : > { %v1783_v0 = vadd.f32 %v1777_v36, %v1753_v32  ;;  %v1894_v55 = vadd.f32 %v1888_v21, %v1851_v2  ;;  %v5258_v49 = vadd.f32 %v1891_v47, %v1854_v3  ;;  %v6593_v56 = vrot.slane %v5246_v35, 7  ;;  %v5287_v2 = vld [vmem:[%s3952_s9 + $0x1a0] sm:$0x3f] }
 0x141   : > { %v1813_v54 = vmul.f32 %v5262_v31, %v4198_v52  ;;  %v1822_v41 = vmul.f32 %v5106_v20, %v3994_v57  ;;  %v1834_v46 = vmul.f32 %v5106_v20, %v3997_v58  ;;  %v1846_v36 = vmul.f32 %v5106_v20, %v6651_v18  ;;  %v6671_v47 = vld [vmem:[#allocation6_spill] sm:$0xff] }
 0x142   : > { %3421 = vst [vmem:[%s4073_s17 + $0x148] sm:$0x3f] %v1783_v0  ;;  %v1921_v4 = vsel %vm624_vm0, 0.0, %v6593_v56  ;;  %v1936_v37 = vrot.slane %v1894_v55, 1  ;;  %v1937_v19 = vrot.slane %v5258_v49, 1  ;;  %v1849_v50 = vmul.f32 %v5267_v48, %v6651_v18 }
 0x143   : > { %v1924_v1 = vadd.f32 %v1921_v4, %v1882_v14  ;;  %v1828_v61 = vadd.f32 %v1822_v41, %v1798_v13  ;;  %v1840_v9 = vadd.f32 %v1834_v46, %v1804_v30  ;;  %v1852_v17 = vadd.f32 %v1846_v36, %v1810_v53  ;;  %v5302_v55 = vld [vmem:[%s3952_s9 + $0x148] sm:$0x3f] }
 0x144   : > { %v1938_v15 = vsel %vm655_vm1, %v1936_v37, %v1937_v19  ;;  %v1855_v8 = vadd.f32 %v1849_v50, %v1813_v54  ;;  %v1865_v3 = vmul.f32 %v5283_v5, %v4004_v60  ;;  %v1877_v32 = vmul.f32 %v5283_v5, %v4027_v12  ;;  %v6672_v54 = vld [vmem:[#allocation10_spill] sm:$0xff]  ;;  %v3433_v37 = vld [vmem:[%s3952_s9 + $0x178] sm:$0x3f] }
 0x145   : > { %v1954_v21 = vadd.f32 %v1938_v15, %v1924_v1  ;;  %v1889_v14 = vmul.f32 %v5283_v5, %v6671_v47  ;;  %v1892_v13 = vmul.f32 %v5287_v2, %v6671_v47  ;;  %v1799_v30 = vmul.f32 %v4974_v28, %v4251_v29 }
 0x146   : > { %v5299_v53 = vadd.f32 %v1865_v3, %v1828_v61  ;;  %v1883_v0 = vadd.f32 %v1877_v32, %v1840_v9  ;;  %v1805_v49 = vmul.f32 %v4974_v28, %v4255_v42  ;;  %v1811_v41 = vmul.f32 %v4974_v28, %v6672_v54 }
 0x147   : > { %3440 = vst [vmem:[%s4073_s17 + $0x150] sm:$0xff] %v1954_v21  ;;  %v1895_v46 = vadd.f32 %v1889_v14, %v1852_v17  ;;  %v1898_v36 = vadd.f32 %v1892_v13, %v1855_v8  ;;  %v1814_v4 = vmul.f32 %v5302_v55, %v6672_v54  ;;  %v1823_v50 = vmul.f32 %v5152_v59, %v4051_v26  ;;  %v5321_v17 = vld [vmem:[%s3952_s9 + $0x190] sm:$0xff] }
 0x148   : > { %v1907_v1 = vrot.slane %v5299_v53, 7  ;;  %v1835_v61 = vmul.f32 %v5152_v59, %v4054_v27  ;;  %v1847_v9 = vmul.f32 %v5152_v59, %v6666_v6  ;;  %v1850_v28 = vmul.f32 %v3433_v37, %v6666_v6  ;;  %v3439_v6 = vld [vmem:[%s3952_s9 + $0x1a8] sm:$0x3f] }
 0x149   : > { %v1939_v15 = vrot.slane %v1895_v46, 1  ;;  %v1940_v8 = vrot.slane %v1898_v36, 1  ;;  %v1829_v3 = vadd.f32 %v1823_v50, %v1799_v30  ;;  %v1866_v32 = vmul.f32 %v5321_v17, %v4079_v62 }
 0x14a   : > { %v1922_v21 = vsel %vm624_vm0, 0.0, %v1907_v1  ;;  %v1841_v14 = vadd.f32 %v1835_v61, %v1805_v49  ;;  %v1853_v13 = vadd.f32 %v1847_v9, %v1811_v41  ;;  %v1856_v56 = vadd.f32 %v1850_v28, %v1814_v4 }
 0x14b   : > { %v1925_v54 = vadd.f32 %v1922_v21, %v1883_v0  ;;  %v1941_v59 = vsel %vm655_vm1, %v1939_v15, %v1940_v8  ;;  %v5330_v47 = vadd.f32 %v1866_v32, %v1829_v3  ;;  %v1878_v30 = vmul.f32 %v5321_v17, %v4083_v63 }
 0x14c   : > { %v1890_v46 = vmul.f32 %v5321_v17, %v6643_v7  ;;  %v1893_v36 = vmul.f32 %v3439_v6, %v6643_v7  ;;  %v1800_v49 = vmul.f32 %v5216_v34, %v4136_v22  ;;  %v1806_v0 = vmul.f32 %v5216_v34, %v4140_v11 }
 0x14d   : > { %v1955_v41 = vadd.f32 %v1941_v59, %v1925_v54  ;;  %v1884_v4 = vadd.f32 %v1878_v30, %v1841_v14  ;;  %v1908_v50 = vrot.slane %v5330_v47, 7  ;;  %v1824_v61 = vmul.f32 %v5223_v51, %v3943_v38 }
 0x14e   : > { %v1896_v9 = vadd.f32 %v1890_v46, %v1853_v13  ;;  %v1899_v28 = vadd.f32 %v1893_v36, %v1856_v56  ;;  %v1836_v15 = vmul.f32 %v5223_v51, %v3946_v39  ;;  %v1867_v3 = vmul.f32 %v5243_v24, %v3960_v43 }
 0x14f   : > { %3441 = vst [vmem:[%s4073_s17 + $0x158] sm:$0xff] %v1955_v41  ;;  %v1923_v34 = vsel %vm624_vm0, 0.0, %v1908_v50  ;;  %v1830_v59 = vadd.f32 %v1824_v61, %v1800_v49  ;;  %v1879_v54 = vmul.f32 %v5243_v24, %v3964_v44  ;;  %v1951_v32 = vsel %vm671_vm2, %v1937_v19, 0.0 }
 0x150   : > { %v1926_v21 = vadd.f32 %v1923_v34, %v1884_v4  ;;  %v1942_v14 = vrot.slane %v1896_v9, 1  ;;  %v1943_v56 = vrot.slane %v1899_v28, 1  ;;  %v1842_v13 = vadd.f32 %v1836_v15, %v1806_v0 }
 0x151   : > { %v1873_v30 = vadd.f32 %v1867_v3, %v1830_v59  ;;  %v1801_v51 = vmul.f32 %v5262_v31, %v4190_v16  ;;  %v1807_v46 = vmul.f32 %v5262_v31, %v4194_v23  ;;  %v1825_v36 = vmul.f32 %v5267_v48, %v3994_v57 }
 0x152   : > { %v1944_v49 = vsel %vm655_vm1, %v1942_v14, %v1943_v56  ;;  %v1885_v24 = vadd.f32 %v1879_v54, %v1842_v13  ;;  %v1837_v19 = vmul.f32 %v5267_v48, %v3997_v58  ;;  %v1868_v0 = vmul.f32 %v5287_v2, %v4004_v60 }
 0x153   : > { %v1956_v41 = vadd.f32 %v1944_v49, %v1926_v21  ;;  %v1909_v4 = vrot.slane %v1873_v30, 7  ;;  %v1831_v61 = vadd.f32 %v1825_v36, %v1801_v51  ;;  %v1880_v9 = vmul.f32 %v5287_v2, %v4027_v12  ;;  %v5383_v36 = vld [vmem:[%s3952_s9 + $0x168] sm:$0x3f] }
 0x154   : > { %v1843_v28 = vadd.f32 %v1837_v19, %v1807_v46  ;;  %v1952_v31 = vsel %vm671_vm2, %v1940_v8, 0.0  ;;  %v1802_v15 = vmul.f32 %v5302_v55, %v4251_v29  ;;  %v1808_v3 = vmul.f32 %v5302_v55, %v4255_v42 }
 0x155   : > { %3442 = vst [vmem:[%s4073_s17 + $0x160] sm:$0xff] %v1956_v41  ;;  %v6673_v48 = vrot.slane %v5246_v35, 7  ;;  %v1874_v59 = vadd.f32 %v1868_v0, %v1831_v61  ;;  %v1826_v54 = vmul.f32 %v3433_v37, %v4051_v26  ;;  %v1838_v2 = vmul.f32 %v3433_v37, %v4054_v27  ;;  %v5398_v41 = vld [vmem:[%s3952_s9 + $0x198] sm:$0x3f] }
 0x156   : > { %v1886_v14 = vadd.f32 %v1880_v9, %v1843_v28  ;;  %v1869_v8 = vmul.f32 %v3439_v6, %v4079_v62  ;;  %v1881_v13 = vmul.f32 %v3439_v6, %v4083_v63  ;;  %v1953_v35 = vsel %vm671_vm2, %v1943_v56, 0.0 }
 0x157   : > { %v1910_v34 = vsel %vm624_vm0, %v6673_v48, %v1909_v4  ;;  %v1911_v30 = vrot.slane %v1874_v59, 7  ;;  %v1832_v55 = vadd.f32 %v1826_v54, %v1802_v15  ;;  %v1844_v51 = vadd.f32 %v1838_v2, %v1808_v3  ;;  %v5416_v54 = vld [vmem:[%s3952_s9 + $0x1c8] sm:$0x3f] }
 0x158   : > { %v1927_v21 = vadd.f32 %v1910_v34, %v1885_v24  ;;  %v1973_v37 = vmul.f32 %v5060_v33, %v4136_v22  ;;  %v1979_v49 = vmul.f32 %v5060_v33, %v4140_v11  ;;  %v1985_v24 = vmul.f32 %v5060_v33, %v4147_v25 }
 0x159   : > { %v1912_v6 = vsel %vm624_vm0, %v1907_v1, %v1911_v30  ;;  %v1875_v19 = vadd.f32 %v1869_v8, %v1832_v55  ;;  %v1887_v0 = vadd.f32 %v1881_v13, %v1844_v51  ;;  %v1997_v4 = vmul.f32 %v5235_v10, %v3943_v38  ;;  %v5407_v1 = vld [vmem:[%s3952_s9 + $0x1b0] sm:$0xff] }
 0x15a   : > { %v1957_v46 = vadd.f32 %v1951_v32, %v1927_v21  ;;  %v1988_v32 = vmul.f32 %v5383_v36, %v4147_v25  ;;  %v1928_v56 = vadd.f32 %v1912_v6, %v1886_v14  ;;  %v2009_v33 = vmul.f32 %v5235_v10, %v3946_v39  ;;  %v5433_v51 = vld [vmem:[%s3952_s9 + $0x170] sm:$0x3f] }
 0x15b   : > { %v2021_v53 = vmul.f32 %v5235_v10, %v3949_v40  ;;  %v1913_v61 = vrot.slane %v1875_v19, 7  ;;  %v2024_v9 = vmul.f32 %v5398_v41, %v3949_v40  ;;  %v2040_v28 = vmul.f32 %v5407_v1, %v3960_v43 }
 0x15c   : > { %3443 = vst [vmem:[%s4073_s17 + $0x168] sm:$0x3f] %v1957_v46  ;;  %v2052_v15 = vmul.f32 %v5407_v1, %v3964_v44  ;;  %v1958_v3 = vadd.f32 %v1952_v31, %v1928_v56  ;;  %v2003_v48 = vadd.f32 %v1997_v4, %v1973_v37  ;;  %v2015_v34 = vadd.f32 %v2009_v33, %v1979_v49  ;;  %v5446_v56 = vld [vmem:[%s3952_s9 + $0x1a0] sm:$0x3f] }
 0x15d   : > { %v2027_v59 = vadd.f32 %v2021_v53, %v1985_v24  ;;  %v1914_v2 = vsel %vm624_vm0, %v1908_v50, %v1913_v61  ;;  %v2030_v21 = vadd.f32 %v2024_v9, %v1988_v32  ;;  %v2064_v14 = vmul.f32 %v5407_v1, %v3968_v45 }
 0x15e   : > { %v2067_v8 = vmul.f32 %v5416_v54, %v3968_v45  ;;  %3444 = vst [vmem:[%s4073_s17 + $0x170] sm:$0x3f] %v1958_v3  ;;  %v1929_v31 = vadd.f32 %v1914_v2, %v1887_v0  ;;  %v5426_v13 = vadd.f32 %v2040_v28, %v2003_v48  ;;  %v2058_v30 = vadd.f32 %v2052_v15, %v2015_v34 }
 0x15f   : > { %v1974_v55 = vmul.f32 %v5106_v20, %v4190_v16  ;;  %v2070_v47 = vadd.f32 %v2064_v14, %v2027_v59  ;;  %v1980_v46 = vmul.f32 %v5106_v20, %v4194_v23  ;;  %v1986_v37 = vmul.f32 %v5106_v20, %v4198_v52  ;;  %v5467_v59 = vld [vmem:[%s3952_s9 + $0x1d0] sm:$0x3f]  ;;  %v6674_v14 = vld [vmem:[#allocation6_spill] sm:$0xff] }
 0x160   : > { %v5430_v50 = vadd.f32 %v2067_v8, %v2030_v21  ;;  %v1959_v49 = vadd.f32 %v1953_v35, %v1929_v31  ;;  %v6599_v24 = vrot.slane %v5426_v13, 7  ;;  %v1989_v6 = vmul.f32 %v5433_v51, %v4198_v52  ;;  %v5453_v35 = vld [vmem:[%s3952_s9 + $0x1b8] sm:$0xff] }
 0x161   : > { %v1998_v19 = vmul.f32 %v5283_v5, %v3994_v57  ;;  %v2112_v0 = vrot.slane %v2070_v47, 1  ;;  %v2010_v4 = vmul.f32 %v5283_v5, %v3997_v58  ;;  %v2022_v20 = vmul.f32 %v5283_v5, %v6651_v18 }
 0x162   : > { %v6600_v32 = vrot.slane %v5430_v50, 1  ;;  %3445 = vst [vmem:[%s4073_s17 + $0x178] sm:$0x3f] %v1959_v49  ;;  %v2097_v33 = vsel %vm624_vm0, 0.0, %v6599_v24  ;;  %v2025_v61 = vmul.f32 %v5446_v56, %v6651_v18  ;;  %v2041_v9 = vmul.f32 %v5453_v35, %v4004_v60 }
 0x163   : > { %v2004_v53 = vadd.f32 %v1998_v19, %v1974_v55  ;;  %v2100_v28 = vadd.f32 %v2097_v33, %v2058_v30  ;;  %v2016_v3 = vadd.f32 %v2010_v4, %v1980_v46  ;;  %v2028_v48 = vadd.f32 %v2022_v20, %v1986_v37  ;;  %v6675_v55 = vld [vmem:[#allocation11_spill] sm:$0xff]  ;;  %v3451_v19 = vld [vmem:[%s3952_s9 + $0x178] sm:$0x3f] }
 0x164   : > { %v2114_v15 = vsel %vm655_vm1, %v2112_v0, %v6600_v32  ;;  %v2031_v34 = vadd.f32 %v2025_v61, %v1989_v6  ;;  %v2053_v21 = vmul.f32 %v5453_v35, %v4027_v12  ;;  %v2065_v8 = vmul.f32 %v5453_v35, %v6674_v14  ;;  %v6676_v0 = vld [vmem:[#allocation10_spill] sm:$0xff] }
 0x165   : > { %v5469_v2 = vadd.f32 %v2041_v9, %v2004_v53  ;;  %v2130_v31 = vadd.f32 %v2114_v15, %v2100_v28  ;;  %v2068_v30 = vmul.f32 %v5467_v59, %v6674_v14  ;;  %v1975_v47 = vmul.f32 %v6675_v55, %v4251_v29  ;;  %v3457_v53 = vld [vmem:[%s3952_s9 + $0x1a8] sm:$0x3f] }
 0x166   : > { %v1981_v46 = vmul.f32 %v6675_v55, %v4255_v42  ;;  %v2059_v37 = vadd.f32 %v2053_v21, %v2016_v3  ;;  %v2071_v49 = vadd.f32 %v2065_v8, %v2028_v48  ;;  %v1987_v4 = vmul.f32 %v6675_v55, %v6676_v0  ;;  %v6677_v3 = vld [vmem:[#allocation7_spill] sm:$0xff] }
 0x167   : > { %v6603_v6 = vrot.slane %v5469_v2, 7  ;;  %3464 = vst [vmem:[%s4073_s17 + $0x180] sm:$0xff] %v2130_v31  ;;  %v2074_v20 = vadd.f32 %v2068_v30, %v2031_v34  ;;  %v1990_v33 = vmul.f32 %v3451_v19, %v6676_v0  ;;  %v1999_v61 = vmul.f32 %v5321_v17, %v4051_v26  ;;  %v5499_v55 = vld [vmem:[%s3952_s9 + $0x1c0] sm:$0xff]  ;;  %v3463_v0 = vld [vmem:[%s3952_s9 + $0x1d8] sm:$0x3f] }
 0x168   : > { %v2011_v9 = vmul.f32 %v5321_v17, %v4054_v27  ;;  %v2115_v15 = vrot.slane %v2071_v49, 1  ;;  %v2023_v48 = vmul.f32 %v5321_v17, %v6677_v3  ;;  %v2026_v34 = vmul.f32 %v3457_v53, %v6677_v3  ;;  %6678 = vst [vmem:[#allocation5_spill] sm:$0xff] %v5499_v55 }
 0x169   : > { %v2098_v28 = vsel %vm624_vm0, 0.0, %v6603_v6  ;;  %v2116_v8 = vrot.slane %v2074_v20, 1  ;;  %v2005_v31 = vadd.f32 %v1999_v61, %v1975_v47  ;;  %v2042_v14 = vmul.f32 %v5499_v55, %v4079_v62 }
 0x16a   : > { %v2101_v21 = vadd.f32 %v2098_v28, %v2059_v37  ;;  %v2017_v30 = vadd.f32 %v2011_v9, %v1981_v46  ;;  %v2029_v24 = vadd.f32 %v2023_v48, %v1987_v4  ;;  %v2032_v32 = vadd.f32 %v2026_v34, %v1990_v33 }
 0x16b   : > { %v2054_v49 = vmul.f32 %v5499_v55, %v4083_v63  ;;  %v2117_v6 = vsel %vm655_vm1, %v2115_v15, %v2116_v8  ;;  %v2066_v37 = vmul.f32 %v5499_v55, %v6643_v7  ;;  %v2069_v47 = vmul.f32 %v3463_v0, %v6643_v7 }
 0x16c   : > { %v1976_v46 = vmul.f32 %v5383_v36, %v4136_v22  ;;  %v2131_v4 = vadd.f32 %v2117_v6, %v2101_v21  ;;  %v5512_v20 = vadd.f32 %v2042_v14, %v2005_v31  ;;  %v1982_v61 = vmul.f32 %v5383_v36, %v4140_v11 }
 0x16d   : > { %v2060_v33 = vadd.f32 %v2054_v49, %v2017_v30  ;;  %v2072_v9 = vadd.f32 %v2066_v37, %v2029_v24  ;;  %v2075_v28 = vadd.f32 %v2069_v47, %v2032_v32  ;;  %v2000_v15 = vmul.f32 %v5398_v41, %v3943_v38 }
 0x16e   : > { %v2012_v48 = vmul.f32 %v5398_v41, %v3946_v39  ;;  %3465 = vst [vmem:[%s4073_s17 + $0x188] sm:$0xff] %v2131_v4  ;;  %v2084_v34 = vrot.slane %v5512_v20, 7  ;;  %v2043_v6 = vmul.f32 %v5416_v54, %v3960_v43  ;;  %v2055_v14 = vmul.f32 %v5416_v54, %v3964_v44 }
 0x16f   : > { %v6679_v21 = vrot.slane %v5430_v50, 1  ;;  %v2118_v24 = vrot.slane %v2072_v9, 1  ;;  %v2119_v32 = vrot.slane %v2075_v28, 1  ;;  %v2006_v31 = vadd.f32 %v2000_v15, %v1976_v46 }
 0x170   : > { %v2018_v30 = vadd.f32 %v2012_v48, %v1982_v61  ;;  %v2099_v49 = vsel %vm624_vm0, 0.0, %v2084_v34  ;;  %v1977_v41 = vmul.f32 %v5433_v51, %v4190_v16  ;;  %v1983_v37 = vmul.f32 %v5433_v51, %v4194_v23 }
 0x171   : > { %v2127_v36 = vsel %vm671_vm2, %v6679_v21, 0.0  ;;  %v2001_v47 = vmul.f32 %v5446_v56, %v3994_v57  ;;  %v2102_v54 = vadd.f32 %v2099_v49, %v2060_v33  ;;  %v2120_v50 = vsel %vm655_vm1, %v2118_v24, %v2119_v32 }
 0x172   : > { %v2049_v4 = vadd.f32 %v2043_v6, %v2006_v31  ;;  %v2061_v20 = vadd.f32 %v2055_v14, %v2018_v30  ;;  %v2013_v46 = vmul.f32 %v5446_v56, %v3997_v58  ;;  %v2044_v61 = vmul.f32 %v5467_v59, %v4004_v60 }
 0x173   : > { %v2007_v9 = vadd.f32 %v2001_v47, %v1977_v41  ;;  %v2056_v28 = vmul.f32 %v5467_v59, %v4027_v12  ;;  %v2132_v51 = vadd.f32 %v2120_v50, %v2102_v54  ;;  %v2128_v48 = vsel %vm671_vm2, %v2116_v8, 0.0 }
 0x174   : > { %v2085_v15 = vrot.slane %v2049_v4, 7  ;;  %v1978_v33 = vmul.f32 %v3451_v19, %v4251_v29  ;;  %v2019_v21 = vadd.f32 %v2013_v46, %v1983_v37  ;;  %v1984_v6 = vmul.f32 %v3451_v19, %v4255_v42 }
 0x175   : > { %v2050_v24 = vadd.f32 %v2044_v61, %v2007_v9  ;;  %v2002_v14 = vmul.f32 %v3457_v53, %v4051_v26  ;;  %3466 = vst [vmem:[%s4073_s17 + $0x190] sm:$0xff] %v2132_v51  ;;  %v6680_v56 = vrot.slane %v5426_v13, 7  ;;  %v2014_v59 = vmul.f32 %v3457_v53, %v4054_v27  ;;  %v5563_v9 = vld [vmem:[%s3952_s9 + $0x198] sm:$0x3f]  ;;  %v5570_v51 = vld [vmem:[%s3952_s9 + $0x1c8] sm:$0x3f] }
 0x176   : > { %v2045_v30 = vmul.f32 %v3463_v0, %v4079_v62  ;;  %v2057_v8 = vmul.f32 %v3463_v0, %v4083_v63  ;;  %v2062_v41 = vadd.f32 %v2056_v28, %v2019_v21  ;;  %v2129_v54 = vsel %vm671_vm2, %v2119_v32, 0.0  ;;  %v5582_v21 = vld [vmem:[%s3952_s9 + $0x1e0] sm:$0xff] }
 0x177   : > { %v2086_v31 = vsel %vm624_vm0, %v6680_v56, %v2085_v15  ;;  %v2087_v37 = vrot.slane %v2050_v24, 7  ;;  %v2008_v19 = vadd.f32 %v2002_v14, %v1978_v33  ;;  %v2020_v47 = vadd.f32 %v2014_v59, %v1984_v6 }
 0x178   : > { %v2103_v49 = vadd.f32 %v2086_v31, %v2061_v20  ;;  %v2149_v13 = vmul.f32 %v5235_v10, %v4136_v22  ;;  %v2155_v50 = vmul.f32 %v5235_v10, %v4140_v11  ;;  %v6681_v4 = vrot.slane %v5469_v2, 7 }
 0x179   : > { %v2051_v20 = vadd.f32 %v2045_v30, %v2008_v19  ;;  %v2161_v46 = vmul.f32 %v5235_v10, %v4147_v25  ;;  %v2063_v32 = vadd.f32 %v2057_v8, %v2020_v47  ;;  %v2164_v28 = vmul.f32 %v5563_v9, %v4147_v25 }
 0x17a   : > { %v2133_v53 = vadd.f32 %v2127_v36, %v2103_v49  ;;  %v2088_v0 = vsel %vm624_vm0, %v6681_v4, %v2087_v37  ;;  %v2173_v36 = vmul.f32 %v5407_v1, %v3943_v38  ;;  %v2185_v15 = vmul.f32 %v5407_v1, %v3946_v39  ;;  %v5590_v49 = vld [vmem:[%s3952_s9 + $0x1f8] sm:$0x3f] }
 0x17b   : > { %v2104_v61 = vadd.f32 %v2088_v0, %v2062_v41  ;;  %v2089_v2 = vrot.slane %v2051_v20, 7  ;;  %v2197_v10 = vmul.f32 %v5407_v1, %v3949_v40  ;;  %v2200_v33 = vmul.f32 %v5570_v51, %v3949_v40 }
 0x17c   : > { %3467 = vst [vmem:[%s4073_s17 + $0x198] sm:$0x3f] %v2133_v53  ;;  %v2179_v6 = vadd.f32 %v2173_v36, %v2149_v13  ;;  %v2216_v14 = vmul.f32 %v5582_v21, %v3960_v43  ;;  %v2228_v56 = vmul.f32 %v5582_v21, %v3964_v44  ;;  %v2191_v59 = vadd.f32 %v2185_v15, %v2155_v50 }
 0x17d   : > { %v2134_v24 = vadd.f32 %v2128_v48, %v2104_v61  ;;  %v2090_v31 = vsel %vm624_vm0, %v2084_v34, %v2089_v2  ;;  %v2203_v30 = vadd.f32 %v2197_v10, %v2161_v46  ;;  %v2206_v8 = vadd.f32 %v2200_v33, %v2164_v28  ;;  %v5609_v46 = vld [vmem:[%s3952_s9 + $0x1a0] sm:$0x3f] }
 0x17e   : > { %v2105_v41 = vadd.f32 %v2090_v31, %v2063_v32  ;;  %v5593_v37 = vadd.f32 %v2216_v14, %v2179_v6  ;;  %v2240_v48 = vmul.f32 %v5582_v21, %v3968_v45  ;;  %v2243_v19 = vmul.f32 %v5590_v49, %v3968_v45  ;;  %v5614_v32 = vld [vmem:[%s3952_s9 + $0x1d0] sm:$0x3f] }
 0x17f   : > { %3468 = vst [vmem:[%s4073_s17 + $0x1a0] sm:$0x3f] %v2134_v24  ;;  %v2234_v47 = vadd.f32 %v2228_v56, %v2191_v59  ;;  %v2150_v34 = vmul.f32 %v5283_v5, %v4190_v16  ;;  %v2156_v13 = vmul.f32 %v5283_v5, %v4194_v23  ;;  %v2162_v50 = vmul.f32 %v5283_v5, %v4198_v52  ;;  %v5630_v56 = vld [vmem:[%s3952_s9 + $0x1e8] sm:$0xff] }
 0x180   : > { %v2135_v53 = vadd.f32 %v2129_v54, %v2105_v41  ;;  %v2246_v4 = vadd.f32 %v2240_v48, %v2203_v30  ;;  %v5605_v0 = vadd.f32 %v2243_v19, %v2206_v8  ;;  %v6604_v20 = vrot.slane %v5593_v37, 7  ;;  %v5634_v30 = vld [vmem:[%s3952_s9 + $0x200] sm:$0x3f] }
 0x181   : > { %v2165_v61 = vmul.f32 %v5609_v46, %v4198_v52  ;;  %v2174_v28 = vmul.f32 %v5453_v35, %v3994_v57  ;;  %v2186_v5 = vmul.f32 %v5453_v35, %v3997_v58  ;;  %v2198_v54 = vmul.f32 %v5453_v35, %v6651_v18  ;;  %v6682_v19 = vld [vmem:[#allocation6_spill] sm:$0xff] }
 0x182   : > { %3469 = vst [vmem:[%s4073_s17 + $0x1a8] sm:$0x3f] %v2135_v53  ;;  %v2273_v36 = vsel %vm624_vm0, 0.0, %v6604_v20  ;;  %v2288_v2 = vrot.slane %v2246_v4, 1  ;;  %v2289_v15 = vrot.slane %v5605_v0, 1  ;;  %v2201_v10 = vmul.f32 %v5614_v32, %v6651_v18 }
 0x183   : > { %v2276_v33 = vadd.f32 %v2273_v36, %v2234_v47  ;;  %v2180_v24 = vadd.f32 %v2174_v28, %v2150_v34  ;;  %v2192_v6 = vadd.f32 %v2186_v5, %v2156_v13  ;;  %v2204_v14 = vadd.f32 %v2198_v54, %v2162_v50  ;;  %v5649_v4 = vld [vmem:[%s3952_s9 + $0x1a8] sm:$0x3f] }
 0x184   : > { %v2290_v31 = vsel %vm655_vm1, %v2288_v2, %v2289_v15  ;;  %v2207_v59 = vadd.f32 %v2201_v10, %v2165_v61  ;;  %v2217_v8 = vmul.f32 %v5630_v56, %v4004_v60  ;;  %v2229_v41 = vmul.f32 %v5630_v56, %v4027_v12  ;;  %v6683_v61 = vld [vmem:[#allocation10_spill] sm:$0xff]  ;;  %v3481_v2 = vld [vmem:[%s3952_s9 + $0x1d8] sm:$0x3f] }
 0x185   : > { %v2306_v48 = vadd.f32 %v2290_v31, %v2276_v33  ;;  %v2241_v47 = vmul.f32 %v5630_v56, %v6682_v19  ;;  %v2244_v34 = vmul.f32 %v5634_v30, %v6682_v19  ;;  %v2151_v13 = vmul.f32 %v5321_v17, %v4251_v29 }
 0x186   : > { %v5646_v50 = vadd.f32 %v2217_v8, %v2180_v24  ;;  %v2235_v53 = vadd.f32 %v2229_v41, %v2192_v6  ;;  %v2157_v0 = vmul.f32 %v5321_v17, %v4255_v42  ;;  %v2163_v28 = vmul.f32 %v5321_v17, %v6683_v61 }
 0x187   : > { %3488 = vst [vmem:[%s4073_s17 + $0x1b0] sm:$0xff] %v2306_v48  ;;  %v2247_v5 = vadd.f32 %v2241_v47, %v2204_v14  ;;  %v2250_v54 = vadd.f32 %v2244_v34, %v2207_v59  ;;  %v2166_v36 = vmul.f32 %v5649_v4, %v6683_v61  ;;  %v2175_v10 = vmul.f32 %v5499_v55, %v4051_v26  ;;  %v5668_v14 = vld [vmem:[%s3952_s9 + $0x1f0] sm:$0xff] }
 0x188   : > { %v2259_v33 = vrot.slane %v5646_v50, 7  ;;  %v2187_v24 = vmul.f32 %v5499_v55, %v4054_v27  ;;  %v2199_v6 = vmul.f32 %v5499_v55, %v6677_v3  ;;  %v2202_v17 = vmul.f32 %v3481_v2, %v6677_v3  ;;  %v3487_v3 = vld [vmem:[%s3952_s9 + $0x208] sm:$0x3f] }
 0x189   : > { %v2291_v31 = vrot.slane %v2247_v5, 1  ;;  %v2292_v59 = vrot.slane %v2250_v54, 1  ;;  %v2181_v8 = vadd.f32 %v2175_v10, %v2151_v13  ;;  %v2218_v41 = vmul.f32 %v5668_v14, %v4079_v62 }
 0x18a   : > { %v2274_v48 = vsel %vm624_vm0, 0.0, %v2259_v33  ;;  %v2193_v47 = vadd.f32 %v2187_v24, %v2157_v0  ;;  %v2205_v34 = vadd.f32 %v2199_v6, %v2163_v28  ;;  %v2208_v20 = vadd.f32 %v2202_v17, %v2166_v36 }
 0x18b   : > { %v2277_v61 = vadd.f32 %v2274_v48, %v2235_v53  ;;  %v2293_v55 = vsel %vm655_vm1, %v2291_v31, %v2292_v59  ;;  %v5677_v19 = vadd.f32 %v2218_v41, %v2181_v8  ;;  %v2230_v13 = vmul.f32 %v5668_v14, %v4083_v63 }
 0x18c   : > { %v2242_v5 = vmul.f32 %v5668_v14, %v6643_v7  ;;  %v2245_v54 = vmul.f32 %v3487_v3, %v6643_v7  ;;  %v2152_v0 = vmul.f32 %v5563_v9, %v4136_v22  ;;  %v2158_v53 = vmul.f32 %v5563_v9, %v4140_v11 }
 0x18d   : > { %v2307_v28 = vadd.f32 %v2293_v55, %v2277_v61  ;;  %v2236_v36 = vadd.f32 %v2230_v13, %v2193_v47  ;;  %v2260_v10 = vrot.slane %v5677_v19, 7  ;;  %v2176_v24 = vmul.f32 %v5570_v51, %v3943_v38 }
 0x18e   : > { %v2248_v6 = vadd.f32 %v2242_v5, %v2205_v34  ;;  %v2251_v17 = vadd.f32 %v2245_v54, %v2208_v20  ;;  %v2188_v31 = vmul.f32 %v5570_v51, %v3946_v39  ;;  %v2219_v8 = vmul.f32 %v5590_v49, %v3960_v43 }
 0x18f   : > { %3489 = vst [vmem:[%s4073_s17 + $0x1b8] sm:$0xff] %v2307_v28  ;;  %v2275_v9 = vsel %vm624_vm0, 0.0, %v2260_v10  ;;  %v2182_v55 = vadd.f32 %v2176_v24, %v2152_v0  ;;  %v2231_v61 = vmul.f32 %v5590_v49, %v3964_v44  ;;  %v2303_v41 = vsel %vm671_vm2, %v2289_v15, 0.0 }
 0x190   : > { %v2278_v48 = vadd.f32 %v2275_v9, %v2236_v36  ;;  %v2294_v47 = vrot.slane %v2248_v6, 1  ;;  %v2295_v20 = vrot.slane %v2251_v17, 1  ;;  %v2194_v34 = vadd.f32 %v2188_v31, %v2158_v53 }
 0x191   : > { %v2225_v13 = vadd.f32 %v2219_v8, %v2182_v55  ;;  %v2153_v51 = vmul.f32 %v5609_v46, %v4190_v16  ;;  %v2159_v5 = vmul.f32 %v5609_v46, %v4194_v23  ;;  %v2177_v54 = vmul.f32 %v5614_v32, %v3994_v57 }
 0x192   : > { %v2296_v0 = vsel %vm655_vm1, %v2294_v47, %v2295_v20  ;;  %v2237_v49 = vadd.f32 %v2231_v61, %v2194_v34  ;;  %v2189_v15 = vmul.f32 %v5614_v32, %v3997_v58  ;;  %v2220_v53 = vmul.f32 %v5634_v30, %v4004_v60 }
 0x193   : > { %v2308_v28 = vadd.f32 %v2296_v0, %v2278_v48  ;;  %v2261_v36 = vrot.slane %v2225_v13, 7  ;;  %v2183_v24 = vadd.f32 %v2177_v54, %v2153_v51  ;;  %v2232_v6 = vmul.f32 %v5634_v30, %v4027_v12  ;;  %v5730_v54 = vld [vmem:[%s3952_s9 + $0x1c8] sm:$0x3f] }
 0x194   : > { %v2195_v17 = vadd.f32 %v2189_v15, %v2159_v5  ;;  %v2304_v46 = vsel %vm671_vm2, %v2292_v59, 0.0  ;;  %v2154_v31 = vmul.f32 %v5649_v4, %v4251_v29  ;;  %v2160_v8 = vmul.f32 %v5649_v4, %v4255_v42 }
 0x195   : > { %3490 = vst [vmem:[%s4073_s17 + $0x1c0] sm:$0xff] %v2308_v28  ;;  %v6684_v32 = vrot.slane %v5593_v37, 7  ;;  %v2226_v55 = vadd.f32 %v2220_v53, %v2183_v24  ;;  %v2178_v61 = vmul.f32 %v3481_v2, %v4051_v26  ;;  %v2190_v30 = vmul.f32 %v3481_v2, %v4054_v27  ;;  %v5745_v28 = vld [vmem:[%s3952_s9 + $0x1f8] sm:$0x3f] }
 0x196   : > { %v2238_v47 = vadd.f32 %v2232_v6, %v2195_v17  ;;  %v2221_v59 = vmul.f32 %v3487_v3, %v4079_v62  ;;  %v2233_v34 = vmul.f32 %v3487_v3, %v4083_v63  ;;  %v2305_v37 = vsel %vm671_vm2, %v2295_v20, 0.0 }
 0x197   : > { %v2262_v9 = vsel %vm624_vm0, %v6684_v32, %v2261_v36  ;;  %v2263_v13 = vrot.slane %v2226_v55, 7  ;;  %v2184_v4 = vadd.f32 %v2178_v61, %v2154_v31  ;;  %v2196_v51 = vadd.f32 %v2190_v30, %v2160_v8  ;;  %v5763_v61 = vld [vmem:[%s3952_s9 + $0x228] sm:$0x3f] }
 0x198   : > { %v2279_v48 = vadd.f32 %v2262_v9, %v2237_v49  ;;  %v2325_v2 = vmul.f32 %v5407_v1, %v4136_v22  ;;  %v2331_v0 = vmul.f32 %v5407_v1, %v4140_v11  ;;  %v2337_v49 = vmul.f32 %v5407_v1, %v4147_v25 }
 0x199   : > { %v2264_v3 = vsel %vm624_vm0, %v2259_v33, %v2263_v13  ;;  %v2227_v15 = vadd.f32 %v2221_v59, %v2184_v4  ;;  %v2239_v53 = vadd.f32 %v2233_v34, %v2196_v51  ;;  %v2349_v36 = vmul.f32 %v5582_v21, %v3943_v38  ;;  %v5754_v33 = vld [vmem:[%s3952_s9 + $0x210] sm:$0xff] }
 0x19a   : > { %v2309_v5 = vadd.f32 %v2303_v41, %v2279_v48  ;;  %v2340_v41 = vmul.f32 %v5730_v54, %v4147_v25  ;;  %v2280_v20 = vadd.f32 %v2264_v3, %v2238_v47  ;;  %v2361_v1 = vmul.f32 %v5582_v21, %v3946_v39  ;;  %v5780_v51 = vld [vmem:[%s3952_s9 + $0x1d0] sm:$0x3f] }
 0x19b   : > { %v2373_v50 = vmul.f32 %v5582_v21, %v3949_v40  ;;  %v2265_v24 = vrot.slane %v2227_v15, 7  ;;  %v2376_v6 = vmul.f32 %v5745_v28, %v3949_v40  ;;  %v2392_v17 = vmul.f32 %v5754_v33, %v3960_v43 }
 0x19c   : > { %3491 = vst [vmem:[%s4073_s17 + $0x1c8] sm:$0x3f] %v2309_v5  ;;  %v2404_v31 = vmul.f32 %v5754_v33, %v3964_v44  ;;  %v2310_v8 = vadd.f32 %v2304_v46, %v2280_v20  ;;  %v2355_v32 = vadd.f32 %v2349_v36, %v2325_v2  ;;  %v2367_v9 = vadd.f32 %v2361_v1, %v2331_v0  ;;  %v5793_v20 = vld [vmem:[%s3952_s9 + $0x200] sm:$0x3f] }
 0x19d   : > { %v2379_v55 = vadd.f32 %v2373_v50, %v2337_v49  ;;  %v2266_v30 = vsel %vm624_vm0, %v2260_v10, %v2265_v24  ;;  %v2382_v48 = vadd.f32 %v2376_v6, %v2340_v41  ;;  %v2416_v47 = vmul.f32 %v5754_v33, %v3968_v45 }
 0x19e   : > { %v2419_v59 = vmul.f32 %v5763_v61, %v3968_v45  ;;  %3492 = vst [vmem:[%s4073_s17 + $0x1d0] sm:$0x3f] %v2310_v8  ;;  %v2281_v46 = vadd.f32 %v2266_v30, %v2239_v53  ;;  %v5773_v34 = vadd.f32 %v2392_v17, %v2355_v32  ;;  %v2410_v13 = vadd.f32 %v2404_v31, %v2367_v9 }
 0x19f   : > { %v2326_v4 = vmul.f32 %v5453_v35, %v4190_v16  ;;  %v2422_v19 = vadd.f32 %v2416_v47, %v2379_v55  ;;  %v2332_v5 = vmul.f32 %v5453_v35, %v4194_v23  ;;  %v2338_v2 = vmul.f32 %v5453_v35, %v4198_v52  ;;  %v5814_v55 = vld [vmem:[%s3952_s9 + $0x230] sm:$0x3f]  ;;  %v6685_v47 = vld [vmem:[#allocation6_spill] sm:$0xff] }
 0x1a0   : > { %v5777_v10 = vadd.f32 %v2419_v59, %v2382_v48  ;;  %v2311_v0 = vadd.f32 %v2305_v37, %v2281_v46  ;;  %v6610_v49 = vrot.slane %v5773_v34, 7  ;;  %v2341_v3 = vmul.f32 %v5780_v51, %v4198_v52  ;;  %v5800_v37 = vld [vmem:[%s3952_s9 + $0x218] sm:$0xff] }
 0x1a1   : > { %v2350_v15 = vmul.f32 %v5630_v56, %v3994_v57  ;;  %v2464_v53 = vrot.slane %v2422_v19, 1  ;;  %v2362_v36 = vmul.f32 %v5630_v56, %v3997_v58  ;;  %v2374_v35 = vmul.f32 %v5630_v56, %v6651_v18 }
 0x1a2   : > { %v6611_v41 = vrot.slane %v5777_v10, 1  ;;  %3493 = vst [vmem:[%s4073_s17 + $0x1d8] sm:$0x3f] %v2311_v0  ;;  %v2449_v1 = vsel %vm624_vm0, 0.0, %v6610_v49  ;;  %v2377_v24 = vmul.f32 %v5793_v20, %v6651_v18  ;;  %v2393_v6 = vmul.f32 %v5800_v37, %v4004_v60 }
 0x1a3   : > { %v2356_v50 = vadd.f32 %v2350_v15, %v2326_v4  ;;  %v2452_v17 = vadd.f32 %v2449_v1, %v2410_v13  ;;  %v2368_v8 = vadd.f32 %v2362_v36, %v2332_v5  ;;  %v2380_v32 = vadd.f32 %v2374_v35, %v2338_v2  ;;  %v6686_v4 = vld [vmem:[#allocation5_spill] sm:$0xff] }
 0x1a4   : > { %v2466_v31 = vsel %vm655_vm1, %v2464_v53, %v6611_v41  ;;  %v2383_v9 = vadd.f32 %v2377_v24, %v2341_v3  ;;  %v2405_v48 = vmul.f32 %v5800_v37, %v4027_v12  ;;  %v2417_v59 = vmul.f32 %v5800_v37, %v6685_v47  ;;  %v3499_v15 = vld [vmem:[%s3952_s9 + $0x1d8] sm:$0x3f]  ;;  %v6687_v53 = vld [vmem:[#allocation10_spill] sm:$0xff] }
 0x1a5   : > { %v5816_v30 = vadd.f32 %v2393_v6, %v2356_v50  ;;  %v2482_v46 = vadd.f32 %v2466_v31, %v2452_v17  ;;  %v2420_v13 = vmul.f32 %v5814_v55, %v6685_v47  ;;  %v2327_v19 = vmul.f32 %v6686_v4, %v4251_v29  ;;  %v3505_v50 = vld [vmem:[%s3952_s9 + $0x208] sm:$0x3f] }
 0x1a6   : > { %v2333_v5 = vmul.f32 %v6686_v4, %v4255_v42  ;;  %v2411_v2 = vadd.f32 %v2405_v48, %v2368_v8  ;;  %v2423_v0 = vadd.f32 %v2417_v59, %v2380_v32  ;;  %v2339_v36 = vmul.f32 %v6686_v4, %v6687_v53  ;;  %v6688_v8 = vld [vmem:[#allocation7_spill] sm:$0xff] }
 0x1a7   : > { %v6614_v3 = vrot.slane %v5816_v30, 7  ;;  %3512 = vst [vmem:[%s4073_s17 + $0x1e0] sm:$0xff] %v2482_v46  ;;  %v2426_v35 = vadd.f32 %v2420_v13, %v2383_v9  ;;  %v2342_v1 = vmul.f32 %v3499_v15, %v6687_v53  ;;  %v2351_v24 = vmul.f32 %v5668_v14, %v4051_v26  ;;  %v5846_v4 = vld [vmem:[%s3952_s9 + $0x220] sm:$0xff]  ;;  %v3511_v53 = vld [vmem:[%s3952_s9 + $0x238] sm:$0x3f] }
 0x1a8   : > { %v2363_v6 = vmul.f32 %v5668_v14, %v4054_v27  ;;  %v2467_v31 = vrot.slane %v2423_v0, 1  ;;  %v2375_v32 = vmul.f32 %v5668_v14, %v6688_v8  ;;  %v2378_v9 = vmul.f32 %v3505_v50, %v6688_v8  ;;  %6689 = vst [vmem:[#allocation9_spill] sm:$0xff] %v5846_v4 }
 0x1a9   : > { %v2450_v17 = vsel %vm624_vm0, 0.0, %v6614_v3  ;;  %v2468_v59 = vrot.slane %v2426_v35, 1  ;;  %v2357_v46 = vadd.f32 %v2351_v24, %v2327_v19  ;;  %v2394_v47 = vmul.f32 %v5846_v4, %v4079_v62 }
 0x1aa   : > { %v2453_v48 = vadd.f32 %v2450_v17, %v2411_v2  ;;  %v2369_v13 = vadd.f32 %v2363_v6, %v2333_v5  ;;  %v2381_v49 = vadd.f32 %v2375_v32, %v2339_v36  ;;  %v2384_v41 = vadd.f32 %v2378_v9, %v2342_v1 }
 0x1ab   : > { %v2406_v0 = vmul.f32 %v5846_v4, %v4083_v63  ;;  %v2469_v3 = vsel %vm655_vm1, %v2467_v31, %v2468_v59  ;;  %v2418_v2 = vmul.f32 %v5846_v4, %v6643_v7  ;;  %v2421_v19 = vmul.f32 %v3511_v53, %v6643_v7 }
 0x1ac   : > { %v2328_v5 = vmul.f32 %v5730_v54, %v4136_v22  ;;  %v2483_v36 = vadd.f32 %v2469_v3, %v2453_v48  ;;  %v5859_v35 = vadd.f32 %v2394_v47, %v2357_v46  ;;  %v2334_v24 = vmul.f32 %v5730_v54, %v4140_v11 }
 0x1ad   : > { %v2412_v1 = vadd.f32 %v2406_v0, %v2369_v13  ;;  %v2424_v6 = vadd.f32 %v2418_v2, %v2381_v49  ;;  %v2427_v17 = vadd.f32 %v2421_v19, %v2384_v41  ;;  %v2352_v31 = vmul.f32 %v5745_v28, %v3943_v38 }
 0x1ae   : > { %v2364_v32 = vmul.f32 %v5745_v28, %v3946_v39  ;;  %3513 = vst [vmem:[%s4073_s17 + $0x1e8] sm:$0xff] %v2483_v36  ;;  %v2436_v9 = vrot.slane %v5859_v35, 7  ;;  %v2395_v3 = vmul.f32 %v5763_v61, %v3960_v43  ;;  %v2407_v47 = vmul.f32 %v5763_v61, %v3964_v44 }
 0x1af   : > { %v6690_v48 = vrot.slane %v5777_v10, 1  ;;  %v2470_v49 = vrot.slane %v2424_v6, 1  ;;  %v2471_v41 = vrot.slane %v2427_v17, 1  ;;  %v2358_v46 = vadd.f32 %v2352_v31, %v2328_v5 }
 0x1b0   : > { %v2370_v13 = vadd.f32 %v2364_v32, %v2334_v24  ;;  %v2451_v0 = vsel %vm624_vm0, 0.0, %v2436_v9  ;;  %v2329_v28 = vmul.f32 %v5780_v51, %v4190_v16  ;;  %v2335_v2 = vmul.f32 %v5780_v51, %v4194_v23 }
 0x1b1   : > { %v2479_v54 = vsel %vm671_vm2, %v6690_v48, 0.0  ;;  %v2353_v19 = vmul.f32 %v5793_v20, %v3994_v57  ;;  %v2454_v61 = vadd.f32 %v2451_v0, %v2412_v1  ;;  %v2472_v10 = vsel %vm655_vm1, %v2470_v49, %v2471_v41 }
 0x1b2   : > { %v2401_v36 = vadd.f32 %v2395_v3, %v2358_v46  ;;  %v2413_v35 = vadd.f32 %v2407_v47, %v2370_v13  ;;  %v2365_v5 = vmul.f32 %v5793_v20, %v3997_v58  ;;  %v2396_v24 = vmul.f32 %v5814_v55, %v4004_v60 }
 0x1b3   : > { %v2359_v6 = vadd.f32 %v2353_v19, %v2329_v28  ;;  %v2408_v17 = vmul.f32 %v5814_v55, %v4027_v12  ;;  %v2484_v51 = vadd.f32 %v2472_v10, %v2454_v61  ;;  %v2480_v32 = vsel %vm671_vm2, %v2468_v59, 0.0 }
 0x1b4   : > { %v2437_v31 = vrot.slane %v2401_v36, 7  ;;  %v2330_v1 = vmul.f32 %v3499_v15, %v4251_v29  ;;  %v2371_v48 = vadd.f32 %v2365_v5, %v2335_v2  ;;  %v2336_v3 = vmul.f32 %v3499_v15, %v4255_v42 }
 0x1b5   : > { %v2402_v49 = vadd.f32 %v2396_v24, %v2359_v6  ;;  %v2354_v47 = vmul.f32 %v3505_v50, %v4051_v26  ;;  %3514 = vst [vmem:[%s4073_s17 + $0x1f0] sm:$0xff] %v2484_v51  ;;  %v6691_v20 = vrot.slane %v5773_v34, 7  ;;  %v2366_v55 = vmul.f32 %v3505_v50, %v4054_v27  ;;  %v5910_v6 = vld [vmem:[%s3952_s9 + $0x1f8] sm:$0x3f]  ;;  %v5917_v51 = vld [vmem:[%s3952_s9 + $0x228] sm:$0x3f] }
 0x1b6   : > { %v2397_v13 = vmul.f32 %v3511_v53, %v4079_v62  ;;  %v2409_v59 = vmul.f32 %v3511_v53, %v4083_v63  ;;  %v2414_v28 = vadd.f32 %v2408_v17, %v2371_v48  ;;  %v2481_v61 = vsel %vm671_vm2, %v2471_v41, 0.0  ;;  %v5929_v48 = vld [vmem:[%s3952_s9 + $0x240] sm:$0xff] }
 0x1b7   : > { %v2438_v46 = vsel %vm624_vm0, %v6691_v20, %v2437_v31  ;;  %v2439_v2 = vrot.slane %v2402_v49, 7  ;;  %v2360_v15 = vadd.f32 %v2354_v47, %v2330_v1  ;;  %v2372_v19 = vadd.f32 %v2366_v55, %v2336_v3 }
 0x1b8   : > { %v2455_v0 = vadd.f32 %v2438_v46, %v2413_v35  ;;  %v2501_v34 = vmul.f32 %v5582_v21, %v4136_v22  ;;  %v2507_v10 = vmul.f32 %v5582_v21, %v4140_v11  ;;  %v6692_v36 = vrot.slane %v5816_v30, 7 }
 0x1b9   : > { %v2403_v35 = vadd.f32 %v2397_v13, %v2360_v15  ;;  %v2513_v5 = vmul.f32 %v5582_v21, %v4147_v25  ;;  %v2415_v41 = vadd.f32 %v2409_v59, %v2372_v19  ;;  %v2516_v17 = vmul.f32 %v5910_v6, %v4147_v25 }
 0x1ba   : > { %v2485_v50 = vadd.f32 %v2479_v54, %v2455_v0  ;;  %v2440_v53 = vsel %vm624_vm0, %v6692_v36, %v2439_v2  ;;  %v2525_v54 = vmul.f32 %v5754_v33, %v3943_v38  ;;  %v2537_v31 = vmul.f32 %v5754_v33, %v3946_v39  ;;  %v5937_v0 = vld [vmem:[%s3952_s9 + $0x258] sm:$0x3f] }
 0x1bb   : > { %v2456_v24 = vadd.f32 %v2440_v53, %v2414_v28  ;;  %v2441_v30 = vrot.slane %v2403_v35, 7  ;;  %v2549_v21 = vmul.f32 %v5754_v33, %v3949_v40  ;;  %v2552_v1 = vmul.f32 %v5917_v51, %v3949_v40 }
 0x1bc   : > { %3515 = vst [vmem:[%s4073_s17 + $0x1f8] sm:$0x3f] %v2485_v50  ;;  %v2531_v3 = vadd.f32 %v2525_v54, %v2501_v34  ;;  %v2568_v47 = vmul.f32 %v5929_v48, %v3960_v43  ;;  %v2580_v20 = vmul.f32 %v5929_v48, %v3964_v44  ;;  %v2543_v55 = vadd.f32 %v2537_v31, %v2507_v10 }
 0x1bd   : > { %v2486_v49 = vadd.f32 %v2480_v32, %v2456_v24  ;;  %v2442_v46 = vsel %vm624_vm0, %v2436_v9, %v2441_v30  ;;  %v2555_v13 = vadd.f32 %v2549_v21, %v2513_v5  ;;  %v2558_v59 = vadd.f32 %v2552_v1, %v2516_v17  ;;  %v5956_v5 = vld [vmem:[%s3952_s9 + $0x200] sm:$0x3f] }
 0x1be   : > { %v2457_v28 = vadd.f32 %v2442_v46, %v2415_v41  ;;  %v5940_v2 = vadd.f32 %v2568_v47, %v2531_v3  ;;  %v2592_v32 = vmul.f32 %v5929_v48, %v3968_v45  ;;  %v2595_v15 = vmul.f32 %v5937_v0, %v3968_v45  ;;  %v5961_v41 = vld [vmem:[%s3952_s9 + $0x230] sm:$0x3f] }
 0x1bf   : > { %3516 = vst [vmem:[%s4073_s17 + $0x200] sm:$0x3f] %v2486_v49  ;;  %v2586_v19 = vadd.f32 %v2580_v20, %v2543_v55  ;;  %v2502_v9 = vmul.f32 %v5630_v56, %v4190_v16  ;;  %v2508_v34 = vmul.f32 %v5630_v56, %v4194_v23  ;;  %v2514_v10 = vmul.f32 %v5630_v56, %v4198_v52  ;;  %v5977_v20 = vld [vmem:[%s3952_s9 + $0x248] sm:$0xff] }
 0x1c0   : > { %v2487_v50 = vadd.f32 %v2481_v61, %v2457_v28  ;;  %v2598_v36 = vadd.f32 %v2592_v32, %v2555_v13  ;;  %v5952_v53 = vadd.f32 %v2595_v15, %v2558_v59  ;;  %v6615_v35 = vrot.slane %v5940_v2, 7  ;;  %v5981_v13 = vld [vmem:[%s3952_s9 + $0x260] sm:$0x3f] }
 0x1c1   : > { %v2517_v24 = vmul.f32 %v5956_v5, %v4198_v52  ;;  %v2526_v17 = vmul.f32 %v5800_v37, %v3994_v57  ;;  %v2538_v56 = vmul.f32 %v5800_v37, %v3997_v58  ;;  %v2550_v61 = vmul.f32 %v5800_v37, %v6651_v18  ;;  %v6693_v15 = vld [vmem:[#allocation6_spill] sm:$0xff] }
 0x1c2   : > { %3517 = vst [vmem:[%s4073_s17 + $0x208] sm:$0x3f] %v2487_v50  ;;  %v2625_v54 = vsel %vm624_vm0, 0.0, %v6615_v35  ;;  %v2640_v30 = vrot.slane %v2598_v36, 1  ;;  %v2641_v31 = vrot.slane %v5952_v53, 1  ;;  %v2553_v21 = vmul.f32 %v5961_v41, %v6651_v18 }
 0x1c3   : > { %v2628_v1 = vadd.f32 %v2625_v54, %v2586_v19  ;;  %v2532_v49 = vadd.f32 %v2526_v17, %v2502_v9  ;;  %v2544_v3 = vadd.f32 %v2538_v56, %v2508_v34  ;;  %v2556_v47 = vadd.f32 %v2550_v61, %v2514_v10  ;;  %v5996_v36 = vld [vmem:[%s3952_s9 + $0x208] sm:$0x3f] }
 0x1c4   : > { %v2642_v46 = vsel %vm655_vm1, %v2640_v30, %v2641_v31  ;;  %v2559_v55 = vadd.f32 %v2553_v21, %v2517_v24  ;;  %v2569_v59 = vmul.f32 %v5977_v20, %v4004_v60  ;;  %v2581_v28 = vmul.f32 %v5977_v20, %v4027_v12  ;;  %v6694_v24 = vld [vmem:[#allocation10_spill] sm:$0xff]  ;;  %v3529_v30 = vld [vmem:[%s3952_s9 + $0x238] sm:$0x3f] }
 0x1c5   : > { %v2658_v32 = vadd.f32 %v2642_v46, %v2628_v1  ;;  %v2593_v19 = vmul.f32 %v5977_v20, %v6693_v15  ;;  %v2596_v9 = vmul.f32 %v5981_v13, %v6693_v15  ;;  %v2503_v34 = vmul.f32 %v5668_v14, %v4251_v29 }
 0x1c6   : > { %v5993_v10 = vadd.f32 %v2569_v59, %v2532_v49  ;;  %v2587_v50 = vadd.f32 %v2581_v28, %v2544_v3  ;;  %v2509_v53 = vmul.f32 %v5668_v14, %v4255_v42  ;;  %v2515_v17 = vmul.f32 %v5668_v14, %v6694_v24 }
 0x1c7   : > { %3536 = vst [vmem:[%s4073_s17 + $0x210] sm:$0xff] %v2658_v32  ;;  %v2599_v56 = vadd.f32 %v2593_v19, %v2556_v47  ;;  %v2602_v61 = vadd.f32 %v2596_v9, %v2559_v55  ;;  %v2518_v54 = vmul.f32 %v5996_v36, %v6694_v24  ;;  %v2527_v21 = vmul.f32 %v5846_v4, %v4051_v26  ;;  %v6015_v47 = vld [vmem:[%s3952_s9 + $0x250] sm:$0xff] }
 0x1c8   : > { %v2611_v1 = vrot.slane %v5993_v10, 7  ;;  %v2539_v49 = vmul.f32 %v5846_v4, %v4054_v27  ;;  %v2551_v3 = vmul.f32 %v5846_v4, %v6688_v8  ;;  %v2554_v14 = vmul.f32 %v3529_v30, %v6688_v8  ;;  %v3535_v8 = vld [vmem:[%s3952_s9 + $0x268] sm:$0x3f] }
 0x1c9   : > { %v2643_v46 = vrot.slane %v2599_v56, 1  ;;  %v2644_v55 = vrot.slane %v2602_v61, 1  ;;  %v2533_v59 = vadd.f32 %v2527_v21, %v2503_v34  ;;  %v2570_v28 = vmul.f32 %v6015_v47, %v4079_v62 }
 0x1ca   : > { %v2626_v32 = vsel %vm624_vm0, 0.0, %v2611_v1  ;;  %v2545_v19 = vadd.f32 %v2539_v49, %v2509_v53  ;;  %v2557_v9 = vadd.f32 %v2551_v3, %v2515_v17  ;;  %v2560_v35 = vadd.f32 %v2554_v14, %v2518_v54 }
 0x1cb   : > { %v2629_v24 = vadd.f32 %v2626_v32, %v2587_v50  ;;  %v2645_v4 = vsel %vm655_vm1, %v2643_v46, %v2644_v55  ;;  %v6024_v15 = vadd.f32 %v2570_v28, %v2533_v59  ;;  %v2582_v34 = vmul.f32 %v6015_v47, %v4083_v63 }
 0x1cc   : > { %v2594_v56 = vmul.f32 %v6015_v47, %v6643_v7  ;;  %v2597_v61 = vmul.f32 %v3535_v8, %v6643_v7  ;;  %v2504_v53 = vmul.f32 %v5910_v6, %v4136_v22  ;;  %v2510_v50 = vmul.f32 %v5910_v6, %v4140_v11 }
 0x1cd   : > { %v2659_v17 = vadd.f32 %v2645_v4, %v2629_v24  ;;  %v2588_v54 = vadd.f32 %v2582_v34, %v2545_v19  ;;  %v2612_v21 = vrot.slane %v6024_v15, 7  ;;  %v2528_v49 = vmul.f32 %v5917_v51, %v3943_v38 }
 0x1ce   : > { %v2600_v3 = vadd.f32 %v2594_v56, %v2557_v9  ;;  %v2603_v14 = vadd.f32 %v2597_v61, %v2560_v35  ;;  %v2540_v46 = vmul.f32 %v5917_v51, %v3946_v39  ;;  %v2571_v59 = vmul.f32 %v5937_v0, %v3960_v43 }
 0x1cf   : > { %3537 = vst [vmem:[%s4073_s17 + $0x218] sm:$0xff] %v2659_v17  ;;  %v2627_v6 = vsel %vm624_vm0, 0.0, %v2612_v21  ;;  %v2534_v4 = vadd.f32 %v2528_v49, %v2504_v53  ;;  %v2583_v24 = vmul.f32 %v5937_v0, %v3964_v44  ;;  %v2655_v28 = vsel %vm671_vm2, %v2641_v31, 0.0 }
 0x1d0   : > { %v2630_v32 = vadd.f32 %v2627_v6, %v2588_v54  ;;  %v2646_v19 = vrot.slane %v2600_v3, 1  ;;  %v2647_v35 = vrot.slane %v2603_v14, 1  ;;  %v2546_v9 = vadd.f32 %v2540_v46, %v2510_v50 }
 0x1d1   : > { %v2577_v34 = vadd.f32 %v2571_v59, %v2534_v4  ;;  %v2505_v51 = vmul.f32 %v5956_v5, %v4190_v16  ;;  %v2511_v56 = vmul.f32 %v5956_v5, %v4194_v23  ;;  %v2529_v61 = vmul.f32 %v5961_v41, %v3994_v57 }
 0x1d2   : > { %v2648_v53 = vsel %vm655_vm1, %v2646_v19, %v2647_v35  ;;  %v2589_v0 = vadd.f32 %v2583_v24, %v2546_v9  ;;  %v2541_v31 = vmul.f32 %v5961_v41, %v3997_v58  ;;  %v2572_v50 = vmul.f32 %v5981_v13, %v4004_v60 }
 0x1d3   : > { %v2660_v17 = vadd.f32 %v2648_v53, %v2630_v32  ;;  %v2613_v54 = vrot.slane %v2577_v34, 7  ;;  %v2535_v49 = vadd.f32 %v2529_v61, %v2505_v51  ;;  %v2584_v3 = vmul.f32 %v5981_v13, %v4027_v12  ;;  %v6077_v61 = vld [vmem:[%s3952_s9 + $0x228] sm:$0x3f] }
 0x1d4   : > { %v2547_v14 = vadd.f32 %v2541_v31, %v2511_v56  ;;  %v2656_v5 = vsel %vm671_vm2, %v2644_v55, 0.0  ;;  %v2506_v46 = vmul.f32 %v5996_v36, %v4251_v29  ;;  %v2512_v59 = vmul.f32 %v5996_v36, %v4255_v42  ;;  %v6086_v31 = vld [vmem:[%s3952_s9 + $0x270] sm:$0xff] }
 0x1d5   : > { %3538 = vst [vmem:[%s4073_s17 + $0x220] sm:$0xff] %v2660_v17  ;;  %v6695_v41 = vrot.slane %v5940_v2, 7  ;;  %v2578_v4 = vadd.f32 %v2572_v50, %v2535_v49  ;;  %v2530_v24 = vmul.f32 %v3529_v30, %v4051_v26  ;;  %v2542_v13 = vmul.f32 %v3529_v30, %v4054_v27 }
 0x1d6   : > { %v2590_v55 = vadd.f32 %v2584_v3, %v2547_v14  ;;  %v2573_v19 = vmul.f32 %v3535_v8, %v4079_v62  ;;  %v2585_v9 = vmul.f32 %v3535_v8, %v4083_v63  ;;  %v2657_v2 = vsel %vm671_vm2, %v2647_v35, 0.0 }
 0x1d7   : > { %v2614_v6 = vsel %vm624_vm0, %v6695_v41, %v2613_v54  ;;  %v2615_v34 = vrot.slane %v2578_v4, 7  ;;  %v2536_v36 = vadd.f32 %v2530_v24, %v2506_v46  ;;  %v2548_v51 = vadd.f32 %v2542_v13, %v2512_v59  ;;  %v6095_v54 = vld [vmem:[%s3952_s9 + $0x258] sm:$0x3f]  ;;  %v6110_v24 = vld [vmem:[%s3952_s9 + $0x288] sm:$0x3f] }
 0x1d8   : > { %v2631_v32 = vadd.f32 %v2614_v6, %v2589_v0  ;;  %v2677_v53 = vmul.f32 %v5754_v33, %v4136_v22  ;;  %v2683_v30 = vmul.f32 %v5754_v33, %v4140_v11  ;;  %v2689_v0 = vmul.f32 %v5754_v33, %v4147_v25 }
 0x1d9   : > { %v2616_v8 = vsel %vm624_vm0, %v2611_v1, %v2615_v34  ;;  %v2579_v50 = vadd.f32 %v2573_v19, %v2536_v36  ;;  %v2591_v35 = vadd.f32 %v2585_v9, %v2548_v51  ;;  %v2701_v49 = vmul.f32 %v5929_v48, %v3943_v38 }
 0x1da   : > { %v2661_v56 = vadd.f32 %v2655_v28, %v2631_v32  ;;  %v2692_v28 = vmul.f32 %v6077_v61, %v4147_v25  ;;  %v2632_v17 = vadd.f32 %v2616_v8, %v2590_v55  ;;  %v2713_v33 = vmul.f32 %v5929_v48, %v3946_v39 }
 0x1db   : > { %v2725_v10 = vmul.f32 %v5929_v48, %v3949_v40  ;;  %v2617_v1 = vrot.slane %v2579_v50, 7  ;;  %v2728_v3 = vmul.f32 %v6095_v54, %v3949_v40  ;;  %v2744_v14 = vmul.f32 %v6086_v31, %v3960_v43 }
 0x1dc   : > { %3539 = vst [vmem:[%s4073_s17 + $0x228] sm:$0x3f] %v2661_v56  ;;  %v2756_v46 = vmul.f32 %v6086_v31, %v3964_v44  ;;  %v2662_v59 = vadd.f32 %v2656_v5, %v2632_v17  ;;  %v2707_v41 = vadd.f32 %v2701_v49, %v2677_v53  ;;  %v2719_v6 = vadd.f32 %v2713_v33, %v2683_v30  ;;  %v6134_v53 = vld [vmem:[%s3952_s9 + $0x278] sm:$0xff]  ;;  %v6143_v17 = vld [vmem:[%s3952_s9 + $0x260] sm:$0x3f] }
 0x1dd   : > { %v2731_v4 = vadd.f32 %v2725_v10, %v2689_v0  ;;  %v2618_v13 = vsel %vm624_vm0, %v2612_v21, %v2617_v1  ;;  %v2734_v32 = vadd.f32 %v2728_v3, %v2692_v28  ;;  %v2768_v55 = vmul.f32 %v6086_v31, %v3968_v45  ;;  %v6127_v21 = vld [vmem:[%s3952_s9 + $0x230] sm:$0x3f] }
 0x1de   : > { %v2771_v19 = vmul.f32 %v6110_v24, %v3968_v45  ;;  %3540 = vst [vmem:[%s4073_s17 + $0x230] sm:$0x3f] %v2662_v59  ;;  %v2633_v5 = vadd.f32 %v2618_v13, %v2591_v35  ;;  %v6120_v9 = vadd.f32 %v2744_v14, %v2707_v41  ;;  %v2762_v34 = vadd.f32 %v2756_v46, %v2719_v6  ;;  %v6161_v6 = vld [vmem:[%s3952_s9 + $0x290] sm:$0x3f] }
 0x1df   : > { %v2678_v36 = vmul.f32 %v5800_v37, %v4190_v16  ;;  %v2774_v15 = vadd.f32 %v2768_v55, %v2731_v4  ;;  %v2684_v56 = vmul.f32 %v5800_v37, %v4194_v23  ;;  %v2690_v45 = vmul.f32 %v5800_v37, %v4198_v52 }
 0x1e0   : > { %v6124_v51 = vadd.f32 %v2771_v19, %v2734_v32  ;;  %v2663_v30 = vadd.f32 %v2657_v2, %v2633_v5  ;;  %v6621_v0 = vrot.slane %v6120_v9, 7  ;;  %v2693_v8 = vmul.f32 %v6127_v21, %v4198_v52  ;;  %v6696_v32 = vld [vmem:[#allocation6_spill] sm:$0xff] }
 0x1e1   : > { %v2702_v50 = vmul.f32 %v5977_v20, %v3994_v57  ;;  %v2816_v35 = vrot.slane %v2774_v15, 1  ;;  %v2714_v37 = vmul.f32 %v5977_v20, %v3997_v58  ;;  %v2726_v2 = vmul.f32 %v5977_v20, %v6651_v18 }
 0x1e2   : > { %v6622_v28 = vrot.slane %v6124_v51, 1  ;;  %3541 = vst [vmem:[%s4073_s17 + $0x238] sm:$0x3f] %v2663_v30  ;;  %v2801_v49 = vsel %vm624_vm0, 0.0, %v6621_v0  ;;  %v2729_v10 = vmul.f32 %v6143_v17, %v6651_v18  ;;  %v2745_v1 = vmul.f32 %v6134_v53, %v4004_v60  ;;  %v3559_v0 = vld [vmem:[%s3952_s9 + $0x298] sm:$0x3f] }
 0x1e3   : > { %v2708_v33 = vadd.f32 %v2702_v50, %v2678_v36  ;;  %v2804_v3 = vadd.f32 %v2801_v49, %v2762_v34  ;;  %v2720_v46 = vadd.f32 %v2714_v37, %v2684_v56  ;;  %v2732_v59 = vadd.f32 %v2726_v2, %v2690_v45  ;;  %v6697_v34 = vld [vmem:[#allocation9_spill] sm:$0xff]  ;;  %v6698_v50 = vld [vmem:[#allocation10_spill] sm:$0xff]  ;;  %v3553_v49 = vld [vmem:[%s3952_s9 + $0x268] sm:$0x3f] }
 0x1e4   : > { %v2818_v14 = vsel %vm655_vm1, %v2816_v35, %v6622_v28  ;;  %v2735_v41 = vadd.f32 %v2729_v10, %v2693_v8  ;;  %v2757_v13 = vmul.f32 %v6134_v53, %v4027_v12  ;;  %v2769_v55 = vmul.f32 %v6134_v53, %v6696_v32  ;;  %v3547_v8 = vld [vmem:[%s3952_s9 + $0x238] sm:$0x3f] }
 0x1e5   : > { %v6163_v4 = vadd.f32 %v2745_v1, %v2708_v33  ;;  %v2834_v19 = vadd.f32 %v2818_v14, %v2804_v3  ;;  %v2772_v5 = vmul.f32 %v6161_v6, %v6696_v32  ;;  %v2679_v36 = vmul.f32 %v6697_v34, %v4251_v29  ;;  %v6187_v1 = vld [vmem:[%s3952_s9 + $0x280] sm:$0xff] }
 0x1e6   : > { %v2685_v15 = vmul.f32 %v6697_v34, %v4255_v42  ;;  %v2763_v56 = vadd.f32 %v2757_v13, %v2720_v46  ;;  %v2775_v45 = vadd.f32 %v2769_v55, %v2732_v59  ;;  %v2691_v35 = vmul.f32 %v6697_v34, %v6698_v50  ;;  %v6699_v46 = vld [vmem:[#allocation7_spill] sm:$0xff] }
 0x1e7   : > { %v6623_v30 = vrot.slane %v6163_v4, 7  ;;  %3560 = vst [vmem:[%s4073_s17 + $0x240] sm:$0xff] %v2834_v19  ;;  %v2778_v37 = vadd.f32 %v2772_v5, %v2735_v41  ;;  %v2694_v2 = vmul.f32 %v3547_v8, %v6698_v50  ;;  %v2703_v33 = vmul.f32 %v6015_v47, %v4051_v26 }
 0x1e8   : > { %v2715_v10 = vmul.f32 %v6015_v47, %v4054_v27  ;;  %v2819_v14 = vrot.slane %v2775_v45, 1  ;;  %v2727_v59 = vmul.f32 %v6015_v47, %v6699_v46  ;;  %v2730_v41 = vmul.f32 %v3553_v49, %v6699_v46 }
 0x1e9   : > { %v2802_v3 = vsel %vm624_vm0, 0.0, %v6623_v30  ;;  %v2820_v32 = vrot.slane %v2778_v37, 1  ;;  %v2709_v55 = vadd.f32 %v2703_v33, %v2679_v36  ;;  %v2746_v28 = vmul.f32 %v6187_v1, %v4079_v62 }
 0x1ea   : > { %v2805_v13 = vadd.f32 %v2802_v3, %v2763_v56  ;;  %v2721_v19 = vadd.f32 %v2715_v10, %v2685_v15  ;;  %v2733_v5 = vadd.f32 %v2727_v59, %v2691_v35  ;;  %v2736_v34 = vadd.f32 %v2730_v41, %v2694_v2 }
 0x1eb   : > { %v2758_v30 = vmul.f32 %v6187_v1, %v4083_v63  ;;  %v2821_v45 = vsel %vm655_vm1, %v2819_v14, %v2820_v32  ;;  %v2770_v50 = vmul.f32 %v6187_v1, %v6643_v7  ;;  %v2773_v56 = vmul.f32 %v3559_v0, %v6643_v7 }
 0x1ec   : > { %v2680_v36 = vmul.f32 %v6077_v61, %v4136_v22  ;;  %v2835_v15 = vadd.f32 %v2821_v45, %v2805_v13  ;;  %v6206_v35 = vadd.f32 %v2746_v28, %v2709_v55  ;;  %v2686_v2 = vmul.f32 %v6077_v61, %v4140_v11 }
 0x1ed   : > { %v2764_v37 = vadd.f32 %v2758_v30, %v2721_v19  ;;  %v2776_v33 = vadd.f32 %v2770_v50, %v2733_v5  ;;  %v2779_v10 = vadd.f32 %v2773_v56, %v2736_v34  ;;  %v2704_v3 = vmul.f32 %v6095_v54, %v3943_v38 }
 0x1ee   : > { %v2716_v14 = vmul.f32 %v6095_v54, %v3946_v39  ;;  %3561 = vst [vmem:[%s4073_s17 + $0x248] sm:$0xff] %v2835_v15  ;;  %v2788_v7 = vrot.slane %v6206_v35, 7  ;;  %v2747_v59 = vmul.f32 %v6110_v24, %v3960_v43  ;;  %v2759_v28 = vmul.f32 %v6110_v24, %v3964_v44 }
 0x1ef   : > { %v6700_v30 = vrot.slane %v6124_v51, 1  ;;  %v2822_v50 = vrot.slane %v2776_v33, 1  ;;  %v2823_v41 = vrot.slane %v2779_v10, 1  ;;  %v2710_v13 = vadd.f32 %v2704_v3, %v2680_v36 }
 0x1f0   : > { %v2722_v55 = vadd.f32 %v2716_v14, %v2686_v2  ;;  %v2803_v19 = vsel %vm624_vm0, 0.0, %v2788_v7  ;;  %v2681_v54 = vmul.f32 %v6127_v21, %v4190_v16  ;;  %v2687_v5 = vmul.f32 %v6127_v21, %v4194_v23 }
 0x1f1   : > { %v2831_v61 = vsel %vm671_vm2, %v6700_v30, 0.0  ;;  %v2705_v43 = vmul.f32 %v6143_v17, %v3994_v57  ;;  %v2806_v44 = vadd.f32 %v2803_v19, %v2764_v37  ;;  %v2824_v24 = vsel %vm655_vm1, %v2822_v50, %v2823_v41  ;;  %v6257_v19 = vld [vmem:[%s3952_s9 + $0x258] sm:$0x3f] }
 0x1f2   : > { %v2753_v51 = vadd.f32 %v2747_v59, %v2710_v13  ;;  %v2765_v34 = vadd.f32 %v2759_v28, %v2722_v55  ;;  %v2717_v56 = vmul.f32 %v6143_v17, %v3997_v58  ;;  %v2748_v36 = vmul.f32 %v6161_v6, %v4004_v60 }
 0x1f3   : > { %v2711_v45 = vadd.f32 %v2705_v43, %v2681_v54  ;;  %v2760_v15 = vmul.f32 %v6161_v6, %v4027_v12  ;;  %v2836_v21 = vadd.f32 %v2824_v24, %v2806_v44  ;;  %v2832_v2 = vsel %vm671_vm2, %v2820_v32, 0.0  ;;  %v6264_v44 = vld [vmem:[%s3952_s9 + $0x288] sm:$0x3f] }
 0x1f4   : > { %v2789_v35 = vrot.slane %v2753_v51, 7  ;;  %v2682_v37 = vmul.f32 %v3547_v8, %v4251_v29  ;;  %v2723_v33 = vadd.f32 %v2717_v56, %v2687_v5  ;;  %v2688_v3 = vmul.f32 %v3547_v8, %v4255_v42 }
 0x1f5   : > { %v2754_v10 = vadd.f32 %v2748_v36, %v2711_v45  ;;  %v2706_v14 = vmul.f32 %v3553_v49, %v4051_v26  ;;  %3562 = vst [vmem:[%s4073_s17 + $0x250] sm:$0xff] %v2836_v21  ;;  %v6701_v17 = vrot.slane %v6120_v9, 7  ;;  %v2718_v12 = vmul.f32 %v3553_v49, %v4054_v27 }
 0x1f6   : > { %v2749_v6 = vmul.f32 %v3559_v0, %v4079_v62  ;;  %v2761_v32 = vmul.f32 %v3559_v0, %v4083_v63  ;;  %v2766_v28 = vadd.f32 %v2760_v15, %v2723_v33  ;;  %v2833_v13 = vsel %vm671_vm2, %v2823_v41, 0.0 }
 0x1f7   : > { %v2790_v60 = vsel %vm624_vm0, %v6701_v17, %v2789_v35  ;;  %v2791_v30 = vrot.slane %v2754_v10, 7  ;;  %v2712_v8 = vadd.f32 %v2706_v14, %v2682_v37  ;;  %v2724_v50 = vadd.f32 %v2718_v12, %v2688_v3 }
 0x1f8   : > { %v2807_v59 = vadd.f32 %v2790_v60, %v2765_v34  ;;  %v2853_v9 = vmul.f32 %v5929_v48, %v4136_v22  ;;  %v2859_v55 = vmul.f32 %v5929_v48, %v4140_v11  ;;  %v6702_v62 = vrot.slane %v6163_v4, 7 }
 0x1f9   : > { %v2755_v0 = vadd.f32 %v2749_v6, %v2712_v8  ;;  %v2865_v54 = vmul.f32 %v5929_v48, %v4147_v25  ;;  %v2767_v43 = vadd.f32 %v2761_v32, %v2724_v50  ;;  %v2868_v41 = vmul.f32 %v6257_v19, %v4147_v25  ;;  %v3571_v50 = vld [vmem:[%s3952_s9 + $0x268] sm:$0x3f] }
 0x1fa   : > { %v2837_v49 = vadd.f32 %v2831_v61, %v2807_v59  ;;  %v2792_v63 = vsel %vm624_vm0, %v6702_v62, %v2791_v30  ;;  %v2877_v4 = vmul.f32 %v6086_v31, %v3943_v38  ;;  %v2889_v24 = vmul.f32 %v6086_v31, %v3946_v39 }
 0x1fb   : > { %v2808_v5 = vadd.f32 %v2792_v63, %v2766_v28  ;;  %v2793_v61 = vrot.slane %v2755_v0, 7  ;;  %v2901_v48 = vmul.f32 %v6086_v31, %v3949_v40  ;;  %v2904_v51 = vmul.f32 %v6264_v44, %v3949_v40  ;;  %v3570_v31 = vld [vmem:[%s3952_s9 + $0x260] sm:$0x3f] }
 0x1fc   : > { %3563 = vst [vmem:[%s4073_s17 + $0x258] sm:$0x3f] %v2837_v49  ;;  %v6275_v25 = vadd.f32 %v2877_v4, %v2853_v9  ;;  %v2854_v45 = vmul.f32 %v5977_v20, %v4190_v16  ;;  %v2860_v56 = vmul.f32 %v5977_v20, %v4194_v23  ;;  %v2895_v15 = vadd.f32 %v2889_v24, %v2859_v55 }
 0x1fd   : > { %v2838_v34 = vadd.f32 %v2832_v2, %v2808_v5  ;;  %v2794_v36 = vsel %vm624_vm0, %v2788_v7, %v2793_v61  ;;  %v2907_v21 = vadd.f32 %v2901_v48, %v2865_v54  ;;  %v6282_v35 = vadd.f32 %v2904_v51, %v2868_v41  ;;  %v3576_v7 = vld [vmem:[%s3952_s9 + $0x290] sm:$0x3f]  ;;  %v3577_v54 = vld [vmem:[%s3952_s9 + $0x298] sm:$0x3f] }
 0x1fe   : > { %v2809_v37 = vadd.f32 %v2794_v36, %v2767_v43  ;;  %v2919_v40 = vrot.slane %v6275_v25, 7  ;;  %v2866_v2 = vmul.f32 %v5977_v20, %v4198_v52  ;;  %v2869_v33 = vmul.f32 %v3570_v31, %v4198_v52 }
 0x1ff   : > { %3564 = vst [vmem:[%s4073_s17 + $0x260] sm:$0x3f] %v2838_v34  ;;  %v2949_v10 = vrot.slane %v2907_v21, 1  ;;  %v2950_v3 = vrot.slane %v6282_v35, 1  ;;  %v2878_v14 = vmul.f32 %v6134_v53, %v3994_v57  ;;  %v2890_v17 = vmul.f32 %v6134_v53, %v3997_v58 }
 0x200   : > { %v2839_v60 = vadd.f32 %v2833_v13, %v2809_v37  ;;  %v2934_v12 = vsel %vm624_vm0, 0.0, %v2919_v40  ;;  %v2902_v20 = vmul.f32 %v6134_v53, %v6651_v18  ;;  %v2905_v52 = vmul.f32 %v3576_v7, %v6651_v18  ;;  %v6703_v18 = vld [vmem:[#allocation10_spill] sm:$0xff] }
 0x201   : > { %v2937_v6 = vadd.f32 %v2934_v12, %v2895_v15  ;;  %v2951_v32 = vsel %vm655_vm1, %v2949_v10, %v2950_v3  ;;  %v2884_v59 = vadd.f32 %v2878_v14, %v2854_v45  ;;  %v2896_v28 = vadd.f32 %v2890_v17, %v2860_v56 }
 0x202   : > { %3565 = vst [vmem:[%s4073_s17 + $0x268] sm:$0x3f] %v2839_v60  ;;  %v2908_v30 = vadd.f32 %v2902_v20, %v2866_v2  ;;  %v2911_v8 = vadd.f32 %v2905_v52, %v2869_v33  ;;  %v2855_v13 = vmul.f32 %v6015_v47, %v4251_v29  ;;  %v2861_v9 = vmul.f32 %v6015_v47, %v4255_v42 }
 0x203   : > { %v2967_v53 = vadd.f32 %v2951_v32, %v2937_v6  ;;  %v2920_v55 = vrot.slane %v2884_v59, 7  ;;  %v2867_v49 = vmul.f32 %v6015_v47, %v6703_v18  ;;  %v2870_v62 = vmul.f32 %v3571_v50, %v6703_v18  ;;  %v3016_v18 = vld [vmem:[%s4073_s17 + $0x30] sm:$0xff] (%p3727_p6) }
 0x204   : > { %v2952_v63 = vrot.slane %v2908_v30, 1  ;;  %v2953_v0 = vrot.slane %v2911_v8, 1  ;;  %v2879_v5 = vmul.f32 %v6187_v1, %v4051_v26  ;;  %v2891_v43 = vmul.f32 %v6187_v1, %v4054_v27  ;;  %v3004_v8 = vld [vmem:[%s4073_s17] sm:$0xff] (%p3727_p6)  ;;  %3017 = vst [vmem:[%s6366_s22 + $0x60] sm:$0xff] (%p3727_p6), %v3016_v18  ;;  %v3144_v18 = vld [vmem:[%s4073_s17 + $0x230] sm:$0xff] (%p3727_p6) }
 0x205   : > { %3578 = vst [vmem:[%s4073_s17 + $0x270] sm:$0xff] %v2967_v53  ;;  %v2935_v41 = vsel %vm624_vm0, 0.0, %v2920_v55  ;;  %v2903_v4 = vmul.f32 %v6187_v1, %v6699_v46  ;;  %v2906_v61 = vmul.f32 %v3577_v54, %v6699_v46  ;;  %v2856_v47 = vmul.f32 %v6257_v19, %v4136_v22  ;;  %v3012_v53 = vld [vmem:[%s4073_s17 + $0x20] sm:$0xff] (%p3727_p6)  ;;  %3005 = vst [vmem:[%s6366_s22] sm:$0xff] (%p3727_p6), %v3004_v8 }
 0x206   : > { %v2938_v24 = vadd.f32 %v2935_v41, %v2896_v28  ;;  %v2954_v48 = vsel %vm655_vm1, %v2952_v63, %v2953_v0  ;;  %v2885_v51 = vadd.f32 %v2879_v5, %v2855_v13  ;;  %v2897_v34 = vadd.f32 %v2891_v43, %v2861_v9  ;;  %v3008_v13 = vld [vmem:[%s4073_s17 + $0x10] sm:$0xff] (%p3727_p6)  ;;  %v3010_v9 = vld [vmem:[%s4073_s17 + $0x18] sm:$0xff] (%p3727_p6)  ;;  %3013 = vst [vmem:[%s6366_s22 + $0x38] sm:$0xff] (%p3727_p6), %v3012_v53  ;;  %v3022_v63 = vld [vmem:[%s4073_s17 + $0x48] sm:$0xff] (%p3727_p6) }
 0x207   : > { %v2909_v45 = vadd.f32 %v2903_v4, %v2867_v49  ;;  %v2912_v56 = vadd.f32 %v2906_v61, %v2870_v62  ;;  %v2862_v36 = vmul.f32 %v6257_v19, %v4140_v11  ;;  %v2880_v15 = vmul.f32 %v6264_v44, %v3943_v38  ;;  %v3018_v49 = vld [vmem:[%s4073_s17 + $0x38] sm:$0xff] (%p3727_p6)  ;;  %v3020_v62 = vld [vmem:[%s4073_s17 + $0x40] sm:$0xff] (%p3727_p6)  ;;  %3009 = vst [vmem:[%s6366_s22 + $0x10] sm:$0xff] (%p3727_p6), %v3008_v13  ;;  %v3030_v43 = vld [vmem:[%s4073_s17 + $0x68] sm:$0xff] (%p3727_p6) }
 0x208   : > { %v2968_v1 = vadd.f32 %v2954_v48, %v2938_v24  ;;  %v2921_v21 = vrot.slane %v2885_v51, 7  ;;  %v2892_v46 = vmul.f32 %v6264_v44, %v3946_v39  ;;  %v2857_v2 = vmul.f32 %v3570_v31, %v4190_v16  ;;  %3011 = vst [vmem:[%s6366_s22 + $0x30] sm:$0xff] (%p3727_p6), %v3010_v9  ;;  %3019 = vst [vmem:[%s6366_s22 + $0x68] sm:$0xff] (%p3727_p6), %v3018_v49  ;;  %v3028_v5 = vld [vmem:[%s4073_s17 + $0x60] sm:$0xff] (%p3727_p6)  ;;  %v3032_v41 = vld [vmem:[%s4073_s17 + $0x70] sm:$0xff] (%p3727_p6) }
 0x209   : > { %v2955_v22 = vrot.slane %v2909_v45, 1  ;;  %v2956_v35 = vrot.slane %v2912_v56, 1  ;;  %v2886_v37 = vadd.f32 %v2880_v15, %v2856_v47  ;;  %v2863_v14 = vmul.f32 %v3570_v31, %v4194_v23  ;;  %3021 = vst [vmem:[%s6366_s22 + $0x70] sm:$0xff] (%p3727_p6), %v3020_v62  ;;  %3023 = vst [vmem:[%s6366_s22 + $0x90] sm:$0xff] (%p3727_p6), %v3022_v63  ;;  %v3034_v4 = vld [vmem:[%s4073_s17 + $0x78] sm:$0xff] (%p3727_p6)  ;;  %v3036_v61 = vld [vmem:[%s4073_s17 + $0x80] sm:$0xff] (%p3727_p6) }
 0x20a   : > { %3579 = vst [vmem:[%s4073_s17 + $0x278] sm:$0xff] %v2968_v1  ;;  %v2936_v33 = vsel %vm624_vm0, 0.0, %v2921_v21  ;;  %v2898_v10 = vadd.f32 %v2892_v46, %v2862_v36  ;;  %v2881_v11 = vmul.f32 %v3576_v7, %v3994_v57  ;;  %v2893_v39 = vmul.f32 %v3576_v7, %v3997_v58  ;;  %3029 = vst [vmem:[%s6366_s22 + $0xc0] sm:$0xff] (%p3727_p6), %v3028_v5  ;;  %v3038_v47 = vld [vmem:[%s4073_s17 + $0x88] sm:$0xff] (%p3727_p6)  ;;  %v3040_v24 = vld [vmem:[%s4073_s17 + $0x90] sm:$0xff] (%p3727_p6) }
 0x20b   : > { %v2939_v38 = vadd.f32 %v2936_v33, %v2897_v34  ;;  %v2957_v19 = vsel %vm655_vm1, %v2955_v22, %v2956_v35  ;;  %v2922_v17 = vrot.slane %v2886_v37, 7  ;;  %v2964_v44 = vsel %vm671_vm2, %v2950_v3, 0.0  ;;  %3031 = vst [vmem:[%s6366_s22 + $0xc8] sm:$0xff] (%p3727_p6), %v3030_v43  ;;  %3033 = vst [vmem:[%s6366_s22 + $0xd0] sm:$0xff] (%p3727_p6), %v3032_v41  ;;  %v3042_v48 = vld [vmem:[%s4073_s17 + $0x98] sm:$0xff] (%p3727_p6)  ;;  %v3044_v51 = vld [vmem:[%s4073_s17 + $0xa0] sm:$0xff] (%p3727_p6) }
 0x20c   : > { %v2887_v60 = vadd.f32 %v2881_v11, %v2857_v2  ;;  %v2858_v16 = vmul.f32 %v3571_v50, %v4251_v29  ;;  %v2864_v12 = vmul.f32 %v3571_v50, %v4255_v42  ;;  %v2899_v23 = vadd.f32 %v2893_v39, %v2863_v14  ;;  %v3006_v50 = vld [vmem:[%s4073_s17 + $0x8] sm:$0xff] (%p3727_p6)  ;;  %3035 = vst [vmem:[%s6366_s22 + $0xf0] sm:$0xff] (%p3727_p6), %v3034_v4  ;;  %v3048_v45 = vld [vmem:[%s4073_s17 + $0xb0] sm:$0xff] (%p3727_p6)  ;;  %v3050_v56 = vld [vmem:[%s4073_s17 + $0xb8] sm:$0xff] (%p3727_p6) }
 0x20d   : > { %v2969_v20 = vadd.f32 %v2957_v19, %v2939_v38  ;;  %v2923_v57 = vsel %vm624_vm0, %v2919_v40, %v2922_v17  ;;  %v2882_v31 = vmul.f32 %v3577_v54, %v4051_v26  ;;  %v2894_v58 = vmul.f32 %v3577_v54, %v4054_v27  ;;  %3007 = vst [vmem:[%s6366_s22 + $0x8] sm:$0xff] (%p3727_p6), %v3006_v50  ;;  %v3026_v54 = vld [vmem:[%s4073_s17 + $0x58] sm:$0xff] (%p3727_p6)  ;;  %v3046_v34 = vld [vmem:[%s4073_s17 + $0xa8] sm:$0xff] (%p3727_p6)  ;;  %v3052_v36 = vld [vmem:[%s4073_s17 + $0xc0] sm:$0xff] (%p3727_p6) }
 0x20e   : > { %v2940_v52 = vadd.f32 %v2923_v57, %v2898_v10  ;;  %v2924_v6 = vrot.slane %v2887_v60, 7  ;;  %v2965_v7 = vsel %vm671_vm2, %v2953_v0, 0.0  ;;  %v2966_v28 = vsel %vm671_vm2, %v2956_v35, 0.0  ;;  %v3024_v0 = vld [vmem:[%s4073_s17 + $0x50] sm:$0xff] (%p3727_p6)  ;;  %3027 = vst [vmem:[%s6366_s22 + $0xa0] sm:$0xff] (%p3727_p6), %v3026_v54  ;;  %3037 = vst [vmem:[%s6366_s22 + $0xf8] sm:$0xff] (%p3727_p6), %v3036_v61 }
 0x20f   : > { %3580 = vst [vmem:[%s4073_s17 + $0x280] sm:$0xff] %v2969_v20  ;;  %v2888_v3 = vadd.f32 %v2882_v31, %v2858_v16  ;;  %v2900_v32 = vadd.f32 %v2894_v58, %v2864_v12  ;;  %3025 = vst [vmem:[%s6366_s22 + $0x98] sm:$0xff] (%p3727_p6), %v3024_v0  ;;  %v3054_v15 = vld [vmem:[%s4073_s17 + $0xc8] sm:$0xff] (%p3727_p6)  ;;  %v3056_v1 = vld [vmem:[%s4073_s17 + $0xd0] sm:$0xff] (%p3727_p6) }
 0x210   : > { %v2970_v29 = vadd.f32 %v2964_v44, %v2940_v52  ;;  %v2925_v42 = vsel %vm624_vm0, %v2920_v55, %v2924_v6  ;;  %v3014_v55 = vld [vmem:[%s4073_s17 + $0x28] sm:$0xff] (%p3727_p6)  ;;  %3039 = vst [vmem:[%s6366_s22 + $0x100] sm:$0xff] (%p3727_p6), %v3038_v47  ;;  %3041 = vst [vmem:[%s6366_s22 + $0x120] sm:$0xff] (%p3727_p6), %v3040_v24  ;;  %v3060_v46 = vld [vmem:[%s4073_s17 + $0xe0] sm:$0xff] (%p3727_p6) }
 0x211   : > { %v2941_v25 = vadd.f32 %v2925_v42, %v2899_v23  ;;  %v2926_v59 = vrot.slane %v2888_v3, 7  ;;  %3015 = vst [vmem:[%s6366_s22 + $0x40] sm:$0xff] (%p3727_p6), %v3014_v55  ;;  %3043 = vst [vmem:[%s6366_s22 + $0x128] sm:$0xff] (%p3727_p6), %v3042_v48  ;;  %v3062_v22 = vld [vmem:[%s4073_s17 + $0xe8] sm:$0xff] (%p3727_p6)  ;;  %v3064_v35 = vld [vmem:[%s4073_s17 + $0xf0] sm:$0xff] (%p3727_p6) }
 0x212   : > { %3581 = vst [vmem:[%s4073_s17 + $0x288] sm:$0x3f] %v2970_v29  ;;  %2986 = sbr.rel (!%p3727_p6) target bundleno = 564 (0x234), region = 96  ;;  %3045 = vst [vmem:[%s6366_s22 + $0x130] sm:$0xff] (%p3727_p6), %v3044_v51  ;;  %v3066_v37 = vld [vmem:[%s4073_s17 + $0xf8] sm:$0xff] (%p3727_p6)  ;;  %v3068_v2 = vld [vmem:[%s4073_s17 + $0x100] sm:$0xff] (%p3727_p6) }
 0x213   : > { %v2971_v40 = vadd.f32 %v2965_v7, %v2941_v25  ;;  %v2927_v26 = vsel %vm624_vm0, %v2921_v21, %v2926_v59  ;;  %3047 = vst [vmem:[%s6366_s22 + $0x150] sm:$0xff] (%p3727_p6), %v3046_v34  ;;  %3049 = vst [vmem:[%s6366_s22 + $0x158] sm:$0xff] (%p3727_p6), %v3048_v45  ;;  %v3058_v21 = vld [vmem:[%s4073_s17 + $0xd8] sm:$0xff] (%p3727_p6)  ;;  %v3070_v33 = vld [vmem:[%s4073_s17 + $0x108] sm:$0xff] (%p3727_p6) }
 0x214   : > { %v2942_v30 = vadd.f32 %v2927_v26, %v2900_v32  ;;  %3051 = vst [vmem:[%s6366_s22 + $0x160] sm:$0xff] (%p3727_p6), %v3050_v56  ;;  %3053 = vst [vmem:[%s6366_s22 + $0x180] sm:$0xff] (%p3727_p6), %v3052_v36  ;;  %v3072_v10 = vld [vmem:[%s4073_s17 + $0x110] sm:$0xff] (%p3727_p6)  ;;  %v3074_v14 = vld [vmem:[%s4073_s17 + $0x118] sm:$0xff] (%p3727_p6) }
 0x215   : > { %3582 = vst [vmem:[%s4073_s17 + $0x290] sm:$0x3f] %v2971_v40  ;;  %3055 = vst [vmem:[%s6366_s22 + $0x188] sm:$0xff] (%p3727_p6), %v3054_v15  ;;  %v3076_v11 = vld [vmem:[%s4073_s17 + $0x120] sm:$0xff] (%p3727_p6)  ;;  %v3078_v38 = vld [vmem:[%s4073_s17 + $0x128] sm:$0xff] (%p3727_p6) }
 0x216   : > { %v2972_v27 = vadd.f32 %v2966_v28, %v2942_v30  ;;  %3057 = vst [vmem:[%s6366_s22 + $0x190] sm:$0xff] (%p3727_p6), %v3056_v1  ;;  %3059 = vst [vmem:[%s6366_s22 + $0x1b0] sm:$0xff] (%p3727_p6), %v3058_v21  ;;  %v3080_v19 = vld [vmem:[%s4073_s17 + $0x130] sm:$0xff] (%p3727_p6)  ;;  %v3082_v17 = vld [vmem:[%s4073_s17 + $0x138] sm:$0xff] (%p3727_p6) }
 0x217   : > { %3061 = vst [vmem:[%s6366_s22 + $0x1b8] sm:$0xff] (%p3727_p6), %v3060_v46  ;;  %3063 = vst [vmem:[%s6366_s22 + $0x1c0] sm:$0xff] (%p3727_p6), %v3062_v22  ;;  %v3084_v39 = vld [vmem:[%s4073_s17 + $0x140] sm:$0xff] (%p3727_p6)  ;;  %v3086_v44 = vld [vmem:[%s4073_s17 + $0x148] sm:$0xff] (%p3727_p6) }
 0x218   : > { %3583 = vst [vmem:[%s4073_s17 + $0x298] sm:$0x3f] %v2972_v27  ;;  %3065 = vst [vmem:[%s6366_s22 + $0x1e0] sm:$0xff] (%p3727_p6), %v3064_v35  ;;  %v3088_v60 = vld [vmem:[%s4073_s17 + $0x150] sm:$0xff] (%p3727_p6)  ;;  %v3090_v16 = vld [vmem:[%s4073_s17 + $0x158] sm:$0xff] (%p3727_p6) }
 0x219   : > { %3067 = vst [vmem:[%s6366_s22 + $0x1e8] sm:$0xff] %v3066_v37  ;;  %3069 = vst [vmem:[%s6366_s22 + $0x1f0] sm:$0xff] %v3068_v2  ;;  %v3092_v12 = vld [vmem:[%s4073_s17 + $0x160] sm:$0xff]  ;;  %v3094_v20 = vld [vmem:[%s4073_s17 + $0x168] sm:$0xff] }
 0x21a   : > { %3071 = vst [vmem:[%s6366_s22 + $0x210] sm:$0xff] %v3070_v33  ;;  %3073 = vst [vmem:[%s6366_s22 + $0x218] sm:$0xff] %v3072_v10  ;;  %v3096_v57 = vld [vmem:[%s4073_s17 + $0x170] sm:$0xff]  ;;  %v3098_v23 = vld [vmem:[%s4073_s17 + $0x178] sm:$0xff] }
 0x21b   : > { %3075 = vst [vmem:[%s6366_s22 + $0x220] sm:$0xff] %v3074_v14  ;;  %3077 = vst [vmem:[%s6366_s22 + $0x240] sm:$0xff] %v3076_v11  ;;  %v3100_v31 = vld [vmem:[%s4073_s17 + $0x180] sm:$0xff]  ;;  %v3102_v52 = vld [vmem:[%s4073_s17 + $0x188] sm:$0xff] }
 0x21c   : > { %3079 = vst [vmem:[%s6366_s22 + $0x248] sm:$0xff] %v3078_v38  ;;  %3081 = vst [vmem:[%s6366_s22 + $0x250] sm:$0xff] %v3080_v19  ;;  %v3104_v6 = vld [vmem:[%s4073_s17 + $0x190] sm:$0xff]  ;;  %v3106_v58 = vld [vmem:[%s4073_s17 + $0x198] sm:$0xff] }
 0x21d   : > { %3083 = vst [vmem:[%s6366_s22 + $0x270] sm:$0xff] %v3082_v17  ;;  %3085 = vst [vmem:[%s6366_s22 + $0x278] sm:$0xff] %v3084_v39  ;;  %v3108_v3 = vld [vmem:[%s4073_s17 + $0x1a0] sm:$0xff]  ;;  %v3110_v29 = vld [vmem:[%s4073_s17 + $0x1a8] sm:$0xff] }
 0x21e   : > { %3087 = vst [vmem:[%s6366_s22 + $0x280] sm:$0xff] %v3086_v44  ;;  %3089 = vst [vmem:[%s6366_s22 + $0x2a0] sm:$0xff] %v3088_v60  ;;  %v3112_v42 = vld [vmem:[%s4073_s17 + $0x1b0] sm:$0xff]  ;;  %v3114_v7 = vld [vmem:[%s4073_s17 + $0x1b8] sm:$0xff] }
 0x21f   : > { %3091 = vst [vmem:[%s6366_s22 + $0x2a8] sm:$0xff] %v3090_v16  ;;  %3093 = vst [vmem:[%s6366_s22 + $0x2b0] sm:$0xff] %v3092_v12  ;;  %v3116_v32 = vld [vmem:[%s4073_s17 + $0x1c0] sm:$0xff]  ;;  %v3118_v25 = vld [vmem:[%s4073_s17 + $0x1c8] sm:$0xff] }
 0x220   : > { %3095 = vst [vmem:[%s6366_s22 + $0x2d0] sm:$0xff] %v3094_v20  ;;  %3097 = vst [vmem:[%s6366_s22 + $0x2d8] sm:$0xff] %v3096_v57  ;;  %v3120_v59 = vld [vmem:[%s4073_s17 + $0x1d0] sm:$0xff]  ;;  %v3122_v40 = vld [vmem:[%s4073_s17 + $0x1d8] sm:$0xff] }
 0x221   : > { %3099 = vst [vmem:[%s6366_s22 + $0x2e0] sm:$0xff] %v3098_v23  ;;  %3101 = vst [vmem:[%s6366_s22 + $0x300] sm:$0xff] %v3100_v31  ;;  %v3124_v26 = vld [vmem:[%s4073_s17 + $0x1e0] sm:$0xff]  ;;  %v3126_v28 = vld [vmem:[%s4073_s17 + $0x1e8] sm:$0xff] }
 0x222   : > { %3103 = vst [vmem:[%s6366_s22 + $0x308] sm:$0xff] %v3102_v52  ;;  %3105 = vst [vmem:[%s6366_s22 + $0x310] sm:$0xff] %v3104_v6  ;;  %v3128_v30 = vld [vmem:[%s4073_s17 + $0x1f0] sm:$0xff]  ;;  %v3130_v27 = vld [vmem:[%s4073_s17 + $0x1f8] sm:$0xff] }
 0x223   : > { %3107 = vst [vmem:[%s6366_s22 + $0x330] sm:$0xff] %v3106_v58  ;;  %3109 = vst [vmem:[%s6366_s22 + $0x338] sm:$0xff] %v3108_v3  ;;  %v3132_v8 = vld [vmem:[%s4073_s17 + $0x200] sm:$0xff]  ;;  %v3134_v50 = vld [vmem:[%s4073_s17 + $0x208] sm:$0xff] }
 0x224   : > { %3111 = vst [vmem:[%s6366_s22 + $0x340] sm:$0xff] %v3110_v29  ;;  %3113 = vst [vmem:[%s6366_s22 + $0x360] sm:$0xff] %v3112_v42  ;;  %v3136_v13 = vld [vmem:[%s4073_s17 + $0x210] sm:$0xff]  ;;  %v3138_v9 = vld [vmem:[%s4073_s17 + $0x218] sm:$0xff] }
 0x225   : > { %3115 = vst [vmem:[%s6366_s22 + $0x368] sm:$0xff] %v3114_v7  ;;  %3117 = vst [vmem:[%s6366_s22 + $0x370] sm:$0xff] %v3116_v32  ;;  %v3140_v53 = vld [vmem:[%s4073_s17 + $0x220] sm:$0xff]  ;;  %v3142_v55 = vld [vmem:[%s4073_s17 + $0x228] sm:$0xff] }
 0x226   : > { %3119 = vst [vmem:[%s6366_s22 + $0x390] sm:$0xff] %v3118_v25  ;;  %3121 = vst [vmem:[%s6366_s22 + $0x398] sm:$0xff] %v3120_v59  ;;  %v3146_v49 = vld [vmem:[%s4073_s17 + $0x238] sm:$0xff]  ;;  %v3148_v62 = vld [vmem:[%s4073_s17 + $0x240] sm:$0xff] }
 0x227   : > { %3123 = vst [vmem:[%s6366_s22 + $0x3a0] sm:$0xff] %v3122_v40  ;;  %3125 = vst [vmem:[%s6366_s22 + $0x3c0] sm:$0xff] %v3124_v26  ;;  %v3150_v63 = vld [vmem:[%s4073_s17 + $0x248] sm:$0xff]  ;;  %v3152_v0 = vld [vmem:[%s4073_s17 + $0x250] sm:$0xff] }
 0x228   : > { %3127 = vst [vmem:[%s6366_s22 + $0x3c8] sm:$0xff] %v3126_v28  ;;  %3129 = vst [vmem:[%s6366_s22 + $0x3d0] sm:$0xff] %v3128_v30  ;;  %v3154_v54 = vld [vmem:[%s4073_s17 + $0x258] sm:$0xff]  ;;  %v3156_v5 = vld [vmem:[%s4073_s17 + $0x260] sm:$0xff] }
 0x229   : > { %3131 = vst [vmem:[%s6366_s22 + $0x3f0] sm:$0xff] %v3130_v27  ;;  %3133 = vst [vmem:[%s6366_s22 + $0x3f8] sm:$0xff] %v3132_v8  ;;  %v3158_v43 = vld [vmem:[%s4073_s17 + $0x268] sm:$0xff]  ;;  %v3160_v41 = vld [vmem:[%s4073_s17 + $0x270] sm:$0xff] }
 0x22a   : > { %3135 = vst [vmem:[%s6366_s22 + $0x400] sm:$0xff] %v3134_v50  ;;  %3137 = vst [vmem:[%s6366_s22 + $0x420] sm:$0xff] %v3136_v13  ;;  %v3162_v4 = vld [vmem:[%s4073_s17 + $0x278] sm:$0xff]  ;;  %v3164_v61 = vld [vmem:[%s4073_s17 + $0x280] sm:$0xff] }
 0x22b   : > { %3139 = vst [vmem:[%s6366_s22 + $0x428] sm:$0xff] %v3138_v9  ;;  %3141 = vst [vmem:[%s6366_s22 + $0x430] sm:$0xff] %v3140_v53  ;;  %v3166_v47 = vld [vmem:[%s4073_s17 + $0x288] sm:$0xff]  ;;  %v3168_v24 = vld [vmem:[%s4073_s17 + $0x290] sm:$0xff] }
 0x22c   : > { %3143 = vst [vmem:[%s6366_s22 + $0x450] sm:$0xff] %v3142_v55  ;;  %3145 = vst [vmem:[%s6366_s22 + $0x458] sm:$0xff] %v3144_v18  ;;  %v3170_v48 = vld [vmem:[%s4073_s17 + $0x298] sm:$0xff] }
 0x22d   : > { %3147 = vst [vmem:[%s6366_s22 + $0x460] sm:$0xff] %v3146_v49  ;;  %3149 = vst [vmem:[%s6366_s22 + $0x480] sm:$0xff] %v3148_v62 }
 0x22e   : > { %3151 = vst [vmem:[%s6366_s22 + $0x488] sm:$0xff] %v3150_v63  ;;  %3153 = vst [vmem:[%s6366_s22 + $0x490] sm:$0xff] %v3152_v0 }
 0x22f   : > { %3155 = vst [vmem:[%s6366_s22 + $0x4b0] sm:$0xff] %v3154_v54  ;;  %3157 = vst [vmem:[%s6366_s22 + $0x4b8] sm:$0xff] %v3156_v5 }
 0x230   : > { %3159 = vst [vmem:[%s6366_s22 + $0x4c0] sm:$0xff] %v3158_v43  ;;  %3161 = vst [vmem:[%s6366_s22 + $0x4e0] sm:$0xff] %v3160_v41 }
 0x231   : > { %3163 = vst [vmem:[%s6366_s22 + $0x4e8] sm:$0xff] %v3162_v4  ;;  %3165 = vst [vmem:[%s6366_s22 + $0x4f0] sm:$0xff] %v3164_v61 }
 0x232   : > { %3167 = vst [vmem:[%s6366_s22 + $0x510] sm:$0xff] %v3166_v47  ;;  %3169 = vst [vmem:[%s6366_s22 + $0x518] sm:$0xff] %v3168_v24 }
 0x233   : > { %3171 = vst [vmem:[%s6366_s22 + $0x520] sm:$0xff] %v3170_v48 }
 0x234 PF: > { %s12_s13 = sadd.s32 1, %s3671_s13   ;;  %s6704_s9 = smov %s3659_s10 }
 0x235   : > { %p9_p11 = scmp.ge.s32.totalorder %s12_s13, 4   ;;  %s6705_s10 = smov %s3732_s20 }
 0x236   : > { %s6706_s11 = smov %s3667_s12  ;;  %s6707_s12 = smov %s6709_s14 }
 0x237   :  { %11 = sbr.rel (!%p9_p11) target bundleno = 3 (0x3), region = 192 }

</bundles_post_ra>
